<compile_context>
chip_gen: v6e
topology: v6e:2x2x1
jax: 0.10.0
libtpu: 0.0.40
codegen_flags: <defaults>
</compile_context>

<pallas_src>
import functools

import jax
import jax.numpy as jnp
from jax.experimental import pallas as pl
from jax.experimental.pallas import tpu as pltpu

_VMEM_LIMIT = 32 * 1024 * 1024  # fits v5e/v6e (128 MiB) and v7x (64 MiB) VMEM


def _round_up(x, m):
    return (x + m - 1) // m * m


# ----------------------------------------------------------------------------
# Tiled matmul + bias + activation (the conv / linear hot path)
# ----------------------------------------------------------------------------
def _matmul_bias_act_kernel(x_ref, w_ref, b_ref, o_ref, acc_ref, *, act):
    @pl.when(pl.program_id(2) == 0)
    def _init():
        acc_ref[...] = jnp.zeros_like(acc_ref)

    acc_ref[...] += jnp.dot(x_ref[...], w_ref[...],
                            preferred_element_type=jnp.float32)

    @pl.when(pl.program_id(2) == pl.num_programs(2) - 1)
    def _finalize():
        acc = acc_ref[...] + b_ref[...]
        if act == "relu":
            acc = jnp.maximum(acc, 0.0)
        elif act == "leaky":
            acc = jnp.where(acc >= 0.0, acc, 0.2 * acc)
        o_ref[...] = acc


def _pallas_matmul(x, w, b, act="none"):
    """y = act(x @ w + b), bf16 MXU operands, f32 accumulation.

    Returns shape (M, Np) with the lane (N) axis zero-padded to a multiple of
    128 so the kernel's output stores are lane-dense.
    """
    M, K = x.shape
    K2, N = w.shape
    assert K == K2

    tm = min(256, _round_up(M, 8))
    tn = min(256, _round_up(N, 128))
    k128 = _round_up(K, 128)
    if k128 <= 1024:
        tk, Kp = k128, k128
    else:
        tk, Kp = 512, _round_up(K, 512)
    Mp = _round_up(M, tm)
    Np = _round_up(N, tn)

    if (Mp, Kp) != (M, K):
        x = jnp.pad(x, ((0, Mp - M), (0, Kp - K)))
    if (Kp, Np) != (K, N):
        w = jnp.pad(w, ((0, Kp - K), (0, Np - N)))
    xp = x.astype(jnp.bfloat16)
    wp = w.astype(jnp.bfloat16)
    bp = jnp.pad(b.astype(jnp.float32), (0, Np - N)).reshape(1, Np)

    grid = (Mp // tm, Np // tn, Kp // tk)
    cost = pl.CostEstimate(
        flops=2 * Mp * Np * Kp,
        transcendentals=0,
        bytes_accessed=Mp * Kp * 2 + Kp * Np * 2 + Mp * Np * 4 + Np * 4,
    )

    y = pl.pallas_call(
        functools.partial(_matmul_bias_act_kernel, act=act),
        out_shape=jax.ShapeDtypeStruct((Mp, Np), jnp.float32),
        grid_spec=pltpu.PrefetchScalarGridSpec(
            num_scalar_prefetch=0,
            grid=grid,
            in_specs=[
                pl.BlockSpec((tm, tk), lambda i, j, k: (i, k)),
                pl.BlockSpec((tk, tn), lambda i, j, k: (k, j)),
                pl.BlockSpec((1, tn), lambda i, j, k: (0, j)),
            ],
            out_specs=pl.BlockSpec((tm, tn), lambda i, j, k: (i, j)),
            scratch_shapes=[pltpu.VMEM((tm, tn), jnp.float32)],
        ),
        compiler_params=pltpu.CompilerParams(
            dimension_semantics=("parallel", "parallel", "arbitrary"),
            vmem_limit_bytes=_VMEM_LIMIT,
        ),
        cost_estimate=cost,
    )(xp, wp, bp)
    return y[:M] if Mp != M else y


def matmul_bias_act(x, w, b, act="none"):
    """Unpadded convenience wrapper (slices the lane padding off)."""
    y = _pallas_matmul(x, w, b, act=act)
    n = w.shape[1]
    return y[:, :n] if y.shape[1] != n else y


# ----------------------------------------------------------------------------
# Tiled training-mode BatchNorm: stats accumulation + normalize-apply kernels
# ----------------------------------------------------------------------------
def _bn_stats_kernel(x_ref, s_ref, ss_ref):
    @pl.when(pl.program_id(0) == 0)
    def _init():
        s_ref[...] = jnp.zeros_like(s_ref)
        ss_ref[...] = jnp.zeros_like(ss_ref)

    x = x_ref[...]
    s_ref[...] += jnp.sum(x, axis=0, keepdims=True)
    ss_ref[...] += jnp.sum(x * x, axis=0, keepdims=True)


def _bn_apply_kernel(x_ref, scale_ref, shift_ref, o_ref, *, co):
    y = x_ref[...] * scale_ref[...] + shift_ref[...]
    o_ref[...] = y[:, :co]


def batchnorm(x2d, gamma, beta, eps, co):
    """x2d: (R, Cp) lane-padded activations; returns (R, co) normalized."""
    R, Cp = x2d.shape
    gamma_p = jnp.pad(gamma.astype(jnp.float32), (0, Cp - co),
                      constant_values=1.0)
    beta_p = jnp.pad(beta.astype(jnp.float32), (0, Cp - co))

    tr = min(256, _round_up(R, 8))
    Rp = _round_up(R, tr)
    xp = x2d if Rp == R else jnp.pad(x2d, ((0, Rp - R), (0, 0)))

    sums, sumsqs = pl.pallas_call(
        _bn_stats_kernel,
        out_shape=(jax.ShapeDtypeStruct((1, Cp), jnp.float32),
                   jax.ShapeDtypeStruct((1, Cp), jnp.float32)),
        grid=(Rp // tr,),
        in_specs=[pl.BlockSpec((tr, Cp), lambda i: (i, 0))],
        out_specs=(pl.BlockSpec((1, Cp), lambda i: (0, 0)),
                   pl.BlockSpec((1, Cp), lambda i: (0, 0))),
        compiler_params=pltpu.CompilerParams(
            dimension_semantics=("arbitrary",),
            vmem_limit_bytes=_VMEM_LIMIT,
        ),
    )(xp)

    # Per-channel (128-wide) glue math on the statistics.
    mean = sums / R
    var = jnp.maximum(sumsqs / R - mean * mean, 0.0)  # biased var (train mode)
    scale = gamma_p.reshape(1, Cp) * jax.lax.rsqrt(var + eps)
    shift = beta_p.reshape(1, Cp) - mean * scale

    y = pl.pallas_call(
        functools.partial(_bn_apply_kernel, co=co),
        out_shape=jax.ShapeDtypeStruct((Rp, co), jnp.float32),
        grid=(Rp // tr,),
        in_specs=[pl.BlockSpec((tr, Cp), lambda i: (i, 0)),
                  pl.BlockSpec((1, Cp), lambda i: (0, 0)),
                  pl.BlockSpec((1, Cp), lambda i: (0, 0))],
        out_specs=pl.BlockSpec((tr, co), lambda i: (i, 0)),
        compiler_params=pltpu.CompilerParams(
            dimension_semantics=("parallel",),
            vmem_limit_bytes=_VMEM_LIMIT,
        ),
    )(xp, scale, shift)
    return y[:R] if Rp != R else y


# ----------------------------------------------------------------------------
# Glue (layout plumbing in plain JAX)
# ----------------------------------------------------------------------------
def im2col(x_nhwc, k, stride, pad):
    N, H, W, C = x_nhwc.shape
    xp = jnp.pad(x_nhwc, ((0, 0), (pad, pad), (pad, pad), (0, 0)))
    HO = (H + 2 * pad - k) // stride + 1
    WO = (W + 2 * pad - k) // stride + 1
    cols = []
    for kh in range(k):
        for kw in range(k):
            cols.append(
                jax.lax.slice(
                    xp,
                    (0, kh, kw, 0),
                    (N, kh + (HO - 1) * stride + 1,
                     kw + (WO - 1) * stride + 1, C),
                    (1, stride, stride, 1),
                )
            )
    cols = jnp.stack(cols, axis=-2)  # (N, HO, WO, k*k, C)
    return cols.reshape(N * HO * WO, k * k * C), HO, WO


def conv2d_padded(x_nhwc, w_hwio, b, stride, pad, act="none"):
    """Conv as im2col + Pallas matmul. Returns a 2-D slab (N*HO*WO, Cp) with
    the channel axis zero-padded to a lane-dense multiple of 128."""
    k, _, ci, co = w_hwio.shape
    cols, HO, WO = im2col(x_nhwc, k, stride, pad)
    wmat = w_hwio.reshape(k * k * ci, co)
    y = _pallas_matmul(cols, wmat, b, act=act)
    return y, HO, WO


def upsample2x(x_nhwc):  # nearest-neighbor, scale_factor=2
    return jnp.repeat(jnp.repeat(x_nhwc, 2, axis=1), 2, axis=2)


# ----------------------------------------------------------------------------
# Parameters (deterministic synthetic init)
# ----------------------------------------------------------------------------
def init_params(key, nc, nef, ndf, nz, isize):
    out_size = isize // 16
    keys = iter(jax.random.split(key, 64))

    def w_conv(k, ci, co):
        return 0.05 * jax.random.normal(next(keys), (k, k, ci, co), jnp.float32)

    def bias(n):
        return 0.01 * jax.random.normal(next(keys), (n,), jnp.float32)

    def lin(i, o):
        return 0.05 * jax.random.normal(next(keys), (i, o), jnp.float32)

    p = {}
    enc_ch = [nc, nef, nef * 2, nef * 4, nef * 8]
    p["enc_conv"] = []
    for l in range(4):
        p["enc_conv"].append(dict(
            w=w_conv(4, enc_ch[l], enc_ch[l + 1]),
            b=bias(enc_ch[l + 1]),
            gamma=1.0 + 0.01 * jax.random.normal(
                next(keys), (enc_ch[l + 1],), jnp.float32),
            beta=0.01 * jax.random.normal(
                next(keys), (enc_ch[l + 1],), jnp.float32),
        ))
    feat = nef * 8 * out_size * out_size
    p["mean_w"], p["mean_b"] = lin(feat, nz), bias(nz)
    p["logvar_w"], p["logvar_b"] = lin(feat, nz), bias(nz)

    dfeat = ndf * 8 * out_size * out_size
    p["dec_dense_w"], p["dec_dense_b"] = lin(nz, dfeat), bias(dfeat)
    dec_ch = [ndf * 8, ndf * 4, ndf * 2, ndf, nc]
    p["dec_conv"] = []
    for l in range(4):
        d = dict(w=w_conv(3, dec_ch[l], dec_ch[l + 1]), b=bias(dec_ch[l + 1]))
        if l < 3:
            d["gamma"] = 1.0 + 0.01 * jax.random.normal(
                next(keys), (dec_ch[l + 1],), jnp.float32)
            d["beta"] = 0.01 * jax.random.normal(
                next(keys), (dec_ch[l + 1],), jnp.float32)
        p["dec_conv"].append(d)
    return p


# ----------------------------------------------------------------------------
# VAE forward (Encoder -> reparametrize -> Decoder)
# ----------------------------------------------------------------------------
def vae_forward(params, x_nchw, eps_noise, *, nef, ndf, nz, isize):
    N = x_nchw.shape[0]
    out_size = isize // 16

    # ----- Encoder: [Conv4x4/s2 -> LeakyReLU(0.2) -> BatchNorm(1e-5)] x 4 ----
    h = jnp.transpose(x_nchw, (0, 2, 3, 1))            # NCHW -> NHWC (once)
    for layer in params["enc_conv"]:
        co = layer["w"].shape[-1]
        y2d, HO, WO = conv2d_padded(h, layer["w"], layer["b"],
                                    stride=2, pad=1, act="leaky")
        y2d = batchnorm(y2d, layer["gamma"], layer["beta"], eps=1e-5, co=co)
        h = y2d.reshape(N, HO, WO, co)

    # ----- Flatten + mean / logvar linears ----------------------------------
    # PyTorch flattens NCHW; instead of transposing the activation we permute
    # the Linear weight rows once (chw-order -> hwc-order): mathematically
    # identical, no full-tensor transpose pass over the activations.
    C, Hs, Ws = nef * 8, out_size, out_size
    h2 = h.reshape(N, Hs * Ws * C)

    def perm_rows(w):
        return (w.reshape(C, Hs, Ws, -1).transpose(1, 2, 0, 3)
                 .reshape(Hs * Ws * C, -1))

    mean = matmul_bias_act(h2, perm_rows(params["mean_w"]), params["mean_b"])
    logvar = matmul_bias_act(h2, perm_rows(params["logvar_w"]),
                             params["logvar_b"])

    # Reparametrize: tiny elementwise op, inlined (no kernel-launch overhead).
    z = mean + jnp.exp(0.5 * logvar) * eps_noise

    # ----- Decoder dense (+ReLU); weight columns pre-permuted to NHWC order --
    Cd = ndf * 8
    w_d = (params["dec_dense_w"].reshape(nz, Cd, out_size, out_size)
           .transpose(0, 2, 3, 1).reshape(nz, -1))
    b_d = (params["dec_dense_b"].reshape(Cd, out_size, out_size)
           .transpose(1, 2, 0).reshape(-1))
    d = matmul_bias_act(z, w_d, b_d, act="relu").reshape(
        N, out_size, out_size, Cd)

    # ----- Decoder: [Up2x -> Conv3x3 -> LeakyReLU -> BN(1e-3)] x3 + final conv
    for li, layer in enumerate(params["dec_conv"]):
        d = upsample2x(d)  # TODO(synk): fuse upsample into conv index_map
        co = layer["w"].shape[-1]
        act = "leaky" if li < 3 else "none"
        y2d, HO, WO = conv2d_padded(d, layer["w"], layer["b"],
                                    stride=1, pad=1, act=act)
        if li < 3:
            y2d = batchnorm(y2d, layer["gamma"], layer["beta"], eps=1e-3, co=co)
        else:
            y2d = y2d[:, :co]
        d = y2d.reshape(N, HO, WO, co)

    rec_x = jnp.transpose(d, (0, 3, 1, 2))             # NHWC -> NCHW
    return rec_x, mean, logvar


# ----------------------------------------------------------------------------
if __name__ == "__main__":
    # Small shapes consistent with the module (isize must be divisible by 16).
    nc, nef, ndf, nz, isize, batch = 3, 8, 8, 16, 32, 2

    key = jax.random.PRNGKey(0)
    kx, keps, kp = jax.random.split(key, 3)
    x = jax.random.normal(kx, (batch, nc, isize, isize), jnp.float32)
    eps = jax.random.normal(keps, (batch, nz), jnp.float32)  # reparam noise
    params = init_params(kp, nc, nef, ndf, nz, isize)

    fwd = jax.jit(functools.partial(vae_forward, nef=nef, ndf=ndf, nz=nz,
                                    isize=isize))
    rec_x, mean, logvar = fwd(params, x, eps)
    jax.block_until_ready((rec_x, mean, logvar))

    assert rec_x.shape == (batch, nc, isize, isize)
    assert mean.shape == (batch, nz)
    assert logvar.shape == (batch, nz)
    assert bool(jnp.all(jnp.isfinite(rec_x)))
    print("KERNEL_OK")
</pallas_src>

<mosaic_0001>
module attributes {stable_mosaic.version = 11 : i64} {
  func.func @_matmul_bias_act_kernel(%arg0: i32, %arg1: i32, %arg2: i32, %arg3: memref<256x128xbf16, #tpu.memory_space<vmem>>, %arg4: memref<128x128xbf16, #tpu.memory_space<vmem>>, %arg5: memref<1x128xf32, #tpu.memory_space<vmem>>, %arg6: memref<256x128xf32, #tpu.memory_space<vmem>>, %arg7: memref<256x128xf32, #tpu.memory_space<vmem>>) attributes {dimension_semantics = [#tpu.dimension_semantics<parallel>, #tpu.dimension_semantics<parallel>, #tpu.dimension_semantics<arbitrary>], iteration_bounds = array<i64: 2, 1, 1>, scalar_prefetch = 0 : i64, scratch_operands = 1 : i64, tpu.core_type = #tpu.core_type<tc>, window_params = [{transform_indices = @transform_0, window_bounds = array<i64: 256, 128>}, {transform_indices = @transform_1, window_bounds = array<i64: 128, 128>}, {transform_indices = @transform_2, window_bounds = array<i64: 1, 128>}, {transform_indices = @transform_3, window_bounds = array<i64: 256, 128>}]} {
    %c0_i32 = arith.constant 0 : i32
    %0 = arith.cmpi eq, %arg2, %c0_i32 : i32
    %1 = arith.extui %0 : i1 to i32
    %c0_i32_0 = arith.constant 0 : i32
    %2 = arith.cmpi ne, %1, %c0_i32_0 : i32
    scf.if %2 {
      %cst_10 = arith.constant 0.000000e+00 : f32
      %12 = vector.broadcast %cst_10 : f32 to vector<256x128xf32>
      %c0_11 = arith.constant 0 : index
      %c0_12 = arith.constant 0 : index
      %13 = vector.load %arg7[%c0_11, %c0_12] : memref<256x128xf32, #tpu.memory_space<vmem>>, vector<256x128xf32>
      tpu.vector_store %arg7[%c0_11, %c0_12], %12 {strides = array<i32>} : memref<256x128xf32, #tpu.memory_space<vmem>>, vector<256x128xf32>,
    } else {
    }
    %c0 = arith.constant 0 : index
    %c0_1 = arith.constant 0 : index
    %3 = vector.load %arg7[%c0, %c0_1] : memref<256x128xf32, #tpu.memory_space<vmem>>, vector<256x128xf32>
    %c0_2 = arith.constant 0 : index
    %c0_3 = arith.constant 0 : index
    %4 = vector.load %arg3[%c0_2, %c0_3] : memref<256x128xbf16, #tpu.memory_space<vmem>>, vector<256x128xbf16>
    %c0_4 = arith.constant 0 : index
    %c0_5 = arith.constant 0 : index
    %5 = vector.load %arg4[%c0_4, %c0_5] : memref<128x128xbf16, #tpu.memory_space<vmem>>, vector<128x128xbf16>
    %cst = arith.constant dense<0.000000e+00> : vector<256x128xf32>
    %6 = tpu.matmul %4, %5, %cst {dimension_numbers = #tpu.dot_dimension_numbers<[1], [0], [0], [1], [0, 0, 1, 1], [], []>} : vector<256x128xbf16>, vector<128x128xbf16>, vector<256x128xf32> -> vector<256x128xf32>
    %7 = arith.addf %3, %6 : vector<256x128xf32>
    %c0_6 = arith.constant 0 : index
    %c0_7 = arith.constant 0 : index
    %8 = vector.load %arg7[%c0_6, %c0_7] : memref<256x128xf32, #tpu.memory_space<vmem>>, vector<256x128xf32>
    tpu.vector_store %arg7[%c0_6, %c0_7], %7 {strides = array<i32>} : memref<256x128xf32, #tpu.memory_space<vmem>>, vector<256x128xf32>,
    %c0_i32_8 = arith.constant 0 : i32
    %9 = arith.cmpi eq, %arg2, %c0_i32_8 : i32
    %10 = arith.extui %9 : i1 to i32
    %c0_i32_9 = arith.constant 0 : i32
    %11 = arith.cmpi ne, %10, %c0_i32_9 : i32
    scf.if %11 {
      %c0_10 = arith.constant 0 : index
      %c0_11 = arith.constant 0 : index
      %12 = vector.load %arg7[%c0_10, %c0_11] : memref<256x128xf32, #tpu.memory_space<vmem>>, vector<256x128xf32>
      %c0_12 = arith.constant 0 : index
      %c0_13 = arith.constant 0 : index
      %13 = vector.load %arg5[%c0_12, %c0_13] : memref<1x128xf32, #tpu.memory_space<vmem>>, vector<1x128xf32>
      %14 = vector.broadcast %13 : vector<1x128xf32> to vector<256x128xf32>
      %15 = arith.addf %12, %14 : vector<256x128xf32>
      %cst_14 = arith.constant 0.000000e+00 : f32
      %16 = vector.broadcast %cst_14 : f32 to vector<256x128xf32>
      %17 = arith.cmpf oge, %15, %16 : vector<256x128xf32>
      %cst_15 = arith.constant 2.000000e-01 : f32
      %18 = vector.broadcast %cst_15 : f32 to vector<256x128xf32>
      %19 = arith.mulf %18, %15 : vector<256x128xf32>
      %20 = arith.select %17, %15, %19 : vector<256x128xi1>, vector<256x128xf32>
      %c0_16 = arith.constant 0 : index
      %c0_17 = arith.constant 0 : index
      %21 = vector.load %arg6[%c0_16, %c0_17] : memref<256x128xf32, #tpu.memory_space<vmem>>, vector<256x128xf32>
      tpu.vector_store %arg6[%c0_16, %c0_17], %20 {strides = array<i32>} : memref<256x128xf32, #tpu.memory_space<vmem>>, vector<256x128xf32>,
    } else {
    }
    return
  }
  func.func @transform_0(%arg0: i32, %arg1: i32, %arg2: i32) -> (i32, i32) {
    %c0_i32 = arith.constant 0 : i32
    return %arg0, %arg2 : i32, i32
  }
  func.func @transform_1(%arg0: i32, %arg1: i32, %arg2: i32) -> (i32, i32) {
    %c0_i32 = arith.constant 0 : i32
    return %arg2, %arg1 : i32, i32
  }
  func.func @transform_2(%arg0: i32, %arg1: i32, %arg2: i32) -> (i32, i32) {
    %c0_i32 = arith.constant 0 : i32
    %c0_i32_0 = arith.constant 0 : i32
    return %c0_i32, %arg1 : i32, i32
  }
  func.func @transform_3(%arg0: i32, %arg1: i32, %arg2: i32) -> (i32, i32) {
    %c0_i32 = arith.constant 0 : i32
    return %arg0, %arg1 : i32, i32
  }
}

module attributes {stable_mosaic.version = 11 : i64} {
  func.func @_bn_stats_kernel(%arg0: i32, %arg1: memref<256x128xf32, #tpu.memory_space<vmem>>, %arg2: memref<1x128xf32, #tpu.memory_space<vmem>>, %arg3: memref<1x128xf32, #tpu.memory_space<vmem>>) attributes {dimension_semantics = [#tpu.dimension_semantics<arbitrary>], iteration_bounds = array<i64: 2>, scalar_prefetch = 0 : i64, scratch_operands = 0 : i64, tpu.core_type = #tpu.core_type<tc>, window_params = [{transform_indices = @transform_0, window_bounds = array<i64: 256, 128>}, {pipeline_mode = #tpu.pipeline_mode<synchronous>, transform_indices = @transform_1, window_bounds = array<i64: 1, 128>}, {pipeline_mode = #tpu.pipeline_mode<synchronous>, transform_indices = @transform_2, window_bounds = array<i64: 1, 128>}]} {
    %c0_i32 = arith.constant 0 : i32
    %0 = arith.cmpi eq, %arg0, %c0_i32 : i32
    %1 = arith.extui %0 : i1 to i32
    %c0_i32_0 = arith.constant 0 : i32
    %2 = arith.cmpi ne, %1, %c0_i32_0 : i32
    scf.if %2 {
      %cst_11 = arith.constant 0.000000e+00 : f32
      %15 = vector.broadcast %cst_11 : f32 to vector<1x128xf32>
      %c0_12 = arith.constant 0 : index
      %c0_13 = arith.constant 0 : index
      %16 = vector.load %arg2[%c0_12, %c0_13] : memref<1x128xf32, #tpu.memory_space<vmem>>, vector<1x128xf32>
      tpu.vector_store %arg2[%c0_12, %c0_13], %15 {strides = array<i32>} : memref<1x128xf32, #tpu.memory_space<vmem>>, vector<1x128xf32>,
      %cst_14 = arith.constant 0.000000e+00 : f32
      %17 = vector.broadcast %cst_14 : f32 to vector<1x128xf32>
      %c0_15 = arith.constant 0 : index
      %c0_16 = arith.constant 0 : index
      %18 = vector.load %arg3[%c0_15, %c0_16] : memref<1x128xf32, #tpu.memory_space<vmem>>, vector<1x128xf32>
      tpu.vector_store %arg3[%c0_15, %c0_16], %17 {strides = array<i32>} : memref<1x128xf32, #tpu.memory_space<vmem>>, vector<1x128xf32>,
    } else {
    }
    %c0 = arith.constant 0 : index
    %c0_1 = arith.constant 0 : index
    %3 = vector.load %arg1[%c0, %c0_1] : memref<256x128xf32, #tpu.memory_space<vmem>>, vector<256x128xf32>
    %c0_2 = arith.constant 0 : index
    %c0_3 = arith.constant 0 : index
    %4 = vector.load %arg2[%c0_2, %c0_3] : memref<1x128xf32, #tpu.memory_space<vmem>>, vector<1x128xf32>
    %cst = arith.constant dense<0.000000e+00> : vector<128xf32>
    %5 = vector.multi_reduction <add>, %3, %cst [0] : vector<256x128xf32> to vector<128xf32>
    %6 = vector.shape_cast %5 : vector<128xf32> to vector<1x128xf32>
    %7 = arith.addf %4, %6 : vector<1x128xf32>
    %c0_4 = arith.constant 0 : index
    %c0_5 = arith.constant 0 : index
    %8 = vector.load %arg2[%c0_4, %c0_5] : memref<1x128xf32, #tpu.memory_space<vmem>>, vector<1x128xf32>
    tpu.vector_store %arg2[%c0_4, %c0_5], %7 {strides = array<i32>} : memref<1x128xf32, #tpu.memory_space<vmem>>, vector<1x128xf32>,
    %c0_6 = arith.constant 0 : index
    %c0_7 = arith.constant 0 : index
    %9 = vector.load %arg3[%c0_6, %c0_7] : memref<1x128xf32, #tpu.memory_space<vmem>>, vector<1x128xf32>
    %10 = arith.mulf %3, %3 : vector<256x128xf32>
    %cst_8 = arith.constant dense<0.000000e+00> : vector<128xf32>
    %11 = vector.multi_reduction <add>, %10, %cst_8 [0] : vector<256x128xf32> to vector<128xf32>
    %12 = vector.shape_cast %11 : vector<128xf32> to vector<1x128xf32>
    %13 = arith.addf %9, %12 : vector<1x128xf32>
    %c0_9 = arith.constant 0 : index
    %c0_10 = arith.constant 0 : index
    %14 = vector.load %arg3[%c0_9, %c0_10] : memref<1x128xf32, #tpu.memory_space<vmem>>, vector<1x128xf32>
    tpu.vector_store %arg3[%c0_9, %c0_10], %13 {strides = array<i32>} : memref<1x128xf32, #tpu.memory_space<vmem>>, vector<1x128xf32>,
    return
  }
  func.func @transform_0(%arg0: i32) -> (i32, i32) {
    %c0_i32 = arith.constant 0 : i32
    %c0_i32_0 = arith.constant 0 : i32
    return %arg0, %c0_i32 : i32, i32
  }
  func.func @transform_1(%arg0: i32) -> (i32, i32) {
    %c0_i32 = arith.constant 0 : i32
    %c0_i32_0 = arith.constant 0 : i32
    %c0_i32_1 = arith.constant 0 : i32
    return %c0_i32, %c0_i32_0 : i32, i32
  }
  func.func @transform_2(%arg0: i32) -> (i32, i32) {
    %c0_i32 = arith.constant 0 : i32
    %c0_i32_0 = arith.constant 0 : i32
    %c0_i32_1 = arith.constant 0 : i32
    return %c0_i32, %c0_i32_0 : i32, i32
  }
}

module attributes {stable_mosaic.version = 11 : i64} {
  func.func @_bn_apply_kernel(%arg0: i32, %arg1: memref<256x128xf32, #tpu.memory_space<vmem>>, %arg2: memref<1x128xf32, #tpu.memory_space<vmem>>, %arg3: memref<1x128xf32, #tpu.memory_space<vmem>>, %arg4: memref<256x8xf32, #tpu.memory_space<vmem>>) attributes {dimension_semantics = [#tpu.dimension_semantics<parallel>], iteration_bounds = array<i64: 2>, scalar_prefetch = 0 : i64, scratch_operands = 0 : i64, tpu.core_type = #tpu.core_type<tc>, window_params = [{transform_indices = @transform_0, window_bounds = array<i64: 256, 128>}, {pipeline_mode = #tpu.pipeline_mode<synchronous>, transform_indices = @transform_1, window_bounds = array<i64: 1, 128>}, {pipeline_mode = #tpu.pipeline_mode<synchronous>, transform_indices = @transform_2, window_bounds = array<i64: 1, 128>}, {transform_indices = @transform_3, window_bounds = array<i64: 256, 8>}]} {
    %c0 = arith.constant 0 : index
    %c0_0 = arith.constant 0 : index
    %0 = vector.load %arg1[%c0, %c0_0] : memref<256x128xf32, #tpu.memory_space<vmem>>, vector<256x128xf32>
    %c0_1 = arith.constant 0 : index
    %c0_2 = arith.constant 0 : index
    %1 = vector.load %arg2[%c0_1, %c0_2] : memref<1x128xf32, #tpu.memory_space<vmem>>, vector<1x128xf32>
    %2 = vector.broadcast %1 : vector<1x128xf32> to vector<256x128xf32>
    %3 = arith.mulf %0, %2 : vector<256x128xf32>
    %c0_3 = arith.constant 0 : index
    %c0_4 = arith.constant 0 : index
    %4 = vector.load %arg3[%c0_3, %c0_4] : memref<1x128xf32, #tpu.memory_space<vmem>>, vector<1x128xf32>
    %5 = vector.broadcast %4 : vector<1x128xf32> to vector<256x128xf32>
    %6 = arith.addf %3, %5 : vector<256x128xf32>
    %7 = vector.extract_strided_slice %6 {offsets = [0, 0], sizes = [256, 8], strides = [1, 1]} : vector<256x128xf32> to vector<256x8xf32>
    %c0_5 = arith.constant 0 : index
    %c0_6 = arith.constant 0 : index
    %8 = vector.load %arg4[%c0_5, %c0_6] : memref<256x8xf32, #tpu.memory_space<vmem>>, vector<256x8xf32>
    tpu.vector_store %arg4[%c0_5, %c0_6], %7 {strides = array<i32>} : memref<256x8xf32, #tpu.memory_space<vmem>>, vector<256x8xf32>,
    return
  }
  func.func @transform_0(%arg0: i32) -> (i32, i32) {
    %c0_i32 = arith.constant 0 : i32
    %c0_i32_0 = arith.constant 0 : i32
    return %arg0, %c0_i32 : i32, i32
  }
  func.func @transform_1(%arg0: i32) -> (i32, i32) {
    %c0_i32 = arith.constant 0 : i32
    %c0_i32_0 = arith.constant 0 : i32
    %c0_i32_1 = arith.constant 0 : i32
    return %c0_i32, %c0_i32_0 : i32, i32
  }
  func.func @transform_2(%arg0: i32) -> (i32, i32) {
    %c0_i32 = arith.constant 0 : i32
    %c0_i32_0 = arith.constant 0 : i32
    %c0_i32_1 = arith.constant 0 : i32
    return %c0_i32, %c0_i32_0 : i32, i32
  }
  func.func @transform_3(%arg0: i32) -> (i32, i32) {
    %c0_i32 = arith.constant 0 : i32
    %c0_i32_0 = arith.constant 0 : i32
    return %arg0, %c0_i32 : i32, i32
  }
}

module attributes {stable_mosaic.version = 11 : i64} {
  func.func @_matmul_bias_act_kernel(%arg0: i32, %arg1: i32, %arg2: i32, %arg3: memref<128x128xbf16, #tpu.memory_space<vmem>>, %arg4: memref<128x128xbf16, #tpu.memory_space<vmem>>, %arg5: memref<1x128xf32, #tpu.memory_space<vmem>>, %arg6: memref<128x128xf32, #tpu.memory_space<vmem>>, %arg7: memref<128x128xf32, #tpu.memory_space<vmem>>) attributes {dimension_semantics = [#tpu.dimension_semantics<parallel>, #tpu.dimension_semantics<parallel>, #tpu.dimension_semantics<arbitrary>], iteration_bounds = array<i64: 1, 1, 1>, scalar_prefetch = 0 : i64, scratch_operands = 1 : i64, tpu.core_type = #tpu.core_type<tc>, window_params = [{transform_indices = @transform_0, window_bounds = array<i64: 128, 128>}, {transform_indices = @transform_1, window_bounds = array<i64: 128, 128>}, {transform_indices = @transform_2, window_bounds = array<i64: 1, 128>}, {transform_indices = @transform_3, window_bounds = array<i64: 128, 128>}]} {
    %c0_i32 = arith.constant 0 : i32
    %0 = arith.cmpi eq, %arg2, %c0_i32 : i32
    %1 = arith.extui %0 : i1 to i32
    %c0_i32_0 = arith.constant 0 : i32
    %2 = arith.cmpi ne, %1, %c0_i32_0 : i32
    scf.if %2 {
      %cst_10 = arith.constant 0.000000e+00 : f32
      %12 = vector.broadcast %cst_10 : f32 to vector<128x128xf32>
      %c0_11 = arith.constant 0 : index
      %c0_12 = arith.constant 0 : index
      %13 = vector.load %arg7[%c0_11, %c0_12] : memref<128x128xf32, #tpu.memory_space<vmem>>, vector<128x128xf32>
      tpu.vector_store %arg7[%c0_11, %c0_12], %12 {strides = array<i32>} : memref<128x128xf32, #tpu.memory_space<vmem>>, vector<128x128xf32>,
    } else {
    }
    %c0 = arith.constant 0 : index
    %c0_1 = arith.constant 0 : index
    %3 = vector.load %arg7[%c0, %c0_1] : memref<128x128xf32, #tpu.memory_space<vmem>>, vector<128x128xf32>
    %c0_2 = arith.constant 0 : index
    %c0_3 = arith.constant 0 : index
    %4 = vector.load %arg3[%c0_2, %c0_3] : memref<128x128xbf16, #tpu.memory_space<vmem>>, vector<128x128xbf16>
    %c0_4 = arith.constant 0 : index
    %c0_5 = arith.constant 0 : index
    %5 = vector.load %arg4[%c0_4, %c0_5] : memref<128x128xbf16, #tpu.memory_space<vmem>>, vector<128x128xbf16>
    %cst = arith.constant dense<0.000000e+00> : vector<128x128xf32>
    %6 = tpu.matmul %4, %5, %cst {dimension_numbers = #tpu.dot_dimension_numbers<[1], [0], [0], [1], [0, 0, 1, 1], [], []>} : vector<128x128xbf16>, vector<128x128xbf16>, vector<128x128xf32> -> vector<128x128xf32>
    %7 = arith.addf %3, %6 : vector<128x128xf32>
    %c0_6 = arith.constant 0 : index
    %c0_7 = arith.constant 0 : index
    %8 = vector.load %arg7[%c0_6, %c0_7] : memref<128x128xf32, #tpu.memory_space<vmem>>, vector<128x128xf32>
    tpu.vector_store %arg7[%c0_6, %c0_7], %7 {strides = array<i32>} : memref<128x128xf32, #tpu.memory_space<vmem>>, vector<128x128xf32>,
    %c0_i32_8 = arith.constant 0 : i32
    %9 = arith.cmpi eq, %arg2, %c0_i32_8 : i32
    %10 = arith.extui %9 : i1 to i32
    %c0_i32_9 = arith.constant 0 : i32
    %11 = arith.cmpi ne, %10, %c0_i32_9 : i32
    scf.if %11 {
      %c0_10 = arith.constant 0 : index
      %c0_11 = arith.constant 0 : index
      %12 = vector.load %arg7[%c0_10, %c0_11] : memref<128x128xf32, #tpu.memory_space<vmem>>, vector<128x128xf32>
      %c0_12 = arith.constant 0 : index
      %c0_13 = arith.constant 0 : index
      %13 = vector.load %arg5[%c0_12, %c0_13] : memref<1x128xf32, #tpu.memory_space<vmem>>, vector<1x128xf32>
      %14 = vector.broadcast %13 : vector<1x128xf32> to vector<128x128xf32>
      %15 = arith.addf %12, %14 : vector<128x128xf32>
      %cst_14 = arith.constant 0.000000e+00 : f32
      %16 = vector.broadcast %cst_14 : f32 to vector<128x128xf32>
      %17 = arith.cmpf oge, %15, %16 : vector<128x128xf32>
      %cst_15 = arith.constant 2.000000e-01 : f32
      %18 = vector.broadcast %cst_15 : f32 to vector<128x128xf32>
      %19 = arith.mulf %18, %15 : vector<128x128xf32>
      %20 = arith.select %17, %15, %19 : vector<128x128xi1>, vector<128x128xf32>
      %c0_16 = arith.constant 0 : index
      %c0_17 = arith.constant 0 : index
      %21 = vector.load %arg6[%c0_16, %c0_17] : memref<128x128xf32, #tpu.memory_space<vmem>>, vector<128x128xf32>
      tpu.vector_store %arg6[%c0_16, %c0_17], %20 {strides = array<i32>} : memref<128x128xf32, #tpu.memory_space<vmem>>, vector<128x128xf32>,
    } else {
    }
    return
  }
  func.func @transform_0(%arg0: i32, %arg1: i32, %arg2: i32) -> (i32, i32) {
    %c0_i32 = arith.constant 0 : i32
    return %arg0, %arg2 : i32, i32
  }
  func.func @transform_1(%arg0: i32, %arg1: i32, %arg2: i32) -> (i32, i32) {
    %c0_i32 = arith.constant 0 : i32
    return %arg2, %arg1 : i32, i32
  }
  func.func @transform_2(%arg0: i32, %arg1: i32, %arg2: i32) -> (i32, i32) {
    %c0_i32 = arith.constant 0 : i32
    %c0_i32_0 = arith.constant 0 : i32
    return %c0_i32, %arg1 : i32, i32
  }
  func.func @transform_3(%arg0: i32, %arg1: i32, %arg2: i32) -> (i32, i32) {
    %c0_i32 = arith.constant 0 : i32
    return %arg0, %arg1 : i32, i32
  }
}

module attributes {stable_mosaic.version = 11 : i64} {
  func.func @_bn_stats_kernel(%arg0: i32, %arg1: memref<128x128xf32, #tpu.memory_space<vmem>>, %arg2: memref<1x128xf32, #tpu.memory_space<vmem>>, %arg3: memref<1x128xf32, #tpu.memory_space<vmem>>) attributes {dimension_semantics = [#tpu.dimension_semantics<arbitrary>], iteration_bounds = array<i64: 1>, scalar_prefetch = 0 : i64, scratch_operands = 0 : i64, tpu.core_type = #tpu.core_type<tc>, window_params = [{transform_indices = @transform_0, window_bounds = array<i64: 128, 128>}, {pipeline_mode = #tpu.pipeline_mode<synchronous>, transform_indices = @transform_1, window_bounds = array<i64: 1, 128>}, {pipeline_mode = #tpu.pipeline_mode<synchronous>, transform_indices = @transform_2, window_bounds = array<i64: 1, 128>}]} {
    %c0_i32 = arith.constant 0 : i32
    %0 = arith.cmpi eq, %arg0, %c0_i32 : i32
    %1 = arith.extui %0 : i1 to i32
    %c0_i32_0 = arith.constant 0 : i32
    %2 = arith.cmpi ne, %1, %c0_i32_0 : i32
    scf.if %2 {
      %cst_11 = arith.constant 0.000000e+00 : f32
      %15 = vector.broadcast %cst_11 : f32 to vector<1x128xf32>
      %c0_12 = arith.constant 0 : index
      %c0_13 = arith.constant 0 : index
      %16 = vector.load %arg2[%c0_12, %c0_13] : memref<1x128xf32, #tpu.memory_space<vmem>>, vector<1x128xf32>
      tpu.vector_store %arg2[%c0_12, %c0_13], %15 {strides = array<i32>} : memref<1x128xf32, #tpu.memory_space<vmem>>, vector<1x128xf32>,
      %cst_14 = arith.constant 0.000000e+00 : f32
      %17 = vector.broadcast %cst_14 : f32 to vector<1x128xf32>
      %c0_15 = arith.constant 0 : index
      %c0_16 = arith.constant 0 : index
      %18 = vector.load %arg3[%c0_15, %c0_16] : memref<1x128xf32, #tpu.memory_space<vmem>>, vector<1x128xf32>
      tpu.vector_store %arg3[%c0_15, %c0_16], %17 {strides = array<i32>} : memref<1x128xf32, #tpu.memory_space<vmem>>, vector<1x128xf32>,
    } else {
    }
    %c0 = arith.constant 0 : index
    %c0_1 = arith.constant 0 : index
    %3 = vector.load %arg1[%c0, %c0_1] : memref<128x128xf32, #tpu.memory_space<vmem>>, vector<128x128xf32>
    %c0_2 = arith.constant 0 : index
    %c0_3 = arith.constant 0 : index
    %4 = vector.load %arg2[%c0_2, %c0_3] : memref<1x128xf32, #tpu.memory_space<vmem>>, vector<1x128xf32>
    %cst = arith.constant dense<0.000000e+00> : vector<128xf32>
    %5 = vector.multi_reduction <add>, %3, %cst [0] : vector<128x128xf32> to vector<128xf32>
    %6 = vector.shape_cast %5 : vector<128xf32> to vector<1x128xf32>
    %7 = arith.addf %4, %6 : vector<1x128xf32>
    %c0_4 = arith.constant 0 : index
    %c0_5 = arith.constant 0 : index
    %8 = vector.load %arg2[%c0_4, %c0_5] : memref<1x128xf32, #tpu.memory_space<vmem>>, vector<1x128xf32>
    tpu.vector_store %arg2[%c0_4, %c0_5], %7 {strides = array<i32>} : memref<1x128xf32, #tpu.memory_space<vmem>>, vector<1x128xf32>,
    %c0_6 = arith.constant 0 : index
    %c0_7 = arith.constant 0 : index
    %9 = vector.load %arg3[%c0_6, %c0_7] : memref<1x128xf32, #tpu.memory_space<vmem>>, vector<1x128xf32>
    %10 = arith.mulf %3, %3 : vector<128x128xf32>
    %cst_8 = arith.constant dense<0.000000e+00> : vector<128xf32>
    %11 = vector.multi_reduction <add>, %10, %cst_8 [0] : vector<128x128xf32> to vector<128xf32>
    %12 = vector.shape_cast %11 : vector<128xf32> to vector<1x128xf32>
    %13 = arith.addf %9, %12 : vector<1x128xf32>
    %c0_9 = arith.constant 0 : index
    %c0_10 = arith.constant 0 : index
    %14 = vector.load %arg3[%c0_9, %c0_10] : memref<1x128xf32, #tpu.memory_space<vmem>>, vector<1x128xf32>
    tpu.vector_store %arg3[%c0_9, %c0_10], %13 {strides = array<i32>} : memref<1x128xf32, #tpu.memory_space<vmem>>, vector<1x128xf32>,
    return
  }
  func.func @transform_0(%arg0: i32) -> (i32, i32) {
    %c0_i32 = arith.constant 0 : i32
    %c0_i32_0 = arith.constant 0 : i32
    return %arg0, %c0_i32 : i32, i32
  }
  func.func @transform_1(%arg0: i32) -> (i32, i32) {
    %c0_i32 = arith.constant 0 : i32
    %c0_i32_0 = arith.constant 0 : i32
    %c0_i32_1 = arith.constant 0 : i32
    return %c0_i32, %c0_i32_0 : i32, i32
  }
  func.func @transform_2(%arg0: i32) -> (i32, i32) {
    %c0_i32 = arith.constant 0 : i32
    %c0_i32_0 = arith.constant 0 : i32
    %c0_i32_1 = arith.constant 0 : i32
    return %c0_i32, %c0_i32_0 : i32, i32
  }
}

module attributes {stable_mosaic.version = 11 : i64} {
  func.func @_bn_apply_kernel(%arg0: i32, %arg1: memref<128x128xf32, #tpu.memory_space<vmem>>, %arg2: memref<1x128xf32, #tpu.memory_space<vmem>>, %arg3: memref<1x128xf32, #tpu.memory_space<vmem>>, %arg4: memref<128x16xf32, #tpu.memory_space<vmem>>) attributes {dimension_semantics = [#tpu.dimension_semantics<parallel>], iteration_bounds = array<i64: 1>, scalar_prefetch = 0 : i64, scratch_operands = 0 : i64, tpu.core_type = #tpu.core_type<tc>, window_params = [{transform_indices = @transform_0, window_bounds = array<i64: 128, 128>}, {pipeline_mode = #tpu.pipeline_mode<synchronous>, transform_indices = @transform_1, window_bounds = array<i64: 1, 128>}, {pipeline_mode = #tpu.pipeline_mode<synchronous>, transform_indices = @transform_2, window_bounds = array<i64: 1, 128>}, {transform_indices = @transform_3, window_bounds = array<i64: 128, 16>}]} {
    %c0 = arith.constant 0 : index
    %c0_0 = arith.constant 0 : index
    %0 = vector.load %arg1[%c0, %c0_0] : memref<128x128xf32, #tpu.memory_space<vmem>>, vector<128x128xf32>
    %c0_1 = arith.constant 0 : index
    %c0_2 = arith.constant 0 : index
    %1 = vector.load %arg2[%c0_1, %c0_2] : memref<1x128xf32, #tpu.memory_space<vmem>>, vector<1x128xf32>
    %2 = vector.broadcast %1 : vector<1x128xf32> to vector<128x128xf32>
    %3 = arith.mulf %0, %2 : vector<128x128xf32>
    %c0_3 = arith.constant 0 : index
    %c0_4 = arith.constant 0 : index
    %4 = vector.load %arg3[%c0_3, %c0_4] : memref<1x128xf32, #tpu.memory_space<vmem>>, vector<1x128xf32>
    %5 = vector.broadcast %4 : vector<1x128xf32> to vector<128x128xf32>
    %6 = arith.addf %3, %5 : vector<128x128xf32>
    %7 = vector.extract_strided_slice %6 {offsets = [0, 0], sizes = [128, 16], strides = [1, 1]} : vector<128x128xf32> to vector<128x16xf32>
    %c0_5 = arith.constant 0 : index
    %c0_6 = arith.constant 0 : index
    %8 = vector.load %arg4[%c0_5, %c0_6] : memref<128x16xf32, #tpu.memory_space<vmem>>, vector<128x16xf32>
    tpu.vector_store %arg4[%c0_5, %c0_6], %7 {strides = array<i32>} : memref<128x16xf32, #tpu.memory_space<vmem>>, vector<128x16xf32>,
    return
  }
  func.func @transform_0(%arg0: i32) -> (i32, i32) {
    %c0_i32 = arith.constant 0 : i32
    %c0_i32_0 = arith.constant 0 : i32
    return %arg0, %c0_i32 : i32, i32
  }
  func.func @transform_1(%arg0: i32) -> (i32, i32) {
    %c0_i32 = arith.constant 0 : i32
    %c0_i32_0 = arith.constant 0 : i32
    %c0_i32_1 = arith.constant 0 : i32
    return %c0_i32, %c0_i32_0 : i32, i32
  }
  func.func @transform_2(%arg0: i32) -> (i32, i32) {
    %c0_i32 = arith.constant 0 : i32
    %c0_i32_0 = arith.constant 0 : i32
    %c0_i32_1 = arith.constant 0 : i32
    return %c0_i32, %c0_i32_0 : i32, i32
  }
  func.func @transform_3(%arg0: i32) -> (i32, i32) {
    %c0_i32 = arith.constant 0 : i32
    %c0_i32_0 = arith.constant 0 : i32
    return %arg0, %c0_i32 : i32, i32
  }
}

module attributes {stable_mosaic.version = 11 : i64} {
  func.func @_matmul_bias_act_kernel(%arg0: i32, %arg1: i32, %arg2: i32, %arg3: memref<32x256xbf16, #tpu.memory_space<vmem>>, %arg4: memref<256x128xbf16, #tpu.memory_space<vmem>>, %arg5: memref<1x128xf32, #tpu.memory_space<vmem>>, %arg6: memref<32x128xf32, #tpu.memory_space<vmem>>, %arg7: memref<32x128xf32, #tpu.memory_space<vmem>>) attributes {dimension_semantics = [#tpu.dimension_semantics<parallel>, #tpu.dimension_semantics<parallel>, #tpu.dimension_semantics<arbitrary>], iteration_bounds = array<i64: 1, 1, 1>, scalar_prefetch = 0 : i64, scratch_operands = 1 : i64, tpu.core_type = #tpu.core_type<tc>, window_params = [{transform_indices = @transform_0, window_bounds = array<i64: 32, 256>}, {transform_indices = @transform_1, window_bounds = array<i64: 256, 128>}, {transform_indices = @transform_2, window_bounds = array<i64: 1, 128>}, {transform_indices = @transform_3, window_bounds = array<i64: 32, 128>}]} {
    %c0_i32 = arith.constant 0 : i32
    %0 = arith.cmpi eq, %arg2, %c0_i32 : i32
    %1 = arith.extui %0 : i1 to i32
    %c0_i32_0 = arith.constant 0 : i32
    %2 = arith.cmpi ne, %1, %c0_i32_0 : i32
    scf.if %2 {
      %cst_10 = arith.constant 0.000000e+00 : f32
      %12 = vector.broadcast %cst_10 : f32 to vector<32x128xf32>
      %c0_11 = arith.constant 0 : index
      %c0_12 = arith.constant 0 : index
      %13 = vector.load %arg7[%c0_11, %c0_12] : memref<32x128xf32, #tpu.memory_space<vmem>>, vector<32x128xf32>
      tpu.vector_store %arg7[%c0_11, %c0_12], %12 {strides = array<i32>} : memref<32x128xf32, #tpu.memory_space<vmem>>, vector<32x128xf32>,
    } else {
    }
    %c0 = arith.constant 0 : index
    %c0_1 = arith.constant 0 : index
    %3 = vector.load %arg7[%c0, %c0_1] : memref<32x128xf32, #tpu.memory_space<vmem>>, vector<32x128xf32>
    %c0_2 = arith.constant 0 : index
    %c0_3 = arith.constant 0 : index
    %4 = vector.load %arg3[%c0_2, %c0_3] : memref<32x256xbf16, #tpu.memory_space<vmem>>, vector<32x256xbf16>
    %c0_4 = arith.constant 0 : index
    %c0_5 = arith.constant 0 : index
    %5 = vector.load %arg4[%c0_4, %c0_5] : memref<256x128xbf16, #tpu.memory_space<vmem>>, vector<256x128xbf16>
    %cst = arith.constant dense<0.000000e+00> : vector<32x128xf32>
    %6 = tpu.matmul %4, %5, %cst {dimension_numbers = #tpu.dot_dimension_numbers<[1], [0], [0], [1], [0, 0, 1, 1], [], []>} : vector<32x256xbf16>, vector<256x128xbf16>, vector<32x128xf32> -> vector<32x128xf32>
    %7 = arith.addf %3, %6 : vector<32x128xf32>
    %c0_6 = arith.constant 0 : index
    %c0_7 = arith.constant 0 : index
    %8 = vector.load %arg7[%c0_6, %c0_7] : memref<32x128xf32, #tpu.memory_space<vmem>>, vector<32x128xf32>
    tpu.vector_store %arg7[%c0_6, %c0_7], %7 {strides = array<i32>} : memref<32x128xf32, #tpu.memory_space<vmem>>, vector<32x128xf32>,
    %c0_i32_8 = arith.constant 0 : i32
    %9 = arith.cmpi eq, %arg2, %c0_i32_8 : i32
    %10 = arith.extui %9 : i1 to i32
    %c0_i32_9 = arith.constant 0 : i32
    %11 = arith.cmpi ne, %10, %c0_i32_9 : i32
    scf.if %11 {
      %c0_10 = arith.constant 0 : index
      %c0_11 = arith.constant 0 : index
      %12 = vector.load %arg7[%c0_10, %c0_11] : memref<32x128xf32, #tpu.memory_space<vmem>>, vector<32x128xf32>
      %c0_12 = arith.constant 0 : index
      %c0_13 = arith.constant 0 : index
      %13 = vector.load %arg5[%c0_12, %c0_13] : memref<1x128xf32, #tpu.memory_space<vmem>>, vector<1x128xf32>
      %14 = vector.broadcast %13 : vector<1x128xf32> to vector<32x128xf32>
      %15 = arith.addf %12, %14 : vector<32x128xf32>
      %cst_14 = arith.constant 0.000000e+00 : f32
      %16 = vector.broadcast %cst_14 : f32 to vector<32x128xf32>
      %17 = arith.cmpf oge, %15, %16 : vector<32x128xf32>
      %cst_15 = arith.constant 2.000000e-01 : f32
      %18 = vector.broadcast %cst_15 : f32 to vector<32x128xf32>
      %19 = arith.mulf %18, %15 : vector<32x128xf32>
      %20 = arith.select %17, %15, %19 : vector<32x128xi1>, vector<32x128xf32>
      %c0_16 = arith.constant 0 : index
      %c0_17 = arith.constant 0 : index
      %21 = vector.load %arg6[%c0_16, %c0_17] : memref<32x128xf32, #tpu.memory_space<vmem>>, vector<32x128xf32>
      tpu.vector_store %arg6[%c0_16, %c0_17], %20 {strides = array<i32>} : memref<32x128xf32, #tpu.memory_space<vmem>>, vector<32x128xf32>,
    } else {
    }
    return
  }
  func.func @transform_0(%arg0: i32, %arg1: i32, %arg2: i32) -> (i32, i32) {
    %c0_i32 = arith.constant 0 : i32
    return %arg0, %arg2 : i32, i32
  }
  func.func @transform_1(%arg0: i32, %arg1: i32, %arg2: i32) -> (i32, i32) {
    %c0_i32 = arith.constant 0 : i32
    return %arg2, %arg1 : i32, i32
  }
  func.func @transform_2(%arg0: i32, %arg1: i32, %arg2: i32) -> (i32, i32) {
    %c0_i32 = arith.constant 0 : i32
    %c0_i32_0 = arith.constant 0 : i32
    return %c0_i32, %arg1 : i32, i32
  }
  func.func @transform_3(%arg0: i32, %arg1: i32, %arg2: i32) -> (i32, i32) {
    %c0_i32 = arith.constant 0 : i32
    return %arg0, %arg1 : i32, i32
  }
}

module attributes {stable_mosaic.version = 11 : i64} {
  func.func @_bn_stats_kernel(%arg0: i32, %arg1: memref<32x128xf32, #tpu.memory_space<vmem>>, %arg2: memref<1x128xf32, #tpu.memory_space<vmem>>, %arg3: memref<1x128xf32, #tpu.memory_space<vmem>>) attributes {dimension_semantics = [#tpu.dimension_semantics<arbitrary>], iteration_bounds = array<i64: 1>, scalar_prefetch = 0 : i64, scratch_operands = 0 : i64, tpu.core_type = #tpu.core_type<tc>, window_params = [{transform_indices = @transform_0, window_bounds = array<i64: 32, 128>}, {pipeline_mode = #tpu.pipeline_mode<synchronous>, transform_indices = @transform_1, window_bounds = array<i64: 1, 128>}, {pipeline_mode = #tpu.pipeline_mode<synchronous>, transform_indices = @transform_2, window_bounds = array<i64: 1, 128>}]} {
    %c0_i32 = arith.constant 0 : i32
    %0 = arith.cmpi eq, %arg0, %c0_i32 : i32
    %1 = arith.extui %0 : i1 to i32
    %c0_i32_0 = arith.constant 0 : i32
    %2 = arith.cmpi ne, %1, %c0_i32_0 : i32
    scf.if %2 {
      %cst_11 = arith.constant 0.000000e+00 : f32
      %15 = vector.broadcast %cst_11 : f32 to vector<1x128xf32>
      %c0_12 = arith.constant 0 : index
      %c0_13 = arith.constant 0 : index
      %16 = vector.load %arg2[%c0_12, %c0_13] : memref<1x128xf32, #tpu.memory_space<vmem>>, vector<1x128xf32>
      tpu.vector_store %arg2[%c0_12, %c0_13], %15 {strides = array<i32>} : memref<1x128xf32, #tpu.memory_space<vmem>>, vector<1x128xf32>,
      %cst_14 = arith.constant 0.000000e+00 : f32
      %17 = vector.broadcast %cst_14 : f32 to vector<1x128xf32>
      %c0_15 = arith.constant 0 : index
      %c0_16 = arith.constant 0 : index
      %18 = vector.load %arg3[%c0_15, %c0_16] : memref<1x128xf32, #tpu.memory_space<vmem>>, vector<1x128xf32>
      tpu.vector_store %arg3[%c0_15, %c0_16], %17 {strides = array<i32>} : memref<1x128xf32, #tpu.memory_space<vmem>>, vector<1x128xf32>,
    } else {
    }
    %c0 = arith.constant 0 : index
    %c0_1 = arith.constant 0 : index
    %3 = vector.load %arg1[%c0, %c0_1] : memref<32x128xf32, #tpu.memory_space<vmem>>, vector<32x128xf32>
    %c0_2 = arith.constant 0 : index
    %c0_3 = arith.constant 0 : index
    %4 = vector.load %arg2[%c0_2, %c0_3] : memref<1x128xf32, #tpu.memory_space<vmem>>, vector<1x128xf32>
    %cst = arith.constant dense<0.000000e+00> : vector<128xf32>
    %5 = vector.multi_reduction <add>, %3, %cst [0] : vector<32x128xf32> to vector<128xf32>
    %6 = vector.shape_cast %5 : vector<128xf32> to vector<1x128xf32>
    %7 = arith.addf %4, %6 : vector<1x128xf32>
    %c0_4 = arith.constant 0 : index
    %c0_5 = arith.constant 0 : index
    %8 = vector.load %arg2[%c0_4, %c0_5] : memref<1x128xf32, #tpu.memory_space<vmem>>, vector<1x128xf32>
    tpu.vector_store %arg2[%c0_4, %c0_5], %7 {strides = array<i32>} : memref<1x128xf32, #tpu.memory_space<vmem>>, vector<1x128xf32>,
    %c0_6 = arith.constant 0 : index
    %c0_7 = arith.constant 0 : index
    %9 = vector.load %arg3[%c0_6, %c0_7] : memref<1x128xf32, #tpu.memory_space<vmem>>, vector<1x128xf32>
    %10 = arith.mulf %3, %3 : vector<32x128xf32>
    %cst_8 = arith.constant dense<0.000000e+00> : vector<128xf32>
    %11 = vector.multi_reduction <add>, %10, %cst_8 [0] : vector<32x128xf32> to vector<128xf32>
    %12 = vector.shape_cast %11 : vector<128xf32> to vector<1x128xf32>
    %13 = arith.addf %9, %12 : vector<1x128xf32>
    %c0_9 = arith.constant 0 : index
    %c0_10 = arith.constant 0 : index
    %14 = vector.load %arg3[%c0_9, %c0_10] : memref<1x128xf32, #tpu.memory_space<vmem>>, vector<1x128xf32>
    tpu.vector_store %arg3[%c0_9, %c0_10], %13 {strides = array<i32>} : memref<1x128xf32, #tpu.memory_space<vmem>>, vector<1x128xf32>,
    return
  }
  func.func @transform_0(%arg0: i32) -> (i32, i32) {
    %c0_i32 = arith.constant 0 : i32
    %c0_i32_0 = arith.constant 0 : i32
    return %arg0, %c0_i32 : i32, i32
  }
  func.func @transform_1(%arg0: i32) -> (i32, i32) {
    %c0_i32 = arith.constant 0 : i32
    %c0_i32_0 = arith.constant 0 : i32
    %c0_i32_1 = arith.constant 0 : i32
    return %c0_i32, %c0_i32_0 : i32, i32
  }
  func.func @transform_2(%arg0: i32) -> (i32, i32) {
    %c0_i32 = arith.constant 0 : i32
    %c0_i32_0 = arith.constant 0 : i32
    %c0_i32_1 = arith.constant 0 : i32
    return %c0_i32, %c0_i32_0 : i32, i32
  }
}

module attributes {stable_mosaic.version = 11 : i64} {
  func.func @_bn_apply_kernel(%arg0: i32, %arg1: memref<32x128xf32, #tpu.memory_space<vmem>>, %arg2: memref<1x128xf32, #tpu.memory_space<vmem>>, %arg3: memref<1x128xf32, #tpu.memory_space<vmem>>, %arg4: memref<32x32xf32, #tpu.memory_space<vmem>>) attributes {dimension_semantics = [#tpu.dimension_semantics<parallel>], iteration_bounds = array<i64: 1>, scalar_prefetch = 0 : i64, scratch_operands = 0 : i64, tpu.core_type = #tpu.core_type<tc>, window_params = [{transform_indices = @transform_0, window_bounds = array<i64: 32, 128>}, {pipeline_mode = #tpu.pipeline_mode<synchronous>, transform_indices = @transform_1, window_bounds = array<i64: 1, 128>}, {pipeline_mode = #tpu.pipeline_mode<synchronous>, transform_indices = @transform_2, window_bounds = array<i64: 1, 128>}, {transform_indices = @transform_3, window_bounds = array<i64: 32, 32>}]} {
    %c0 = arith.constant 0 : index
    %c0_0 = arith.constant 0 : index
    %0 = vector.load %arg1[%c0, %c0_0] : memref<32x128xf32, #tpu.memory_space<vmem>>, vector<32x128xf32>
    %c0_1 = arith.constant 0 : index
    %c0_2 = arith.constant 0 : index
    %1 = vector.load %arg2[%c0_1, %c0_2] : memref<1x128xf32, #tpu.memory_space<vmem>>, vector<1x128xf32>
    %2 = vector.broadcast %1 : vector<1x128xf32> to vector<32x128xf32>
    %3 = arith.mulf %0, %2 : vector<32x128xf32>
    %c0_3 = arith.constant 0 : index
    %c0_4 = arith.constant 0 : index
    %4 = vector.load %arg3[%c0_3, %c0_4] : memref<1x128xf32, #tpu.memory_space<vmem>>, vector<1x128xf32>
    %5 = vector.broadcast %4 : vector<1x128xf32> to vector<32x128xf32>
    %6 = arith.addf %3, %5 : vector<32x128xf32>
    %7 = vector.extract_strided_slice %6 {offsets = [0, 0], sizes = [32, 32], strides = [1, 1]} : vector<32x128xf32> to vector<32x32xf32>
    %c0_5 = arith.constant 0 : index
    %c0_6 = arith.constant 0 : index
    %8 = vector.load %arg4[%c0_5, %c0_6] : memref<32x32xf32, #tpu.memory_space<vmem>>, vector<32x32xf32>
    tpu.vector_store %arg4[%c0_5, %c0_6], %7 {strides = array<i32>} : memref<32x32xf32, #tpu.memory_space<vmem>>, vector<32x32xf32>,
    return
  }
  func.func @transform_0(%arg0: i32) -> (i32, i32) {
    %c0_i32 = arith.constant 0 : i32
    %c0_i32_0 = arith.constant 0 : i32
    return %arg0, %c0_i32 : i32, i32
  }
  func.func @transform_1(%arg0: i32) -> (i32, i32) {
    %c0_i32 = arith.constant 0 : i32
    %c0_i32_0 = arith.constant 0 : i32
    %c0_i32_1 = arith.constant 0 : i32
    return %c0_i32, %c0_i32_0 : i32, i32
  }
  func.func @transform_2(%arg0: i32) -> (i32, i32) {
    %c0_i32 = arith.constant 0 : i32
    %c0_i32_0 = arith.constant 0 : i32
    %c0_i32_1 = arith.constant 0 : i32
    return %c0_i32, %c0_i32_0 : i32, i32
  }
  func.func @transform_3(%arg0: i32) -> (i32, i32) {
    %c0_i32 = arith.constant 0 : i32
    %c0_i32_0 = arith.constant 0 : i32
    return %arg0, %c0_i32 : i32, i32
  }
}

module attributes {stable_mosaic.version = 11 : i64} {
  func.func @_matmul_bias_act_kernel(%arg0: i32, %arg1: i32, %arg2: i32, %arg3: memref<8x512xbf16, #tpu.memory_space<vmem>>, %arg4: memref<512x128xbf16, #tpu.memory_space<vmem>>, %arg5: memref<1x128xf32, #tpu.memory_space<vmem>>, %arg6: memref<8x128xf32, #tpu.memory_space<vmem>>, %arg7: memref<8x128xf32, #tpu.memory_space<vmem>>) attributes {dimension_semantics = [#tpu.dimension_semantics<parallel>, #tpu.dimension_semantics<parallel>, #tpu.dimension_semantics<arbitrary>], iteration_bounds = array<i64: 1, 1, 1>, scalar_prefetch = 0 : i64, scratch_operands = 1 : i64, tpu.core_type = #tpu.core_type<tc>, window_params = [{transform_indices = @transform_0, window_bounds = array<i64: 8, 512>}, {transform_indices = @transform_1, window_bounds = array<i64: 512, 128>}, {transform_indices = @transform_2, window_bounds = array<i64: 1, 128>}, {transform_indices = @transform_3, window_bounds = array<i64: 8, 128>}]} {
    %c0_i32 = arith.constant 0 : i32
    %0 = arith.cmpi eq, %arg2, %c0_i32 : i32
    %1 = arith.extui %0 : i1 to i32
    %c0_i32_0 = arith.constant 0 : i32
    %2 = arith.cmpi ne, %1, %c0_i32_0 : i32
    scf.if %2 {
      %cst_10 = arith.constant 0.000000e+00 : f32
      %12 = vector.broadcast %cst_10 : f32 to vector<8x128xf32>
      %c0_11 = arith.constant 0 : index
      %c0_12 = arith.constant 0 : index
      %13 = vector.load %arg7[%c0_11, %c0_12] : memref<8x128xf32, #tpu.memory_space<vmem>>, vector<8x128xf32>
      tpu.vector_store %arg7[%c0_11, %c0_12], %12 {strides = array<i32>} : memref<8x128xf32, #tpu.memory_space<vmem>>, vector<8x128xf32>,
    } else {
    }
    %c0 = arith.constant 0 : index
    %c0_1 = arith.constant 0 : index
    %3 = vector.load %arg7[%c0, %c0_1] : memref<8x128xf32, #tpu.memory_space<vmem>>, vector<8x128xf32>
    %c0_2 = arith.constant 0 : index
    %c0_3 = arith.constant 0 : index
    %4 = vector.load %arg3[%c0_2, %c0_3] : memref<8x512xbf16, #tpu.memory_space<vmem>>, vector<8x512xbf16>
    %c0_4 = arith.constant 0 : index
    %c0_5 = arith.constant 0 : index
    %5 = vector.load %arg4[%c0_4, %c0_5] : memref<512x128xbf16, #tpu.memory_space<vmem>>, vector<512x128xbf16>
    %cst = arith.constant dense<0.000000e+00> : vector<8x128xf32>
    %6 = tpu.matmul %4, %5, %cst {dimension_numbers = #tpu.dot_dimension_numbers<[1], [0], [0], [1], [0, 0, 1, 1], [], []>} : vector<8x512xbf16>, vector<512x128xbf16>, vector<8x128xf32> -> vector<8x128xf32>
    %7 = arith.addf %3, %6 : vector<8x128xf32>
    %c0_6 = arith.constant 0 : index
    %c0_7 = arith.constant 0 : index
    %8 = vector.load %arg7[%c0_6, %c0_7] : memref<8x128xf32, #tpu.memory_space<vmem>>, vector<8x128xf32>
    tpu.vector_store %arg7[%c0_6, %c0_7], %7 {strides = array<i32>} : memref<8x128xf32, #tpu.memory_space<vmem>>, vector<8x128xf32>,
    %c0_i32_8 = arith.constant 0 : i32
    %9 = arith.cmpi eq, %arg2, %c0_i32_8 : i32
    %10 = arith.extui %9 : i1 to i32
    %c0_i32_9 = arith.constant 0 : i32
    %11 = arith.cmpi ne, %10, %c0_i32_9 : i32
    scf.if %11 {
      %c0_10 = arith.constant 0 : index
      %c0_11 = arith.constant 0 : index
      %12 = vector.load %arg7[%c0_10, %c0_11] : memref<8x128xf32, #tpu.memory_space<vmem>>, vector<8x128xf32>
      %c0_12 = arith.constant 0 : index
      %c0_13 = arith.constant 0 : index
      %13 = vector.load %arg5[%c0_12, %c0_13] : memref<1x128xf32, #tpu.memory_space<vmem>>, vector<1x128xf32>
      %14 = vector.broadcast %13 : vector<1x128xf32> to vector<8x128xf32>
      %15 = arith.addf %12, %14 : vector<8x128xf32>
      %cst_14 = arith.constant 0.000000e+00 : f32
      %16 = vector.broadcast %cst_14 : f32 to vector<8x128xf32>
      %17 = arith.cmpf oge, %15, %16 : vector<8x128xf32>
      %cst_15 = arith.constant 2.000000e-01 : f32
      %18 = vector.broadcast %cst_15 : f32 to vector<8x128xf32>
      %19 = arith.mulf %18, %15 : vector<8x128xf32>
      %20 = arith.select %17, %15, %19 : vector<8x128xi1>, vector<8x128xf32>
      %c0_16 = arith.constant 0 : index
      %c0_17 = arith.constant 0 : index
      %21 = vector.load %arg6[%c0_16, %c0_17] : memref<8x128xf32, #tpu.memory_space<vmem>>, vector<8x128xf32>
      tpu.vector_store %arg6[%c0_16, %c0_17], %20 {strides = array<i32>} : memref<8x128xf32, #tpu.memory_space<vmem>>, vector<8x128xf32>,
    } else {
    }
    return
  }
  func.func @transform_0(%arg0: i32, %arg1: i32, %arg2: i32) -> (i32, i32) {
    %c0_i32 = arith.constant 0 : i32
    return %arg0, %arg2 : i32, i32
  }
  func.func @transform_1(%arg0: i32, %arg1: i32, %arg2: i32) -> (i32, i32) {
    %c0_i32 = arith.constant 0 : i32
    return %arg2, %arg1 : i32, i32
  }
  func.func @transform_2(%arg0: i32, %arg1: i32, %arg2: i32) -> (i32, i32) {
    %c0_i32 = arith.constant 0 : i32
    %c0_i32_0 = arith.constant 0 : i32
    return %c0_i32, %arg1 : i32, i32
  }
  func.func @transform_3(%arg0: i32, %arg1: i32, %arg2: i32) -> (i32, i32) {
    %c0_i32 = arith.constant 0 : i32
    return %arg0, %arg1 : i32, i32
  }
}

module attributes {stable_mosaic.version = 11 : i64} {
  func.func @_bn_apply_kernel(%arg0: i32, %arg1: memref<8x128xf32, #tpu.memory_space<vmem>>, %arg2: memref<1x128xf32, #tpu.memory_space<vmem>>, %arg3: memref<1x128xf32, #tpu.memory_space<vmem>>, %arg4: memref<8x64xf32, #tpu.memory_space<vmem>>) attributes {dimension_semantics = [#tpu.dimension_semantics<parallel>], iteration_bounds = array<i64: 1>, scalar_prefetch = 0 : i64, scratch_operands = 0 : i64, tpu.core_type = #tpu.core_type<tc>, window_params = [{transform_indices = @transform_0, window_bounds = array<i64: 8, 128>}, {pipeline_mode = #tpu.pipeline_mode<synchronous>, transform_indices = @transform_1, window_bounds = array<i64: 1, 128>}, {pipeline_mode = #tpu.pipeline_mode<synchronous>, transform_indices = @transform_2, window_bounds = array<i64: 1, 128>}, {transform_indices = @transform_3, window_bounds = array<i64: 8, 64>}]} {
    %c0 = arith.constant 0 : index
    %c0_0 = arith.constant 0 : index
    %0 = vector.load %arg1[%c0, %c0_0] : memref<8x128xf32, #tpu.memory_space<vmem>>, vector<8x128xf32>
    %c0_1 = arith.constant 0 : index
    %c0_2 = arith.constant 0 : index
    %1 = vector.load %arg2[%c0_1, %c0_2] : memref<1x128xf32, #tpu.memory_space<vmem>>, vector<1x128xf32>
    %2 = vector.broadcast %1 : vector<1x128xf32> to vector<8x128xf32>
    %3 = arith.mulf %0, %2 : vector<8x128xf32>
    %c0_3 = arith.constant 0 : index
    %c0_4 = arith.constant 0 : index
    %4 = vector.load %arg3[%c0_3, %c0_4] : memref<1x128xf32, #tpu.memory_space<vmem>>, vector<1x128xf32>
    %5 = vector.broadcast %4 : vector<1x128xf32> to vector<8x128xf32>
    %6 = arith.addf %3, %5 : vector<8x128xf32>
    %7 = vector.extract_strided_slice %6 {offsets = [0, 0], sizes = [8, 64], strides = [1, 1]} : vector<8x128xf32> to vector<8x64xf32>
    %c0_5 = arith.constant 0 : index
    %c0_6 = arith.constant 0 : index
    %8 = vector.load %arg4[%c0_5, %c0_6] : memref<8x64xf32, #tpu.memory_space<vmem>>, vector<8x64xf32>
    tpu.vector_store %arg4[%c0_5, %c0_6], %7 {strides = array<i32>} : memref<8x64xf32, #tpu.memory_space<vmem>>, vector<8x64xf32>,
    return
  }
  func.func @transform_0(%arg0: i32) -> (i32, i32) {
    %c0_i32 = arith.constant 0 : i32
    %c0_i32_0 = arith.constant 0 : i32
    return %arg0, %c0_i32 : i32, i32
  }
  func.func @transform_1(%arg0: i32) -> (i32, i32) {
    %c0_i32 = arith.constant 0 : i32
    %c0_i32_0 = arith.constant 0 : i32
    %c0_i32_1 = arith.constant 0 : i32
    return %c0_i32, %c0_i32_0 : i32, i32
  }
  func.func @transform_2(%arg0: i32) -> (i32, i32) {
    %c0_i32 = arith.constant 0 : i32
    %c0_i32_0 = arith.constant 0 : i32
    %c0_i32_1 = arith.constant 0 : i32
    return %c0_i32, %c0_i32_0 : i32, i32
  }
  func.func @transform_3(%arg0: i32) -> (i32, i32) {
    %c0_i32 = arith.constant 0 : i32
    %c0_i32_0 = arith.constant 0 : i32
    return %arg0, %c0_i32 : i32, i32
  }
}

module attributes {stable_mosaic.version = 11 : i64} {
  func.func @_bn_stats_kernel(%arg0: i32, %arg1: memref<8x128xf32, #tpu.memory_space<vmem>>, %arg2: memref<1x128xf32, #tpu.memory_space<vmem>>, %arg3: memref<1x128xf32, #tpu.memory_space<vmem>>) attributes {dimension_semantics = [#tpu.dimension_semantics<arbitrary>], iteration_bounds = array<i64: 1>, scalar_prefetch = 0 : i64, scratch_operands = 0 : i64, tpu.core_type = #tpu.core_type<tc>, window_params = [{transform_indices = @transform_0, window_bounds = array<i64: 8, 128>}, {pipeline_mode = #tpu.pipeline_mode<synchronous>, transform_indices = @transform_1, window_bounds = array<i64: 1, 128>}, {pipeline_mode = #tpu.pipeline_mode<synchronous>, transform_indices = @transform_2, window_bounds = array<i64: 1, 128>}]} {
    %c0_i32 = arith.constant 0 : i32
    %0 = arith.cmpi eq, %arg0, %c0_i32 : i32
    %1 = arith.extui %0 : i1 to i32
    %c0_i32_0 = arith.constant 0 : i32
    %2 = arith.cmpi ne, %1, %c0_i32_0 : i32
    scf.if %2 {
      %cst_11 = arith.constant 0.000000e+00 : f32
      %15 = vector.broadcast %cst_11 : f32 to vector<1x128xf32>
      %c0_12 = arith.constant 0 : index
      %c0_13 = arith.constant 0 : index
      %16 = vector.load %arg2[%c0_12, %c0_13] : memref<1x128xf32, #tpu.memory_space<vmem>>, vector<1x128xf32>
      tpu.vector_store %arg2[%c0_12, %c0_13], %15 {strides = array<i32>} : memref<1x128xf32, #tpu.memory_space<vmem>>, vector<1x128xf32>,
      %cst_14 = arith.constant 0.000000e+00 : f32
      %17 = vector.broadcast %cst_14 : f32 to vector<1x128xf32>
      %c0_15 = arith.constant 0 : index
      %c0_16 = arith.constant 0 : index
      %18 = vector.load %arg3[%c0_15, %c0_16] : memref<1x128xf32, #tpu.memory_space<vmem>>, vector<1x128xf32>
      tpu.vector_store %arg3[%c0_15, %c0_16], %17 {strides = array<i32>} : memref<1x128xf32, #tpu.memory_space<vmem>>, vector<1x128xf32>,
    } else {
    }
    %c0 = arith.constant 0 : index
    %c0_1 = arith.constant 0 : index
    %3 = vector.load %arg1[%c0, %c0_1] : memref<8x128xf32, #tpu.memory_space<vmem>>, vector<8x128xf32>
    %c0_2 = arith.constant 0 : index
    %c0_3 = arith.constant 0 : index
    %4 = vector.load %arg2[%c0_2, %c0_3] : memref<1x128xf32, #tpu.memory_space<vmem>>, vector<1x128xf32>
    %cst = arith.constant dense<0.000000e+00> : vector<128xf32>
    %5 = vector.multi_reduction <add>, %3, %cst [0] : vector<8x128xf32> to vector<128xf32>
    %6 = vector.shape_cast %5 : vector<128xf32> to vector<1x128xf32>
    %7 = arith.addf %4, %6 : vector<1x128xf32>
    %c0_4 = arith.constant 0 : index
    %c0_5 = arith.constant 0 : index
    %8 = vector.load %arg2[%c0_4, %c0_5] : memref<1x128xf32, #tpu.memory_space<vmem>>, vector<1x128xf32>
    tpu.vector_store %arg2[%c0_4, %c0_5], %7 {strides = array<i32>} : memref<1x128xf32, #tpu.memory_space<vmem>>, vector<1x128xf32>,
    %c0_6 = arith.constant 0 : index
    %c0_7 = arith.constant 0 : index
    %9 = vector.load %arg3[%c0_6, %c0_7] : memref<1x128xf32, #tpu.memory_space<vmem>>, vector<1x128xf32>
    %10 = arith.mulf %3, %3 : vector<8x128xf32>
    %cst_8 = arith.constant dense<0.000000e+00> : vector<128xf32>
    %11 = vector.multi_reduction <add>, %10, %cst_8 [0] : vector<8x128xf32> to vector<128xf32>
    %12 = vector.shape_cast %11 : vector<128xf32> to vector<1x128xf32>
    %13 = arith.addf %9, %12 : vector<1x128xf32>
    %c0_9 = arith.constant 0 : index
    %c0_10 = arith.constant 0 : index
    %14 = vector.load %arg3[%c0_9, %c0_10] : memref<1x128xf32, #tpu.memory_space<vmem>>, vector<1x128xf32>
    tpu.vector_store %arg3[%c0_9, %c0_10], %13 {strides = array<i32>} : memref<1x128xf32, #tpu.memory_space<vmem>>, vector<1x128xf32>,
    return
  }
  func.func @transform_0(%arg0: i32) -> (i32, i32) {
    %c0_i32 = arith.constant 0 : i32
    %c0_i32_0 = arith.constant 0 : i32
    return %arg0, %c0_i32 : i32, i32
  }
  func.func @transform_1(%arg0: i32) -> (i32, i32) {
    %c0_i32 = arith.constant 0 : i32
    %c0_i32_0 = arith.constant 0 : i32
    %c0_i32_1 = arith.constant 0 : i32
    return %c0_i32, %c0_i32_0 : i32, i32
  }
  func.func @transform_2(%arg0: i32) -> (i32, i32) {
    %c0_i32 = arith.constant 0 : i32
    %c0_i32_0 = arith.constant 0 : i32
    %c0_i32_1 = arith.constant 0 : i32
    return %c0_i32, %c0_i32_0 : i32, i32
  }
}

module attributes {stable_mosaic.version = 11 : i64} {
  func.func @_matmul_bias_act_kernel(%arg0: i32, %arg1: i32, %arg2: i32, %arg3: memref<8x256xbf16, #tpu.memory_space<vmem>>, %arg4: memref<256x128xbf16, #tpu.memory_space<vmem>>, %arg5: memref<1x128xf32, #tpu.memory_space<vmem>>, %arg6: memref<8x128xf32, #tpu.memory_space<vmem>>, %arg7: memref<8x128xf32, #tpu.memory_space<vmem>>) attributes {dimension_semantics = [#tpu.dimension_semantics<parallel>, #tpu.dimension_semantics<parallel>, #tpu.dimension_semantics<arbitrary>], iteration_bounds = array<i64: 1, 1, 1>, scalar_prefetch = 0 : i64, scratch_operands = 1 : i64, tpu.core_type = #tpu.core_type<tc>, window_params = [{transform_indices = @transform_0, window_bounds = array<i64: 8, 256>}, {transform_indices = @transform_1, window_bounds = array<i64: 256, 128>}, {transform_indices = @transform_2, window_bounds = array<i64: 1, 128>}, {transform_indices = @transform_3, window_bounds = array<i64: 8, 128>}]} {
    %c0_i32 = arith.constant 0 : i32
    %0 = arith.cmpi eq, %arg2, %c0_i32 : i32
    %1 = arith.extui %0 : i1 to i32
    %c0_i32_0 = arith.constant 0 : i32
    %2 = arith.cmpi ne, %1, %c0_i32_0 : i32
    scf.if %2 {
      %cst_10 = arith.constant 0.000000e+00 : f32
      %12 = vector.broadcast %cst_10 : f32 to vector<8x128xf32>
      %c0_11 = arith.constant 0 : index
      %c0_12 = arith.constant 0 : index
      %13 = vector.load %arg7[%c0_11, %c0_12] : memref<8x128xf32, #tpu.memory_space<vmem>>, vector<8x128xf32>
      tpu.vector_store %arg7[%c0_11, %c0_12], %12 {strides = array<i32>} : memref<8x128xf32, #tpu.memory_space<vmem>>, vector<8x128xf32>,
    } else {
    }
    %c0 = arith.constant 0 : index
    %c0_1 = arith.constant 0 : index
    %3 = vector.load %arg7[%c0, %c0_1] : memref<8x128xf32, #tpu.memory_space<vmem>>, vector<8x128xf32>
    %c0_2 = arith.constant 0 : index
    %c0_3 = arith.constant 0 : index
    %4 = vector.load %arg3[%c0_2, %c0_3] : memref<8x256xbf16, #tpu.memory_space<vmem>>, vector<8x256xbf16>
    %c0_4 = arith.constant 0 : index
    %c0_5 = arith.constant 0 : index
    %5 = vector.load %arg4[%c0_4, %c0_5] : memref<256x128xbf16, #tpu.memory_space<vmem>>, vector<256x128xbf16>
    %cst = arith.constant dense<0.000000e+00> : vector<8x128xf32>
    %6 = tpu.matmul %4, %5, %cst {dimension_numbers = #tpu.dot_dimension_numbers<[1], [0], [0], [1], [0, 0, 1, 1], [], []>} : vector<8x256xbf16>, vector<256x128xbf16>, vector<8x128xf32> -> vector<8x128xf32>
    %7 = arith.addf %3, %6 : vector<8x128xf32>
    %c0_6 = arith.constant 0 : index
    %c0_7 = arith.constant 0 : index
    %8 = vector.load %arg7[%c0_6, %c0_7] : memref<8x128xf32, #tpu.memory_space<vmem>>, vector<8x128xf32>
    tpu.vector_store %arg7[%c0_6, %c0_7], %7 {strides = array<i32>} : memref<8x128xf32, #tpu.memory_space<vmem>>, vector<8x128xf32>,
    %c0_i32_8 = arith.constant 0 : i32
    %9 = arith.cmpi eq, %arg2, %c0_i32_8 : i32
    %10 = arith.extui %9 : i1 to i32
    %c0_i32_9 = arith.constant 0 : i32
    %11 = arith.cmpi ne, %10, %c0_i32_9 : i32
    scf.if %11 {
      %c0_10 = arith.constant 0 : index
      %c0_11 = arith.constant 0 : index
      %12 = vector.load %arg7[%c0_10, %c0_11] : memref<8x128xf32, #tpu.memory_space<vmem>>, vector<8x128xf32>
      %c0_12 = arith.constant 0 : index
      %c0_13 = arith.constant 0 : index
      %13 = vector.load %arg5[%c0_12, %c0_13] : memref<1x128xf32, #tpu.memory_space<vmem>>, vector<1x128xf32>
      %14 = vector.broadcast %13 : vector<1x128xf32> to vector<8x128xf32>
      %15 = arith.addf %12, %14 : vector<8x128xf32>
      %c0_14 = arith.constant 0 : index
      %c0_15 = arith.constant 0 : index
      %16 = vector.load %arg6[%c0_14, %c0_15] : memref<8x128xf32, #tpu.memory_space<vmem>>, vector<8x128xf32>
      tpu.vector_store %arg6[%c0_14, %c0_15], %15 {strides = array<i32>} : memref<8x128xf32, #tpu.memory_space<vmem>>, vector<8x128xf32>,
    } else {
    }
    return
  }
  func.func @transform_0(%arg0: i32, %arg1: i32, %arg2: i32) -> (i32, i32) {
    %c0_i32 = arith.constant 0 : i32
    return %arg0, %arg2 : i32, i32
  }
  func.func @transform_1(%arg0: i32, %arg1: i32, %arg2: i32) -> (i32, i32) {
    %c0_i32 = arith.constant 0 : i32
    return %arg2, %arg1 : i32, i32
  }
  func.func @transform_2(%arg0: i32, %arg1: i32, %arg2: i32) -> (i32, i32) {
    %c0_i32 = arith.constant 0 : i32
    %c0_i32_0 = arith.constant 0 : i32
    return %c0_i32, %arg1 : i32, i32
  }
  func.func @transform_3(%arg0: i32, %arg1: i32, %arg2: i32) -> (i32, i32) {
    %c0_i32 = arith.constant 0 : i32
    return %arg0, %arg1 : i32, i32
  }
}

module attributes {stable_mosaic.version = 11 : i64} {
  func.func @_matmul_bias_act_kernel(%arg0: i32, %arg1: i32, %arg2: i32, %arg3: memref<8x128xbf16, #tpu.memory_space<vmem>>, %arg4: memref<128x256xbf16, #tpu.memory_space<vmem>>, %arg5: memref<1x256xf32, #tpu.memory_space<vmem>>, %arg6: memref<8x256xf32, #tpu.memory_space<vmem>>, %arg7: memref<8x256xf32, #tpu.memory_space<vmem>>) attributes {dimension_semantics = [#tpu.dimension_semantics<parallel>, #tpu.dimension_semantics<parallel>, #tpu.dimension_semantics<arbitrary>], iteration_bounds = array<i64: 1, 1, 1>, scalar_prefetch = 0 : i64, scratch_operands = 1 : i64, tpu.core_type = #tpu.core_type<tc>, window_params = [{transform_indices = @transform_0, window_bounds = array<i64: 8, 128>}, {transform_indices = @transform_1, window_bounds = array<i64: 128, 256>}, {transform_indices = @transform_2, window_bounds = array<i64: 1, 256>}, {transform_indices = @transform_3, window_bounds = array<i64: 8, 256>}]} {
    %c0_i32 = arith.constant 0 : i32
    %0 = arith.cmpi eq, %arg2, %c0_i32 : i32
    %1 = arith.extui %0 : i1 to i32
    %c0_i32_0 = arith.constant 0 : i32
    %2 = arith.cmpi ne, %1, %c0_i32_0 : i32
    scf.if %2 {
      %cst_10 = arith.constant 0.000000e+00 : f32
      %12 = vector.broadcast %cst_10 : f32 to vector<8x256xf32>
      %c0_11 = arith.constant 0 : index
      %c0_12 = arith.constant 0 : index
      %13 = vector.load %arg7[%c0_11, %c0_12] : memref<8x256xf32, #tpu.memory_space<vmem>>, vector<8x256xf32>
      tpu.vector_store %arg7[%c0_11, %c0_12], %12 {strides = array<i32>} : memref<8x256xf32, #tpu.memory_space<vmem>>, vector<8x256xf32>,
    } else {
    }
    %c0 = arith.constant 0 : index
    %c0_1 = arith.constant 0 : index
    %3 = vector.load %arg7[%c0, %c0_1] : memref<8x256xf32, #tpu.memory_space<vmem>>, vector<8x256xf32>
    %c0_2 = arith.constant 0 : index
    %c0_3 = arith.constant 0 : index
    %4 = vector.load %arg3[%c0_2, %c0_3] : memref<8x128xbf16, #tpu.memory_space<vmem>>, vector<8x128xbf16>
    %c0_4 = arith.constant 0 : index
    %c0_5 = arith.constant 0 : index
    %5 = vector.load %arg4[%c0_4, %c0_5] : memref<128x256xbf16, #tpu.memory_space<vmem>>, vector<128x256xbf16>
    %cst = arith.constant dense<0.000000e+00> : vector<8x256xf32>
    %6 = tpu.matmul %4, %5, %cst {dimension_numbers = #tpu.dot_dimension_numbers<[1], [0], [0], [1], [0, 0, 1, 1], [], []>} : vector<8x128xbf16>, vector<128x256xbf16>, vector<8x256xf32> -> vector<8x256xf32>
    %7 = arith.addf %3, %6 : vector<8x256xf32>
    %c0_6 = arith.constant 0 : index
    %c0_7 = arith.constant 0 : index
    %8 = vector.load %arg7[%c0_6, %c0_7] : memref<8x256xf32, #tpu.memory_space<vmem>>, vector<8x256xf32>
    tpu.vector_store %arg7[%c0_6, %c0_7], %7 {strides = array<i32>} : memref<8x256xf32, #tpu.memory_space<vmem>>, vector<8x256xf32>,
    %c0_i32_8 = arith.constant 0 : i32
    %9 = arith.cmpi eq, %arg2, %c0_i32_8 : i32
    %10 = arith.extui %9 : i1 to i32
    %c0_i32_9 = arith.constant 0 : i32
    %11 = arith.cmpi ne, %10, %c0_i32_9 : i32
    scf.if %11 {
      %c0_10 = arith.constant 0 : index
      %c0_11 = arith.constant 0 : index
      %12 = vector.load %arg7[%c0_10, %c0_11] : memref<8x256xf32, #tpu.memory_space<vmem>>, vector<8x256xf32>
      %c0_12 = arith.constant 0 : index
      %c0_13 = arith.constant 0 : index
      %13 = vector.load %arg5[%c0_12, %c0_13] : memref<1x256xf32, #tpu.memory_space<vmem>>, vector<1x256xf32>
      %14 = vector.broadcast %13 : vector<1x256xf32> to vector<8x256xf32>
      %15 = arith.addf %12, %14 : vector<8x256xf32>
      %cst_14 = arith.constant 0.000000e+00 : f32
      %16 = vector.broadcast %cst_14 : f32 to vector<8x256xf32>
      %17 = arith.maximumf %15, %16 : vector<8x256xf32>
      %c0_15 = arith.constant 0 : index
      %c0_16 = arith.constant 0 : index
      %18 = vector.load %arg6[%c0_15, %c0_16] : memref<8x256xf32, #tpu.memory_space<vmem>>, vector<8x256xf32>
      tpu.vector_store %arg6[%c0_15, %c0_16], %17 {strides = array<i32>} : memref<8x256xf32, #tpu.memory_space<vmem>>, vector<8x256xf32>,
    } else {
    }
    return
  }
  func.func @transform_0(%arg0: i32, %arg1: i32, %arg2: i32) -> (i32, i32) {
    %c0_i32 = arith.constant 0 : i32
    return %arg0, %arg2 : i32, i32
  }
  func.func @transform_1(%arg0: i32, %arg1: i32, %arg2: i32) -> (i32, i32) {
    %c0_i32 = arith.constant 0 : i32
    return %arg2, %arg1 : i32, i32
  }
  func.func @transform_2(%arg0: i32, %arg1: i32, %arg2: i32) -> (i32, i32) {
    %c0_i32 = arith.constant 0 : i32
    %c0_i32_0 = arith.constant 0 : i32
    return %c0_i32, %arg1 : i32, i32
  }
  func.func @transform_3(%arg0: i32, %arg1: i32, %arg2: i32) -> (i32, i32) {
    %c0_i32 = arith.constant 0 : i32
    return %arg0, %arg1 : i32, i32
  }
}

module attributes {stable_mosaic.version = 11 : i64} {
  func.func @_matmul_bias_act_kernel(%arg0: i32, %arg1: i32, %arg2: i32, %arg3: memref<32x640xbf16, #tpu.memory_space<vmem>>, %arg4: memref<640x128xbf16, #tpu.memory_space<vmem>>, %arg5: memref<1x128xf32, #tpu.memory_space<vmem>>, %arg6: memref<32x128xf32, #tpu.memory_space<vmem>>, %arg7: memref<32x128xf32, #tpu.memory_space<vmem>>) attributes {dimension_semantics = [#tpu.dimension_semantics<parallel>, #tpu.dimension_semantics<parallel>, #tpu.dimension_semantics<arbitrary>], iteration_bounds = array<i64: 1, 1, 1>, scalar_prefetch = 0 : i64, scratch_operands = 1 : i64, tpu.core_type = #tpu.core_type<tc>, window_params = [{transform_indices = @transform_0, window_bounds = array<i64: 32, 640>}, {transform_indices = @transform_1, window_bounds = array<i64: 640, 128>}, {transform_indices = @transform_2, window_bounds = array<i64: 1, 128>}, {transform_indices = @transform_3, window_bounds = array<i64: 32, 128>}]} {
    %c0_i32 = arith.constant 0 : i32
    %0 = arith.cmpi eq, %arg2, %c0_i32 : i32
    %1 = arith.extui %0 : i1 to i32
    %c0_i32_0 = arith.constant 0 : i32
    %2 = arith.cmpi ne, %1, %c0_i32_0 : i32
    scf.if %2 {
      %cst_10 = arith.constant 0.000000e+00 : f32
      %12 = vector.broadcast %cst_10 : f32 to vector<32x128xf32>
      %c0_11 = arith.constant 0 : index
      %c0_12 = arith.constant 0 : index
      %13 = vector.load %arg7[%c0_11, %c0_12] : memref<32x128xf32, #tpu.memory_space<vmem>>, vector<32x128xf32>
      tpu.vector_store %arg7[%c0_11, %c0_12], %12 {strides = array<i32>} : memref<32x128xf32, #tpu.memory_space<vmem>>, vector<32x128xf32>,
    } else {
    }
    %c0 = arith.constant 0 : index
    %c0_1 = arith.constant 0 : index
    %3 = vector.load %arg7[%c0, %c0_1] : memref<32x128xf32, #tpu.memory_space<vmem>>, vector<32x128xf32>
    %c0_2 = arith.constant 0 : index
    %c0_3 = arith.constant 0 : index
    %4 = vector.load %arg3[%c0_2, %c0_3] : memref<32x640xbf16, #tpu.memory_space<vmem>>, vector<32x640xbf16>
    %c0_4 = arith.constant 0 : index
    %c0_5 = arith.constant 0 : index
    %5 = vector.load %arg4[%c0_4, %c0_5] : memref<640x128xbf16, #tpu.memory_space<vmem>>, vector<640x128xbf16>
    %cst = arith.constant dense<0.000000e+00> : vector<32x128xf32>
    %6 = tpu.matmul %4, %5, %cst {dimension_numbers = #tpu.dot_dimension_numbers<[1], [0], [0], [1], [0, 0, 1, 1], [], []>} : vector<32x640xbf16>, vector<640x128xbf16>, vector<32x128xf32> -> vector<32x128xf32>
    %7 = arith.addf %3, %6 : vector<32x128xf32>
    %c0_6 = arith.constant 0 : index
    %c0_7 = arith.constant 0 : index
    %8 = vector.load %arg7[%c0_6, %c0_7] : memref<32x128xf32, #tpu.memory_space<vmem>>, vector<32x128xf32>
    tpu.vector_store %arg7[%c0_6, %c0_7], %7 {strides = array<i32>} : memref<32x128xf32, #tpu.memory_space<vmem>>, vector<32x128xf32>,
    %c0_i32_8 = arith.constant 0 : i32
    %9 = arith.cmpi eq, %arg2, %c0_i32_8 : i32
    %10 = arith.extui %9 : i1 to i32
    %c0_i32_9 = arith.constant 0 : i32
    %11 = arith.cmpi ne, %10, %c0_i32_9 : i32
    scf.if %11 {
      %c0_10 = arith.constant 0 : index
      %c0_11 = arith.constant 0 : index
      %12 = vector.load %arg7[%c0_10, %c0_11] : memref<32x128xf32, #tpu.memory_space<vmem>>, vector<32x128xf32>
      %c0_12 = arith.constant 0 : index
      %c0_13 = arith.constant 0 : index
      %13 = vector.load %arg5[%c0_12, %c0_13] : memref<1x128xf32, #tpu.memory_space<vmem>>, vector<1x128xf32>
      %14 = vector.broadcast %13 : vector<1x128xf32> to vector<32x128xf32>
      %15 = arith.addf %12, %14 : vector<32x128xf32>
      %cst_14 = arith.constant 0.000000e+00 : f32
      %16 = vector.broadcast %cst_14 : f32 to vector<32x128xf32>
      %17 = arith.cmpf oge, %15, %16 : vector<32x128xf32>
      %cst_15 = arith.constant 2.000000e-01 : f32
      %18 = vector.broadcast %cst_15 : f32 to vector<32x128xf32>
      %19 = arith.mulf %18, %15 : vector<32x128xf32>
      %20 = arith.select %17, %15, %19 : vector<32x128xi1>, vector<32x128xf32>
      %c0_16 = arith.constant 0 : index
      %c0_17 = arith.constant 0 : index
      %21 = vector.load %arg6[%c0_16, %c0_17] : memref<32x128xf32, #tpu.memory_space<vmem>>, vector<32x128xf32>
      tpu.vector_store %arg6[%c0_16, %c0_17], %20 {strides = array<i32>} : memref<32x128xf32, #tpu.memory_space<vmem>>, vector<32x128xf32>,
    } else {
    }
    return
  }
  func.func @transform_0(%arg0: i32, %arg1: i32, %arg2: i32) -> (i32, i32) {
    %c0_i32 = arith.constant 0 : i32
    return %arg0, %arg2 : i32, i32
  }
  func.func @transform_1(%arg0: i32, %arg1: i32, %arg2: i32) -> (i32, i32) {
    %c0_i32 = arith.constant 0 : i32
    return %arg2, %arg1 : i32, i32
  }
  func.func @transform_2(%arg0: i32, %arg1: i32, %arg2: i32) -> (i32, i32) {
    %c0_i32 = arith.constant 0 : i32
    %c0_i32_0 = arith.constant 0 : i32
    return %c0_i32, %arg1 : i32, i32
  }
  func.func @transform_3(%arg0: i32, %arg1: i32, %arg2: i32) -> (i32, i32) {
    %c0_i32 = arith.constant 0 : i32
    return %arg0, %arg1 : i32, i32
  }
}

module attributes {stable_mosaic.version = 11 : i64} {
  func.func @_matmul_bias_act_kernel(%arg0: i32, %arg1: i32, %arg2: i32, %arg3: memref<128x384xbf16, #tpu.memory_space<vmem>>, %arg4: memref<384x128xbf16, #tpu.memory_space<vmem>>, %arg5: memref<1x128xf32, #tpu.memory_space<vmem>>, %arg6: memref<128x128xf32, #tpu.memory_space<vmem>>, %arg7: memref<128x128xf32, #tpu.memory_space<vmem>>) attributes {dimension_semantics = [#tpu.dimension_semantics<parallel>, #tpu.dimension_semantics<parallel>, #tpu.dimension_semantics<arbitrary>], iteration_bounds = array<i64: 1, 1, 1>, scalar_prefetch = 0 : i64, scratch_operands = 1 : i64, tpu.core_type = #tpu.core_type<tc>, window_params = [{transform_indices = @transform_0, window_bounds = array<i64: 128, 384>}, {transform_indices = @transform_1, window_bounds = array<i64: 384, 128>}, {transform_indices = @transform_2, window_bounds = array<i64: 1, 128>}, {transform_indices = @transform_3, window_bounds = array<i64: 128, 128>}]} {
    %c0_i32 = arith.constant 0 : i32
    %0 = arith.cmpi eq, %arg2, %c0_i32 : i32
    %1 = arith.extui %0 : i1 to i32
    %c0_i32_0 = arith.constant 0 : i32
    %2 = arith.cmpi ne, %1, %c0_i32_0 : i32
    scf.if %2 {
      %cst_10 = arith.constant 0.000000e+00 : f32
      %12 = vector.broadcast %cst_10 : f32 to vector<128x128xf32>
      %c0_11 = arith.constant 0 : index
      %c0_12 = arith.constant 0 : index
      %13 = vector.load %arg7[%c0_11, %c0_12] : memref<128x128xf32, #tpu.memory_space<vmem>>, vector<128x128xf32>
      tpu.vector_store %arg7[%c0_11, %c0_12], %12 {strides = array<i32>} : memref<128x128xf32, #tpu.memory_space<vmem>>, vector<128x128xf32>,
    } else {
    }
    %c0 = arith.constant 0 : index
    %c0_1 = arith.constant 0 : index
    %3 = vector.load %arg7[%c0, %c0_1] : memref<128x128xf32, #tpu.memory_space<vmem>>, vector<128x128xf32>
    %c0_2 = arith.constant 0 : index
    %c0_3 = arith.constant 0 : index
    %4 = vector.load %arg3[%c0_2, %c0_3] : memref<128x384xbf16, #tpu.memory_space<vmem>>, vector<128x384xbf16>
    %c0_4 = arith.constant 0 : index
    %c0_5 = arith.constant 0 : index
    %5 = vector.load %arg4[%c0_4, %c0_5] : memref<384x128xbf16, #tpu.memory_space<vmem>>, vector<384x128xbf16>
    %cst = arith.constant dense<0.000000e+00> : vector<128x128xf32>
    %6 = tpu.matmul %4, %5, %cst {dimension_numbers = #tpu.dot_dimension_numbers<[1], [0], [0], [1], [0, 0, 1, 1], [], []>} : vector<128x384xbf16>, vector<384x128xbf16>, vector<128x128xf32> -> vector<128x128xf32>
    %7 = arith.addf %3, %6 : vector<128x128xf32>
    %c0_6 = arith.constant 0 : index
    %c0_7 = arith.constant 0 : index
    %8 = vector.load %arg7[%c0_6, %c0_7] : memref<128x128xf32, #tpu.memory_space<vmem>>, vector<128x128xf32>
    tpu.vector_store %arg7[%c0_6, %c0_7], %7 {strides = array<i32>} : memref<128x128xf32, #tpu.memory_space<vmem>>, vector<128x128xf32>,
    %c0_i32_8 = arith.constant 0 : i32
    %9 = arith.cmpi eq, %arg2, %c0_i32_8 : i32
    %10 = arith.extui %9 : i1 to i32
    %c0_i32_9 = arith.constant 0 : i32
    %11 = arith.cmpi ne, %10, %c0_i32_9 : i32
    scf.if %11 {
      %c0_10 = arith.constant 0 : index
      %c0_11 = arith.constant 0 : index
      %12 = vector.load %arg7[%c0_10, %c0_11] : memref<128x128xf32, #tpu.memory_space<vmem>>, vector<128x128xf32>
      %c0_12 = arith.constant 0 : index
      %c0_13 = arith.constant 0 : index
      %13 = vector.load %arg5[%c0_12, %c0_13] : memref<1x128xf32, #tpu.memory_space<vmem>>, vector<1x128xf32>
      %14 = vector.broadcast %13 : vector<1x128xf32> to vector<128x128xf32>
      %15 = arith.addf %12, %14 : vector<128x128xf32>
      %cst_14 = arith.constant 0.000000e+00 : f32
      %16 = vector.broadcast %cst_14 : f32 to vector<128x128xf32>
      %17 = arith.cmpf oge, %15, %16 : vector<128x128xf32>
      %cst_15 = arith.constant 2.000000e-01 : f32
      %18 = vector.broadcast %cst_15 : f32 to vector<128x128xf32>
      %19 = arith.mulf %18, %15 : vector<128x128xf32>
      %20 = arith.select %17, %15, %19 : vector<128x128xi1>, vector<128x128xf32>
      %c0_16 = arith.constant 0 : index
      %c0_17 = arith.constant 0 : index
      %21 = vector.load %arg6[%c0_16, %c0_17] : memref<128x128xf32, #tpu.memory_space<vmem>>, vector<128x128xf32>
      tpu.vector_store %arg6[%c0_16, %c0_17], %20 {strides = array<i32>} : memref<128x128xf32, #tpu.memory_space<vmem>>, vector<128x128xf32>,
    } else {
    }
    return
  }
  func.func @transform_0(%arg0: i32, %arg1: i32, %arg2: i32) -> (i32, i32) {
    %c0_i32 = arith.constant 0 : i32
    return %arg0, %arg2 : i32, i32
  }
  func.func @transform_1(%arg0: i32, %arg1: i32, %arg2: i32) -> (i32, i32) {
    %c0_i32 = arith.constant 0 : i32
    return %arg2, %arg1 : i32, i32
  }
  func.func @transform_2(%arg0: i32, %arg1: i32, %arg2: i32) -> (i32, i32) {
    %c0_i32 = arith.constant 0 : i32
    %c0_i32_0 = arith.constant 0 : i32
    return %c0_i32, %arg1 : i32, i32
  }
  func.func @transform_3(%arg0: i32, %arg1: i32, %arg2: i32) -> (i32, i32) {
    %c0_i32 = arith.constant 0 : i32
    return %arg0, %arg1 : i32, i32
  }
}

module attributes {stable_mosaic.version = 11 : i64} {
  func.func @_matmul_bias_act_kernel(%arg0: i32, %arg1: i32, %arg2: i32, %arg3: memref<256x256xbf16, #tpu.memory_space<vmem>>, %arg4: memref<256x128xbf16, #tpu.memory_space<vmem>>, %arg5: memref<1x128xf32, #tpu.memory_space<vmem>>, %arg6: memref<256x128xf32, #tpu.memory_space<vmem>>, %arg7: memref<256x128xf32, #tpu.memory_space<vmem>>) attributes {dimension_semantics = [#tpu.dimension_semantics<parallel>, #tpu.dimension_semantics<parallel>, #tpu.dimension_semantics<arbitrary>], iteration_bounds = array<i64: 2, 1, 1>, scalar_prefetch = 0 : i64, scratch_operands = 1 : i64, tpu.core_type = #tpu.core_type<tc>, window_params = [{transform_indices = @transform_0, window_bounds = array<i64: 256, 256>}, {transform_indices = @transform_1, window_bounds = array<i64: 256, 128>}, {transform_indices = @transform_2, window_bounds = array<i64: 1, 128>}, {transform_indices = @transform_3, window_bounds = array<i64: 256, 128>}]} {
    %c0_i32 = arith.constant 0 : i32
    %0 = arith.cmpi eq, %arg2, %c0_i32 : i32
    %1 = arith.extui %0 : i1 to i32
    %c0_i32_0 = arith.constant 0 : i32
    %2 = arith.cmpi ne, %1, %c0_i32_0 : i32
    scf.if %2 {
      %cst_10 = arith.constant 0.000000e+00 : f32
      %12 = vector.broadcast %cst_10 : f32 to vector<256x128xf32>
      %c0_11 = arith.constant 0 : index
      %c0_12 = arith.constant 0 : index
      %13 = vector.load %arg7[%c0_11, %c0_12] : memref<256x128xf32, #tpu.memory_space<vmem>>, vector<256x128xf32>
      tpu.vector_store %arg7[%c0_11, %c0_12], %12 {strides = array<i32>} : memref<256x128xf32, #tpu.memory_space<vmem>>, vector<256x128xf32>,
    } else {
    }
    %c0 = arith.constant 0 : index
    %c0_1 = arith.constant 0 : index
    %3 = vector.load %arg7[%c0, %c0_1] : memref<256x128xf32, #tpu.memory_space<vmem>>, vector<256x128xf32>
    %c0_2 = arith.constant 0 : index
    %c0_3 = arith.constant 0 : index
    %4 = vector.load %arg3[%c0_2, %c0_3] : memref<256x256xbf16, #tpu.memory_space<vmem>>, vector<256x256xbf16>
    %c0_4 = arith.constant 0 : index
    %c0_5 = arith.constant 0 : index
    %5 = vector.load %arg4[%c0_4, %c0_5] : memref<256x128xbf16, #tpu.memory_space<vmem>>, vector<256x128xbf16>
    %cst = arith.constant dense<0.000000e+00> : vector<256x128xf32>
    %6 = tpu.matmul %4, %5, %cst {dimension_numbers = #tpu.dot_dimension_numbers<[1], [0], [0], [1], [0, 0, 1, 1], [], []>} : vector<256x256xbf16>, vector<256x128xbf16>, vector<256x128xf32> -> vector<256x128xf32>
    %7 = arith.addf %3, %6 : vector<256x128xf32>
    %c0_6 = arith.constant 0 : index
    %c0_7 = arith.constant 0 : index
    %8 = vector.load %arg7[%c0_6, %c0_7] : memref<256x128xf32, #tpu.memory_space<vmem>>, vector<256x128xf32>
    tpu.vector_store %arg7[%c0_6, %c0_7], %7 {strides = array<i32>} : memref<256x128xf32, #tpu.memory_space<vmem>>, vector<256x128xf32>,
    %c0_i32_8 = arith.constant 0 : i32
    %9 = arith.cmpi eq, %arg2, %c0_i32_8 : i32
    %10 = arith.extui %9 : i1 to i32
    %c0_i32_9 = arith.constant 0 : i32
    %11 = arith.cmpi ne, %10, %c0_i32_9 : i32
    scf.if %11 {
      %c0_10 = arith.constant 0 : index
      %c0_11 = arith.constant 0 : index
      %12 = vector.load %arg7[%c0_10, %c0_11] : memref<256x128xf32, #tpu.memory_space<vmem>>, vector<256x128xf32>
      %c0_12 = arith.constant 0 : index
      %c0_13 = arith.constant 0 : index
      %13 = vector.load %arg5[%c0_12, %c0_13] : memref<1x128xf32, #tpu.memory_space<vmem>>, vector<1x128xf32>
      %14 = vector.broadcast %13 : vector<1x128xf32> to vector<256x128xf32>
      %15 = arith.addf %12, %14 : vector<256x128xf32>
      %cst_14 = arith.constant 0.000000e+00 : f32
      %16 = vector.broadcast %cst_14 : f32 to vector<256x128xf32>
      %17 = arith.cmpf oge, %15, %16 : vector<256x128xf32>
      %cst_15 = arith.constant 2.000000e-01 : f32
      %18 = vector.broadcast %cst_15 : f32 to vector<256x128xf32>
      %19 = arith.mulf %18, %15 : vector<256x128xf32>
      %20 = arith.select %17, %15, %19 : vector<256x128xi1>, vector<256x128xf32>
      %c0_16 = arith.constant 0 : index
      %c0_17 = arith.constant 0 : index
      %21 = vector.load %arg6[%c0_16, %c0_17] : memref<256x128xf32, #tpu.memory_space<vmem>>, vector<256x128xf32>
      tpu.vector_store %arg6[%c0_16, %c0_17], %20 {strides = array<i32>} : memref<256x128xf32, #tpu.memory_space<vmem>>, vector<256x128xf32>,
    } else {
    }
    return
  }
  func.func @transform_0(%arg0: i32, %arg1: i32, %arg2: i32) -> (i32, i32) {
    %c0_i32 = arith.constant 0 : i32
    return %arg0, %arg2 : i32, i32
  }
  func.func @transform_1(%arg0: i32, %arg1: i32, %arg2: i32) -> (i32, i32) {
    %c0_i32 = arith.constant 0 : i32
    return %arg2, %arg1 : i32, i32
  }
  func.func @transform_2(%arg0: i32, %arg1: i32, %arg2: i32) -> (i32, i32) {
    %c0_i32 = arith.constant 0 : i32
    %c0_i32_0 = arith.constant 0 : i32
    return %c0_i32, %arg1 : i32, i32
  }
  func.func @transform_3(%arg0: i32, %arg1: i32, %arg2: i32) -> (i32, i32) {
    %c0_i32 = arith.constant 0 : i32
    return %arg0, %arg1 : i32, i32
  }
}

module attributes {stable_mosaic.version = 11 : i64} {
  func.func @_matmul_bias_act_kernel(%arg0: i32, %arg1: i32, %arg2: i32, %arg3: memref<256x128xbf16, #tpu.memory_space<vmem>>, %arg4: memref<128x128xbf16, #tpu.memory_space<vmem>>, %arg5: memref<1x128xf32, #tpu.memory_space<vmem>>, %arg6: memref<256x128xf32, #tpu.memory_space<vmem>>, %arg7: memref<256x128xf32, #tpu.memory_space<vmem>>) attributes {dimension_semantics = [#tpu.dimension_semantics<parallel>, #tpu.dimension_semantics<parallel>, #tpu.dimension_semantics<arbitrary>], iteration_bounds = array<i64: 8, 1, 1>, scalar_prefetch = 0 : i64, scratch_operands = 1 : i64, tpu.core_type = #tpu.core_type<tc>, window_params = [{transform_indices = @transform_0, window_bounds = array<i64: 256, 128>}, {transform_indices = @transform_1, window_bounds = array<i64: 128, 128>}, {transform_indices = @transform_2, window_bounds = array<i64: 1, 128>}, {transform_indices = @transform_3, window_bounds = array<i64: 256, 128>}]} {
    %c0_i32 = arith.constant 0 : i32
    %0 = arith.cmpi eq, %arg2, %c0_i32 : i32
    %1 = arith.extui %0 : i1 to i32
    %c0_i32_0 = arith.constant 0 : i32
    %2 = arith.cmpi ne, %1, %c0_i32_0 : i32
    scf.if %2 {
      %cst_10 = arith.constant 0.000000e+00 : f32
      %12 = vector.broadcast %cst_10 : f32 to vector<256x128xf32>
      %c0_11 = arith.constant 0 : index
      %c0_12 = arith.constant 0 : index
      %13 = vector.load %arg7[%c0_11, %c0_12] : memref<256x128xf32, #tpu.memory_space<vmem>>, vector<256x128xf32>
      tpu.vector_store %arg7[%c0_11, %c0_12], %12 {strides = array<i32>} : memref<256x128xf32, #tpu.memory_space<vmem>>, vector<256x128xf32>,
    } else {
    }
    %c0 = arith.constant 0 : index
    %c0_1 = arith.constant 0 : index
    %3 = vector.load %arg7[%c0, %c0_1] : memref<256x128xf32, #tpu.memory_space<vmem>>, vector<256x128xf32>
    %c0_2 = arith.constant 0 : index
    %c0_3 = arith.constant 0 : index
    %4 = vector.load %arg3[%c0_2, %c0_3] : memref<256x128xbf16, #tpu.memory_space<vmem>>, vector<256x128xbf16>
    %c0_4 = arith.constant 0 : index
    %c0_5 = arith.constant 0 : index
    %5 = vector.load %arg4[%c0_4, %c0_5] : memref<128x128xbf16, #tpu.memory_space<vmem>>, vector<128x128xbf16>
    %cst = arith.constant dense<0.000000e+00> : vector<256x128xf32>
    %6 = tpu.matmul %4, %5, %cst {dimension_numbers = #tpu.dot_dimension_numbers<[1], [0], [0], [1], [0, 0, 1, 1], [], []>} : vector<256x128xbf16>, vector<128x128xbf16>, vector<256x128xf32> -> vector<256x128xf32>
    %7 = arith.addf %3, %6 : vector<256x128xf32>
    %c0_6 = arith.constant 0 : index
    %c0_7 = arith.constant 0 : index
    %8 = vector.load %arg7[%c0_6, %c0_7] : memref<256x128xf32, #tpu.memory_space<vmem>>, vector<256x128xf32>
    tpu.vector_store %arg7[%c0_6, %c0_7], %7 {strides = array<i32>} : memref<256x128xf32, #tpu.memory_space<vmem>>, vector<256x128xf32>,
    %c0_i32_8 = arith.constant 0 : i32
    %9 = arith.cmpi eq, %arg2, %c0_i32_8 : i32
    %10 = arith.extui %9 : i1 to i32
    %c0_i32_9 = arith.constant 0 : i32
    %11 = arith.cmpi ne, %10, %c0_i32_9 : i32
    scf.if %11 {
      %c0_10 = arith.constant 0 : index
      %c0_11 = arith.constant 0 : index
      %12 = vector.load %arg7[%c0_10, %c0_11] : memref<256x128xf32, #tpu.memory_space<vmem>>, vector<256x128xf32>
      %c0_12 = arith.constant 0 : index
      %c0_13 = arith.constant 0 : index
      %13 = vector.load %arg5[%c0_12, %c0_13] : memref<1x128xf32, #tpu.memory_space<vmem>>, vector<1x128xf32>
      %14 = vector.broadcast %13 : vector<1x128xf32> to vector<256x128xf32>
      %15 = arith.addf %12, %14 : vector<256x128xf32>
      %c0_14 = arith.constant 0 : index
      %c0_15 = arith.constant 0 : index
      %16 = vector.load %arg6[%c0_14, %c0_15] : memref<256x128xf32, #tpu.memory_space<vmem>>, vector<256x128xf32>
      tpu.vector_store %arg6[%c0_14, %c0_15], %15 {strides = array<i32>} : memref<256x128xf32, #tpu.memory_space<vmem>>, vector<256x128xf32>,
    } else {
    }
    return
  }
  func.func @transform_0(%arg0: i32, %arg1: i32, %arg2: i32) -> (i32, i32) {
    %c0_i32 = arith.constant 0 : i32
    return %arg0, %arg2 : i32, i32
  }
  func.func @transform_1(%arg0: i32, %arg1: i32, %arg2: i32) -> (i32, i32) {
    %c0_i32 = arith.constant 0 : i32
    return %arg2, %arg1 : i32, i32
  }
  func.func @transform_2(%arg0: i32, %arg1: i32, %arg2: i32) -> (i32, i32) {
    %c0_i32 = arith.constant 0 : i32
    %c0_i32_0 = arith.constant 0 : i32
    return %c0_i32, %arg1 : i32, i32
  }
  func.func @transform_3(%arg0: i32, %arg1: i32, %arg2: i32) -> (i32, i32) {
    %c0_i32 = arith.constant 0 : i32
    return %arg0, %arg1 : i32, i32
  }
}

</mosaic_0001>

<bundles_post_ra>
// kernel: vae_forward.27
= control target key start
LH: loop header
LB: loop body
LE: loop exit
PB: predicated region body
PF: predicated region fallthrough
CT: control target
= control target key end

     0   :  { %s422_s12 = smov 0   ;;  %s613_s0 = inlined_call_operand.vmem [shape: f32[512,128], index: 0, kind: input, shape index: {}]   ;;  %s614_s1 = inlined_call_operand.vmem [shape: f32[1,128], index: 1, kind: input, shape index: {}]   ;;  %s615_s2 = inlined_call_operand.vmem [shape: f32[1,128], index: 2, kind: input, shape index: {}]   ;;  %s616_s3 = inlined_call_operand.vmem [shape: f32[512,8], index: 3, kind: output, shape index: {}]  }
   0x1 LB: > { %s373_s13 = sadd.s32 4294967295, %s400_s12   ;;  %p377_p0 = scmp.ge.s32.totalorder %s400_s12, 1  ;;  %s400_s12 = sphi %s422_s12, %s13_s12  }
   0x2   : > { %p138_p1 = scmp.lt.s32.totalorder %s400_s12, 3 }
   0x4   : > { %p139_p2 = pnand %p377_p0, %p138_p1 }
   0x5   : > { %s378_s14 = sshll.u32 (!%p139_p2), %s373_s13, 5 }
   0x6   : > { %142 = sbr.rel (%p139_p2) target bundleno = 38 (0x26), region = 32  ;;  %p163_p3 = scmp.lt.s32.totalorder (!%p139_p2), %s378_s14, 63 }
   0xb   : > { %s618_s14 = smov (!%p163_p3, %s378_s14), 63  ;;  %v433_v0 = vld [vmem:[%s614_s1] ss:$0 sm:$0xff]  ;;  %vm284_vm0 = vcmask 64512  }
   0xc   : > { %s379_s15 = sshll.u32 %s618_s14, 3  ;;  %v443_v1 = vld [vmem:[%s615_s2] ss:$0 sm:$0xff] }
   0xd   : > { %s438_s20 = scalar_lea.vmem %s613_s0, %s379_s15  ;;  %s457_s25 = scalar_lea.vmem %s616_s3, %s379_s15 }
   0xe   : > { %v174_v2 = vld [vmem:[%s438_s20] sm:$0xff]  ;;  %v175_v3 = vld [vmem:[%s438_s20 + $0x8] sm:$0xff]  ;;  %v176_v4 = vld [vmem:[%s438_s20 + $0x10] sm:$0xff] }
   0xf   : > { %v213_v5 = vmul.f32 %v433_v0, %v174_v2  ;;  %v214_v6 = vmul.f32 %v433_v0, %v175_v3  ;;  %v215_v7 = vmul.f32 %v433_v0, %v176_v4  ;;  %v177_v8 = vld [vmem:[%s438_s20 + $0x18] sm:$0xff]  ;;  %v178_v9 = vld [vmem:[%s438_s20 + $0x20] sm:$0xff]  ;;  %v179_v10 = vld [vmem:[%s438_s20 + $0x28] sm:$0xff] }
  0x10   : > { %v216_v11 = vmul.f32 %v433_v0, %v177_v8  ;;  %v217_v12 = vmul.f32 %v433_v0, %v178_v9  ;;  %v218_v13 = vmul.f32 %v433_v0, %v179_v10  ;;  %v180_v14 = vld [vmem:[%s438_s20 + $0x30] sm:$0xff]  ;;  %v181_v15 = vld [vmem:[%s438_s20 + $0x38] sm:$0xff]  ;;  %v182_v16 = vld [vmem:[%s438_s20 + $0x40] sm:$0xff] }
  0x11   : > { %v252_v17 = vadd.f32 %v443_v1, %v213_v5  ;;  %v253_v18 = vadd.f32 %v443_v1, %v214_v6  ;;  %v254_v19 = vadd.f32 %v443_v1, %v215_v7  ;;  %v219_v20 = vmul.f32 %v433_v0, %v180_v14  ;;  %v183_v21 = vld [vmem:[%s438_s20 + $0x48] sm:$0xff]  ;;  %v184_v22 = vld [vmem:[%s438_s20 + $0x50] sm:$0xff]  ;;  %v185_v23 = vld [vmem:[%s438_s20 + $0x58] sm:$0xff] }
  0x12   : > { %v255_v24 = vadd.f32 %v443_v1, %v216_v11  ;;  %v256_v25 = vadd.f32 %v443_v1, %v217_v12  ;;  %v257_v26 = vadd.f32 %v443_v1, %v218_v13  ;;  %v220_v27 = vmul.f32 %v433_v0, %v181_v15  ;;  %v186_v28 = vld [vmem:[%s438_s20 + $0x60] sm:$0xff]  ;;  %v187_v29 = vld [vmem:[%s438_s20 + $0x68] sm:$0xff]  ;;  %v188_v30 = vld [vmem:[%s438_s20 + $0x70] sm:$0xff] }
  0x13   : > { %285 = vst.msk [vmem:[%s457_s25] sm:$0xff] %vm284_vm0, %v252_v17  ;;  %286 = vst.msk [vmem:[%s457_s25 + $0x8] sm:$0xff] %vm284_vm0, %v253_v18  ;;  %v258_v31 = vadd.f32 %v443_v1, %v219_v20  ;;  %v221_v32 = vmul.f32 %v433_v0, %v182_v16  ;;  %v222_v33 = vmul.f32 %v433_v0, %v183_v21  ;;  %v189_v35 = vld [vmem:[%s438_s20 + $0x78] sm:$0xff]  ;;  %v190_v40 = vld [vmem:[%s438_s20 + $0x80] sm:$0xff] }
  0x14   : > { %287 = vst.msk [vmem:[%s457_s25 + $0x10] sm:$0xff] %vm284_vm0, %v254_v19  ;;  %v223_v34 = vmul.f32 %v433_v0, %v184_v22  ;;  %288 = vst.msk [vmem:[%s457_s25 + $0x18] sm:$0xff] %vm284_vm0, %v255_v24  ;;  %v259_v36 = vadd.f32 %v443_v1, %v220_v27  ;;  %v224_v37 = vmul.f32 %v433_v0, %v185_v23  ;;  %v191_v41 = vld [vmem:[%s438_s20 + $0x88] sm:$0xff]  ;;  %v192_v42 = vld [vmem:[%s438_s20 + $0x90] sm:$0xff] }
  0x15   : > { %289 = vst.msk [vmem:[%s457_s25 + $0x20] sm:$0xff] %vm284_vm0, %v256_v25  ;;  %290 = vst.msk [vmem:[%s457_s25 + $0x28] sm:$0xff] %vm284_vm0, %v257_v26  ;;  %v225_v38 = vmul.f32 %v433_v0, %v186_v28  ;;  %v226_v39 = vmul.f32 %v433_v0, %v187_v29  ;;  %v260_v43 = vadd.f32 %v443_v1, %v221_v32  ;;  %v193_v47 = vld [vmem:[%s438_s20 + $0x98] sm:$0xff]  ;;  %v194_v48 = vld [vmem:[%s438_s20 + $0xa0] sm:$0xff] }
  0x16   : > { %291 = vst.msk [vmem:[%s457_s25 + $0x30] sm:$0xff] %vm284_vm0, %v258_v31  ;;  %v261_v44 = vadd.f32 %v443_v1, %v222_v33  ;;  %v262_v45 = vadd.f32 %v443_v1, %v223_v34  ;;  %v227_v46 = vmul.f32 %v433_v0, %v188_v30  ;;  %v195_v49 = vld [vmem:[%s438_s20 + $0xa8] sm:$0xff]  ;;  %292 = vst.msk [vmem:[%s457_s25 + $0x38] sm:$0xff] %vm284_vm0, %v259_v36  ;;  %v196_v54 = vld [vmem:[%s438_s20 + $0xb0] sm:$0xff] }
  0x17   : > { %v263_v50 = vadd.f32 %v443_v1, %v224_v37  ;;  %v264_v51 = vadd.f32 %v443_v1, %v225_v38  ;;  %v265_v52 = vadd.f32 %v443_v1, %v226_v39  ;;  %v228_v53 = vmul.f32 %v433_v0, %v189_v35  ;;  %293 = vst.msk [vmem:[%s457_s25 + $0x40] sm:$0xff] %vm284_vm0, %v260_v43  ;;  %v197_v59 = vld [vmem:[%s438_s20 + $0xb8] sm:$0xff]  ;;  %v198_v2 = vld [vmem:[%s438_s20 + $0xc0] sm:$0xff]  ;;  %v199_v3 = vld [vmem:[%s438_s20 + $0xc8] sm:$0xff] }
  0x18   : > { %294 = vst.msk [vmem:[%s457_s25 + $0x48] sm:$0xff] %vm284_vm0, %v261_v44  ;;  %295 = vst.msk [vmem:[%s457_s25 + $0x50] sm:$0xff] %vm284_vm0, %v262_v45  ;;  %v266_v55 = vadd.f32 %v443_v1, %v227_v46  ;;  %v229_v56 = vmul.f32 %v433_v0, %v190_v40  ;;  %v230_v57 = vmul.f32 %v433_v0, %v191_v41  ;;  %v200_v4 = vld [vmem:[%s438_s20 + $0xd0] sm:$0xff]  ;;  %v201_v9 = vld [vmem:[%s438_s20 + $0xd8] sm:$0xff] }
  0x19   : > { %v231_v58 = vmul.f32 %v433_v0, %v192_v42  ;;  %296 = vst.msk [vmem:[%s457_s25 + $0x58] sm:$0xff] %vm284_vm0, %v263_v50  ;;  %297 = vst.msk [vmem:[%s457_s25 + $0x60] sm:$0xff] %vm284_vm0, %v264_v51  ;;  %v267_v60 = vadd.f32 %v443_v1, %v228_v53  ;;  %v232_v61 = vmul.f32 %v433_v0, %v193_v47  ;;  %v202_v10 = vld [vmem:[%s438_s20 + $0xe0] sm:$0xff]  ;;  %v203_v11 = vld [vmem:[%s438_s20 + $0xe8] sm:$0xff] }
  0x1a   : > { %298 = vst.msk [vmem:[%s457_s25 + $0x68] sm:$0xff] %vm284_vm0, %v265_v52  ;;  %v233_v62 = vmul.f32 %v433_v0, %v194_v48  ;;  %v234_v63 = vmul.f32 %v433_v0, %v195_v49  ;;  %299 = vst.msk [vmem:[%s457_s25 + $0x70] sm:$0xff] %vm284_vm0, %v266_v55  ;;  %v268_v5 = vadd.f32 %v443_v1, %v229_v56  ;;  %v204_v16 = vld [vmem:[%s438_s20 + $0xf0] sm:$0xff]  ;;  %v205_v21 = vld [vmem:[%s438_s20 + $0xf8] sm:$0xff] }
  0x1b   : > { %v269_v6 = vadd.f32 %v443_v1, %v230_v57  ;;  %v270_v7 = vadd.f32 %v443_v1, %v231_v58  ;;  %v235_v8 = vmul.f32 %v433_v0, %v196_v54  ;;  %300 = vst.msk [vmem:[%s457_s25 + $0x78] sm:$0xff] %vm284_vm0, %v267_v60  ;;  %v271_v12 = vadd.f32 %v443_v1, %v232_v61 }
  0x1c   : > { %v272_v13 = vadd.f32 %v443_v1, %v233_v62  ;;  %v273_v14 = vadd.f32 %v443_v1, %v234_v63  ;;  %v236_v15 = vmul.f32 %v433_v0, %v197_v59  ;;  %301 = vst.msk [vmem:[%s457_s25 + $0x80] sm:$0xff] %vm284_vm0, %v268_v5  ;;  %v237_v18 = vmul.f32 %v433_v0, %v198_v2 }
  0x1d   : > { %302 = vst.msk [vmem:[%s457_s25 + $0x88] sm:$0xff] %vm284_vm0, %v269_v6  ;;  %303 = vst.msk [vmem:[%s457_s25 + $0x90] sm:$0xff] %vm284_vm0, %v270_v7  ;;  %v274_v17 = vadd.f32 %v443_v1, %v235_v8  ;;  %v238_v19 = vmul.f32 %v433_v0, %v199_v3  ;;  %v239_v20 = vmul.f32 %v433_v0, %v200_v4 }
  0x1e   : > { %304 = vst.msk [vmem:[%s457_s25 + $0x98] sm:$0xff] %vm284_vm0, %v271_v12  ;;  %305 = vst.msk [vmem:[%s457_s25 + $0xa0] sm:$0xff] %vm284_vm0, %v272_v13  ;;  %v275_v22 = vadd.f32 %v443_v1, %v236_v15  ;;  %v240_v23 = vmul.f32 %v433_v0, %v201_v9  ;;  %v241_v24 = vmul.f32 %v433_v0, %v202_v10 }
  0x1f   : > { %306 = vst.msk [vmem:[%s457_s25 + $0xa8] sm:$0xff] %vm284_vm0, %v273_v14  ;;  %v242_v25 = vmul.f32 %v433_v0, %v203_v11  ;;  %307 = vst.msk [vmem:[%s457_s25 + $0xb0] sm:$0xff] %vm284_vm0, %v274_v17  ;;  %v276_v26 = vadd.f32 %v443_v1, %v237_v18  ;;  %v277_v27 = vadd.f32 %v443_v1, %v238_v19 }
  0x20   : > { %v278_v28 = vadd.f32 %v443_v1, %v239_v20  ;;  %v243_v29 = vmul.f32 %v433_v0, %v204_v16  ;;  %308 = vst.msk [vmem:[%s457_s25 + $0xb8] sm:$0xff] %vm284_vm0, %v275_v22  ;;  %v279_v30 = vadd.f32 %v443_v1, %v240_v23  ;;  %v280_v31 = vadd.f32 %v443_v1, %v241_v24 }
  0x21   : > { %v281_v32 = vadd.f32 %v443_v1, %v242_v25  ;;  %v244_v33 = vmul.f32 %v433_v0, %v205_v21  ;;  %309 = vst.msk [vmem:[%s457_s25 + $0xc0] sm:$0xff] %vm284_vm0, %v276_v26  ;;  %310 = vst.msk [vmem:[%s457_s25 + $0xc8] sm:$0xff] %vm284_vm0, %v277_v27 }
  0x22   : > { %311 = vst.msk [vmem:[%s457_s25 + $0xd0] sm:$0xff] %vm284_vm0, %v278_v28  ;;  %v282_v34 = vadd.f32 %v443_v1, %v243_v29  ;;  %312 = vst.msk [vmem:[%s457_s25 + $0xd8] sm:$0xff] %vm284_vm0, %v279_v30 }
  0x23   : > { %313 = vst.msk [vmem:[%s457_s25 + $0xe0] sm:$0xff] %vm284_vm0, %v280_v31  ;;  %314 = vst.msk [vmem:[%s457_s25 + $0xe8] sm:$0xff] %vm284_vm0, %v281_v32  ;;  %v283_v35 = vadd.f32 %v443_v1, %v244_v33 }
  0x24   : > { %315 = vst.msk [vmem:[%s457_s25 + $0xf0] sm:$0xff] %vm284_vm0, %v282_v34 }
  0x25   : > { %316 = vst.msk [vmem:[%s457_s25 + $0xf8] sm:$0xff] %vm284_vm0, %v283_v35 }
  0x26 PF: > { %s13_s12 = sadd.s32 1, %s400_s12  }
  0x27   : > { %p10_p4 = scmp.ge.s32.totalorder %s13_s12, 4  }
  0x29   :  { %12 = sbr.rel (!%p10_p4) target bundleno = 1 (0x1), region = 62 }

// kernel: vae_forward.26
= control target key start
LH: loop header
LB: loop body
LE: loop exit
PB: predicated region body
PF: predicated region fallthrough
CT: control target
= control target key end

     0   :  { %s355_s9 = smov 0   ;;  %s421_s0 = inlined_call_operand.vmem [shape: f32[512,128], index: 0, kind: input, shape index: {}]   ;;  %s422_s1 = inlined_call_operand.vmem [shape: f32[1,128], index: 1, kind: output, shape index: {0}]   ;;  %s423_s2 = inlined_call_operand.vmem [shape: f32[1,128], index: 2, kind: output, shape index: {1}]  }
   0x1 LB: > { %s313_s10 = sadd.s32 4294967295, %s337_s9   ;;  %p316_p0 = scmp.ge.s32.totalorder %s337_s9, 1  ;;  %s337_s9 = sphi %s355_s9, %s13_s9  }
   0x2   : > { %p106_p1 = scmp.lt.s32.totalorder %s337_s9, 3 }
   0x4   : > { %p107_p2 = pnand %p316_p0, %p106_p1 }
   0x5   : > { %s317_s11 = sshll.u32 (!%p107_p2), %s313_s10, 5  ;;  %p319_p4 = scmp.ne.s32.totalorder (!%p107_p2), %s313_s10, 0 }
   0x6   : > { %110 = sbr.rel (%p107_p2) target bundleno = 98 (0x62), region = 24  ;;  %p124_p3 = scmp.lt.s32.totalorder (!%p107_p2), %s317_s11, 63 }
   0xb   : > { %s425_s11 = smov (!%p124_p3, %s317_s11), 63  ;;  %132 = sbr.rel (%p319_p4) target bundleno = 18 (0x12), region = 28 }
   0xc   : > { %s318_s12 = sshll.u32 %s425_s11, 3 }
   0xd   : > { %s366_s15 = scalar_lea.vmem %s421_s0, %s318_s12 }
  0x10   : > { %v339_v0 = vmov 0.0  }
  0x11   : > { %133 = vst [vmem:[%s422_s1] sm:$0x1] %v339_v0  ;;  %134 = vst [vmem:[%s423_s2] sm:$0x1] %v339_v0 }
  0x12 PF: > { %v135_v1 = vld [vmem:[%s366_s15] sm:$0xff]  ;;  %v136_v2 = vld [vmem:[%s366_s15 + $0x8] sm:$0xff]  ;;  %v137_v3 = vld [vmem:[%s366_s15 + $0x10] sm:$0xff] }
  0x13   : > { %v138_v4 = vld [vmem:[%s366_s15 + $0x18] sm:$0xff]  ;;  %v168_v5 = vadd.f32 %v136_v2, %v135_v1  ;;  %v208_v6 = vmul.f32 %v135_v1, %v135_v1  ;;  %v209_v7 = vmul.f32 %v136_v2, %v136_v2  ;;  %v210_v8 = vmul.f32 %v137_v3, %v137_v3  ;;  %v139_v9 = vld [vmem:[%s366_s15 + $0x20] sm:$0xff]  ;;  %v140_v13 = vld [vmem:[%s366_s15 + $0x28] sm:$0xff] }
  0x14   : > { %v211_v11 = vmul.f32 %v138_v4, %v138_v4  ;;  %v212_v15 = vmul.f32 %v139_v9, %v139_v9  ;;  %v141_v17 = vld [vmem:[%s366_s15 + $0x30] sm:$0xff]  ;;  %v213_v19 = vmul.f32 %v140_v13, %v140_v13  ;;  %v142_v21 = vld [vmem:[%s366_s15 + $0x38] sm:$0xff]  ;;  %v143_v25 = vld [vmem:[%s366_s15 + $0x40] sm:$0xff] }
  0x15   : > { %v169_v10 = vadd.f32 %v168_v5, %v137_v3  ;;  %v240_v12 = vadd.f32 %v209_v7, %v208_v6  ;;  %v214_v23 = vmul.f32 %v141_v17, %v141_v17  ;;  %v215_v27 = vmul.f32 %v142_v21, %v142_v21  ;;  %v144_v29 = vld [vmem:[%s366_s15 + $0x48] sm:$0xff]  ;;  %v145_v33 = vld [vmem:[%s366_s15 + $0x50] sm:$0xff]  ;;  %v146_v37 = vld [vmem:[%s366_s15 + $0x58] sm:$0xff] }
  0x16   : > { %v216_v31 = vmul.f32 %v143_v25, %v143_v25  ;;  %v217_v35 = vmul.f32 %v144_v29, %v144_v29  ;;  %v218_v39 = vmul.f32 %v145_v33, %v145_v33  ;;  %v147_v41 = vld [vmem:[%s366_s15 + $0x60] sm:$0xff]  ;;  %v219_v43 = vmul.f32 %v146_v37, %v146_v37  ;;  %v148_v45 = vld [vmem:[%s366_s15 + $0x68] sm:$0xff]  ;;  %v149_v49 = vld [vmem:[%s366_s15 + $0x70] sm:$0xff] }
  0x17   : > { %v170_v14 = vadd.f32 %v169_v10, %v138_v4  ;;  %v241_v16 = vadd.f32 %v240_v12, %v210_v8  ;;  %v220_v47 = vmul.f32 %v147_v41, %v147_v41  ;;  %v221_v51 = vmul.f32 %v148_v45, %v148_v45  ;;  %v150_v53 = vld [vmem:[%s366_s15 + $0x78] sm:$0xff]  ;;  %v151_v57 = vld [vmem:[%s366_s15 + $0x80] sm:$0xff]  ;;  %v152_v61 = vld [vmem:[%s366_s15 + $0x88] sm:$0xff] }
  0x18   : > { %v222_v55 = vmul.f32 %v149_v49, %v149_v49  ;;  %v223_v59 = vmul.f32 %v150_v53, %v150_v53  ;;  %v224_v63 = vmul.f32 %v151_v57, %v151_v57  ;;  %v153_v1 = vld [vmem:[%s366_s15 + $0x90] sm:$0xff]  ;;  %v225_v3 = vmul.f32 %v152_v61, %v152_v61  ;;  %v154_v5 = vld [vmem:[%s366_s15 + $0x98] sm:$0xff] }
  0x19   : > { %v171_v18 = vadd.f32 %v170_v14, %v139_v9  ;;  %v242_v20 = vadd.f32 %v241_v16, %v211_v11  ;;  %v226_v7 = vmul.f32 %v153_v1, %v153_v1  ;;  %v155_v9 = vld [vmem:[%s366_s15 + $0xa0] sm:$0xff]  ;;  %v227_v11 = vmul.f32 %v154_v5, %v154_v5 }
  0x1b   : > { %v172_v22 = vadd.f32 %v171_v18, %v140_v13  ;;  %v243_v24 = vadd.f32 %v242_v20, %v212_v15  ;;  %v156_v13 = vld [vmem:[%s366_s15 + $0xa8] sm:$0xff]  ;;  %v228_v15 = vmul.f32 %v155_v9, %v155_v9 }
  0x1d   : > { %v173_v26 = vadd.f32 %v172_v22, %v141_v17  ;;  %v244_v28 = vadd.f32 %v243_v24, %v213_v19  ;;  %v157_v17 = vld [vmem:[%s366_s15 + $0xb0] sm:$0xff]  ;;  %v229_v19 = vmul.f32 %v156_v13, %v156_v13 }
  0x1f   : > { %v174_v30 = vadd.f32 %v173_v26, %v142_v21  ;;  %v245_v32 = vadd.f32 %v244_v28, %v214_v23  ;;  %v158_v21 = vld [vmem:[%s366_s15 + $0xb8] sm:$0xff]  ;;  %v230_v23 = vmul.f32 %v157_v17, %v157_v17 }
  0x21   : > { %v175_v34 = vadd.f32 %v174_v30, %v143_v25  ;;  %v246_v36 = vadd.f32 %v245_v32, %v215_v27  ;;  %v159_v25 = vld [vmem:[%s366_s15 + $0xc0] sm:$0xff]  ;;  %v231_v27 = vmul.f32 %v158_v21, %v158_v21 }
  0x23   : > { %v176_v38 = vadd.f32 %v175_v34, %v144_v29  ;;  %v247_v40 = vadd.f32 %v246_v36, %v216_v31  ;;  %v160_v29 = vld [vmem:[%s366_s15 + $0xc8] sm:$0xff]  ;;  %v232_v31 = vmul.f32 %v159_v25, %v159_v25 }
  0x25   : > { %v177_v42 = vadd.f32 %v176_v38, %v145_v33  ;;  %v248_v44 = vadd.f32 %v247_v40, %v217_v35  ;;  %v161_v33 = vld [vmem:[%s366_s15 + $0xd0] sm:$0xff]  ;;  %v233_v35 = vmul.f32 %v160_v29, %v160_v29 }
  0x27   : > { %v178_v46 = vadd.f32 %v177_v42, %v146_v37  ;;  %v249_v48 = vadd.f32 %v248_v44, %v218_v39  ;;  %v162_v37 = vld [vmem:[%s366_s15 + $0xd8] sm:$0xff]  ;;  %v234_v39 = vmul.f32 %v161_v33, %v161_v33 }
  0x29   : > { %v179_v50 = vadd.f32 %v178_v46, %v147_v41  ;;  %v250_v52 = vadd.f32 %v249_v48, %v219_v43  ;;  %v163_v41 = vld [vmem:[%s366_s15 + $0xe0] sm:$0xff]  ;;  %v235_v43 = vmul.f32 %v162_v37, %v162_v37 }
  0x2b   : > { %v180_v54 = vadd.f32 %v179_v50, %v148_v45  ;;  %v251_v56 = vadd.f32 %v250_v52, %v220_v47  ;;  %v164_v45 = vld [vmem:[%s366_s15 + $0xe8] sm:$0xff]  ;;  %v236_v47 = vmul.f32 %v163_v41, %v163_v41 }
  0x2d   : > { %v181_v58 = vadd.f32 %v180_v54, %v149_v49  ;;  %v252_v60 = vadd.f32 %v251_v56, %v221_v51  ;;  %v165_v49 = vld [vmem:[%s366_s15 + $0xf0] sm:$0xff]  ;;  %v237_v51 = vmul.f32 %v164_v45, %v164_v45 }
  0x2f   : > { %v182_v62 = vadd.f32 %v181_v58, %v150_v53  ;;  %v253_v0 = vadd.f32 %v252_v60, %v222_v55  ;;  %v166_v53 = vld [vmem:[%s366_s15 + $0xf8] sm:$0xff]  ;;  %v238_v55 = vmul.f32 %v165_v49, %v165_v49 }
  0x30   : > { %v239_v58 = vmul.f32 %v166_v53, %v166_v53 }
  0x31   : > { %v183_v2 = vadd.f32 %v182_v62, %v151_v57  ;;  %v254_v4 = vadd.f32 %v253_v0, %v223_v59 }
  0x33   : > { %v184_v6 = vadd.f32 %v183_v2, %v152_v61  ;;  %v255_v8 = vadd.f32 %v254_v4, %v224_v63 }
  0x35   : > { %v185_v10 = vadd.f32 %v184_v6, %v153_v1  ;;  %v256_v12 = vadd.f32 %v255_v8, %v225_v3 }
  0x37   : > { %v186_v14 = vadd.f32 %v185_v10, %v154_v5  ;;  %v257_v16 = vadd.f32 %v256_v12, %v226_v7  ;;  %v167_v7 = vld [vmem:[%s422_s1] sm:$0x1] }
  0x38   : > { %v207_v12 = vld [vmem:[%s423_s2] sm:$0x1] }
  0x39   : > { %v187_v18 = vadd.f32 %v186_v14, %v155_v9  ;;  %v258_v20 = vadd.f32 %v257_v16, %v227_v11 }
  0x3b   : > { %v188_v22 = vadd.f32 %v187_v18, %v156_v13  ;;  %v259_v24 = vadd.f32 %v258_v20, %v228_v15 }
  0x3d   : > { %v189_v26 = vadd.f32 %v188_v22, %v157_v17  ;;  %v260_v28 = vadd.f32 %v259_v24, %v229_v19 }
  0x3f   : > { %v190_v30 = vadd.f32 %v189_v26, %v158_v21  ;;  %v261_v32 = vadd.f32 %v260_v28, %v230_v23 }
  0x41   : > { %v191_v34 = vadd.f32 %v190_v30, %v159_v25  ;;  %v262_v36 = vadd.f32 %v261_v32, %v231_v27 }
  0x43   : > { %v192_v38 = vadd.f32 %v191_v34, %v160_v29  ;;  %v263_v40 = vadd.f32 %v262_v36, %v232_v31 }
  0x45   : > { %v193_v42 = vadd.f32 %v192_v38, %v161_v33  ;;  %v264_v44 = vadd.f32 %v263_v40, %v233_v35 }
  0x47   : > { %v194_v46 = vadd.f32 %v193_v42, %v162_v37  ;;  %v265_v48 = vadd.f32 %v264_v44, %v234_v39 }
  0x49   : > { %v195_v50 = vadd.f32 %v194_v46, %v163_v41  ;;  %v266_v52 = vadd.f32 %v265_v48, %v235_v43 }
  0x4b   : > { %v196_v54 = vadd.f32 %v195_v50, %v164_v45  ;;  %v267_v56 = vadd.f32 %v266_v52, %v236_v47 }
  0x4d   : > { %v197_v57 = vadd.f32 %v196_v54, %v165_v49  ;;  %v268_v59 = vadd.f32 %v267_v56, %v237_v51 }
  0x4f   : > { %v198_v60 = vadd.f32 %v197_v57, %v166_v53  ;;  %v269_v61 = vadd.f32 %v268_v59, %v238_v55 }
  0x51   : > { %v199_v62 = vrot.slane %v198_v60, 4  ;;  %v270_v63 = vadd.f32 %v269_v61, %v239_v58 }
  0x53   : > { %v200_v0 = vadd.f32 %v199_v62, %v198_v60  ;;  %v271_v1 = vrot.slane %v270_v63, 4 }
  0x55   : > { %v201_v2 = vrot.slane %v200_v0, 2  ;;  %v272_v3 = vadd.f32 %v271_v1, %v270_v63 }
  0x57   : > { %v202_v4 = vadd.f32 %v201_v2, %v200_v0  ;;  %v273_v5 = vrot.slane %v272_v3, 2 }
  0x59   : > { %v203_v6 = vrot.slane %v202_v4, 1  ;;  %v274_v8 = vadd.f32 %v273_v5, %v272_v3 }
  0x5b   : > { %v204_v9 = vadd.f32 %v203_v6, %v202_v4  ;;  %v275_v10 = vrot.slane %v274_v8, 1 }
  0x5d   : > { %v205_v11 = vadd.f32 %v204_v9, %v167_v7  ;;  %v276_v13 = vadd.f32 %v275_v10, %v274_v8 }
  0x5f   : > { %206 = vst [vmem:[%s422_s1] sm:$0x1] %v205_v11  ;;  %v277_v14 = vadd.f32 %v276_v13, %v207_v12 }
  0x61   : > { %278 = vst [vmem:[%s423_s2] sm:$0x1] %v277_v14 }
  0x62 PF: > { %s13_s9 = sadd.s32 1, %s337_s9  }
  0x63   : > { %p10_p5 = scmp.ge.s32.totalorder %s13_s9, 4  }
  0x65   :  { %12 = sbr.rel (!%p10_p5) target bundleno = 1 (0x1), region = 62 }

// kernel: vae_forward.25
= control target key start
LH: loop header
LB: loop body
LE: loop exit
PB: predicated region body
PF: predicated region fallthrough
CT: control target
= control target key end

     0   :  { %s1276_s12 = smov 0   ;;  %s1278_s13 = smov 0   ;;  %s1426_s0 = inlined_call_operand.vmem [shape: bf16[512,128], index: 0, kind: input, shape index: {}]   ;;  %s1427_s1 = inlined_call_operand.vmem [shape: bf16[128,128], index: 1, kind: input, shape index: {}]   ;;  %s1428_s2 = inlined_call_operand.vmem [shape: f32[1,128], index: 2, kind: input, shape index: {}]   ;;  %s1429_s3 = inlined_call_operand.vmem [shape: f32[512,128], index: 3, kind: output, shape index: {}]  }
   0x1   :  { %s1280_s14 = smov 0  }
   0x2 LB: > { %s32_s15 = sadd.s32 1, %s1250_s13  ;;  %p1064_p0 = scmp.ge.s32.totalorder %s1254_s14, 1  ;;  %s1254_s14 = sphi %s1280_s14, %s13_s14   ;;  %s1250_s13 = sphi %s1278_s13, %s1431_s13   ;;  %s1246_s12 = sphi %s1276_s12, %s1430_s12  }
   0x3   : > { %p34_p1 = scmp.ge.s32.totalorder %s32_s15, 2  ;;  %p188_p2 = scmp.lt.s32.totalorder %s1254_s14, 3 }
   0x5   : > { %s1433_s15 = smov (%p34_p1, %s32_s15), 0  ;;  %p189_p3 = pnand %p1064_p0, %p188_p2 }
   0x6   : > { %s1065_s18 = sshll.u32 (!%p189_p3), %s1246_s12, 5 }
   0x7   : > { %192 = sbr.rel (%p189_p3) target bundleno = 275 (0x113), region = 32  ;;  %p230_p4 = scmp.lt.s32.totalorder (!%p189_p3), %s1065_s18, 63 }
   0xc   : > { %v1208_v0 = vld [vmem:[%s1427_s1 + $0x38] sm:$0xff]   ;;  %v1209_v1 = vld [vmem:[%s1427_s1 + $0x30] sm:$0xff]   ;;  %s1435_s18 = smov (!%p230_p4, %s1065_s18), 63  ;;  %v1210_v2 = vld [vmem:[%s1427_s1 + $0x28] sm:$0xff]  }
   0xd   : > { %1120 = vmatprep.subr.bf16.mxu0 %v1208_v0  ;;  %1168 = vmatprep.subr.bf16.mxu1 %v1208_v0  ;;  %s1066_s23 = sshll.u32 %s1435_s18, 2  ;;  %v1211_v3 = vld [vmem:[%s1427_s1 + $0x20] sm:$0xff]   ;;  %v1212_v6 = vld [vmem:[%s1427_s1 + $0x18] sm:$0xff]   ;;  %v1213_v7 = vld [vmem:[%s1427_s1 + $0x10] sm:$0xff]   ;;  %s1068_s12 = sshll.u32 %s1435_s18, 3 }
   0xe   : > { %1121 = vmatpush3.bf16.msra.mxu0 %v1208_v0  ;;  %1176 = vmatpush3.bf16.msra.mxu1 %v1208_v0  ;;  %s1309_s26 = scalar_lea.vmem %s1426_s0, %s1066_s23  ;;  %v1214_v8 = vld [vmem:[%s1427_s1 + $0x8] sm:$0xff]   ;;  %v1215_v9 = vld [vmem:[%s1427_s1] sm:$0xff]   ;;  %s1353_s19 = scalar_lea.vmem %s1429_s3, %s1068_s12 }
   0xf   : > { %1122 = vmatprep.subr.bf16.mxu0 %v1209_v1  ;;  %1169 = vmatprep.subr.bf16.mxu1 %v1209_v1  ;;  %v1216_v4 = vld [vmem:[%s1309_s26] sm:$0xff]   ;;  %v1218_v10 = vld [vmem:[%s1309_s26 + $0x8] sm:$0xff]   ;;  %v1220_v12 = vld [vmem:[%s1309_s26 + $0x10] sm:$0xff]  }
  0x10   : > { %v1217_v5 = vld [vmem:[%s1309_s26 + $0x40] sm:$0xff]   ;;  %1136 = vmatprep.mubr.bf16.mxu0 %v1216_v4  ;;  %v1219_v11 = vld [vmem:[%s1309_s26 + $0x48] sm:$0xff]   ;;  %v1221_v13 = vld [vmem:[%s1309_s26 + $0x50] sm:$0xff]  }
  0x11   : > { %1152 = vmatprep.mubr.bf16.mxu1 %v1217_v5  ;;  %v1222_v14 = vld [vmem:[%s1309_s26 + $0x18] sm:$0xff]   ;;  %v1224_v16 = vld [vmem:[%s1309_s26 + $0x20] sm:$0xff]   ;;  %v1226_v18 = vld [vmem:[%s1309_s26 + $0x28] sm:$0xff]  }
  0x12   : > { %1123 = vmatpush3.bf16.msra.mxu0 %v1209_v1  ;;  %1177 = vmatpush3.bf16.msra.mxu1 %v1209_v1  ;;  %v1223_v15 = vld [vmem:[%s1309_s26 + $0x58] sm:$0xff]   ;;  %v1225_v17 = vld [vmem:[%s1309_s26 + $0x60] sm:$0xff]   ;;  %v1227_v19 = vld [vmem:[%s1309_s26 + $0x68] sm:$0xff]  }
  0x13   : > { %1124 = vmatprep.subr.bf16.mxu0 %v1210_v2  ;;  %1170 = vmatprep.subr.bf16.mxu1 %v1210_v2  ;;  %v1228_v20 = vld [vmem:[%s1309_s26 + $0x30] sm:$0xff]   ;;  %v1230_v22 = vld [vmem:[%s1309_s26 + $0x38] sm:$0xff]   ;;  %v1345_v24 = vld [vmem:[%s1428_s2] ss:$0 sm:$0xff] }
  0x14   : > { %v1229_v21 = vld [vmem:[%s1309_s26 + $0x70] sm:$0xff]   ;;  %v1231_v23 = vld [vmem:[%s1309_s26 + $0x78] sm:$0xff]  }
  0x16   : > { %1125 = vmatpush3.bf16.msra.mxu0 %v1210_v2  ;;  %1178 = vmatpush3.bf16.msra.mxu1 %v1210_v2 }
  0x17   : > { %1126 = vmatprep.subr.bf16.mxu0 %v1211_v3  ;;  %1171 = vmatprep.subr.bf16.mxu1 %v1211_v3 }
  0x1a   : > { %1127 = vmatpush3.bf16.msra.mxu0 %v1211_v3  ;;  %1179 = vmatpush3.bf16.msra.mxu1 %v1211_v3 }
  0x1b   : > { %1128 = vmatprep.subr.bf16.mxu0 %v1212_v6  ;;  %1172 = vmatprep.subr.bf16.mxu1 %v1212_v6 }
  0x1e   : > { %1129 = vmatpush3.bf16.msra.mxu0 %v1212_v6  ;;  %1180 = vmatpush3.bf16.msra.mxu1 %v1212_v6 }
  0x1f   : > { %1130 = vmatprep.subr.bf16.mxu0 %v1213_v7  ;;  %1173 = vmatprep.subr.bf16.mxu1 %v1213_v7 }
  0x22   : > { %1131 = vmatpush3.bf16.msra.mxu0 %v1213_v7  ;;  %1181 = vmatpush3.bf16.msra.mxu1 %v1213_v7 }
  0x23   : > { %1132 = vmatprep.subr.bf16.mxu0 %v1214_v8  ;;  %1174 = vmatprep.subr.bf16.mxu1 %v1214_v8 }
  0x26   : > { %1133 = vmatpush3.bf16.msra.mxu0 %v1214_v8  ;;  %1182 = vmatpush3.bf16.msra.mxu1 %v1214_v8 }
  0x27   : > { %1134 = vmatprep.subr.bf16.mxu0 %v1215_v9  ;;  %1175 = vmatprep.subr.bf16.mxu1 %v1215_v9 }
  0x2a   : > { %1135 = vmatpush3.bf16.msra.mxu0 %v1215_v9  ;;  %1183 = vmatpush3.bf16.msra.mxu1 %v1215_v9 }
  0x2d   : > { %1137 = vmatmul.mubr.bf16.vlgmr.msra.gmra.mxu0 %v1218_v10  ;;  %1153 = vmatmul.mubr.bf16.vlgmr.msra.gmra.mxu1 %v1219_v11 }
  0x2e   : > { %1140 = vmatprep.mubr.bf16.mxu0 %v1220_v12  ;;  %1156 = vmatprep.mubr.bf16.mxu1 %v1221_v13 }
  0x35   : > { %1141 = vmatmul.mubr.bf16.gmra.mxu0 %v1222_v14  ;;  %1157 = vmatmul.mubr.bf16.gmra.mxu1 %v1223_v15 }
  0x36   : > { %1144 = vmatprep.mubr.bf16.mxu0 %v1224_v16  ;;  %1160 = vmatprep.mubr.bf16.mxu1 %v1225_v17 }
  0x3d   : > { %1145 = vmatmul.mubr.bf16.gmra.mxu0 %v1226_v18  ;;  %1161 = vmatmul.mubr.bf16.gmra.mxu1 %v1227_v19 }
  0x3e   : > { %1148 = vmatprep.mubr.bf16.mxu0 %v1228_v20  ;;  %1164 = vmatprep.mubr.bf16.mxu1 %v1229_v21 }
  0x45   : > { %1149 = vmatmul.mubr.bf16.gmra.mxu0 %v1230_v22  ;;  %1165 = vmatmul.mubr.bf16.gmra.mxu1 %v1231_v23 }
  0xed   : > { %v1138_v25 = vpop.f32.mrf.mxu0  ;;  %v1154_v26 = vpop.f32.mrf.mxu1 }
  0xee   : > { %v789_v27 = vadd.f32 %v1138_v25, %v1345_v24  ;;  %v805_v28 = vadd.f32 %v1154_v26, %v1345_v24 }
  0xef   : > { %v554_v29 = vpop.f32.mrf.mxu0  ;;  %v618_v30 = vpop.f32.mrf.mxu1 }
  0xf0   : > { %vm821_vm0 = vcmp.ge.f32.partialorder %v789_v27, 0.0  ;;  %v853_v31 = vmul.f32 0.2, %v789_v27  ;;  %vm837_vm1 = vcmp.ge.f32.partialorder %v805_v28, 0.0  ;;  %v869_v32 = vmul.f32 0.2, %v805_v28 }
  0xf1   : > { %v787_v33 = vadd.f32 %v1345_v24, %v554_v29  ;;  %v803_v34 = vadd.f32 %v1345_v24, %v618_v30  ;;  %v1139_v35 = vpop.f32.mrf.mxu0  ;;  %v1155_v36 = vpop.f32.mrf.mxu1 }
  0xf2   : > { %v885_v37 = vsel %vm821_vm0, %v789_v27, %v853_v31  ;;  %v901_v38 = vsel %vm837_vm1, %v805_v28, %v869_v32  ;;  %v790_v39 = vadd.f32 %v1139_v35, %v1345_v24  ;;  %v806_v40 = vadd.f32 %v1155_v36, %v1345_v24 }
  0xf3   : > { %917 = vst [vmem:[%s1353_s19 + $0x10] sm:$0xff] %v885_v37  ;;  %933 = vst [vmem:[%s1353_s19 + $0x90] sm:$0xff] %v901_v38  ;;  %vm819_vm2 = vcmp.ge.f32.partialorder %v787_v33, 0.0  ;;  %v851_v41 = vmul.f32 0.2, %v787_v33  ;;  %vm835_vm3 = vcmp.ge.f32.partialorder %v803_v34, 0.0  ;;  %v557_v43 = vpop.f32.mrf.mxu0  ;;  %v621_v44 = vpop.f32.mrf.mxu1 }
  0xf4   : > { %v867_v42 = vmul.f32 0.2, %v803_v34  ;;  %vm822_vm4 = vcmp.ge.f32.partialorder %v790_v39, 0.0  ;;  %v854_v45 = vmul.f32 0.2, %v790_v39  ;;  %vm838_vm5 = vcmp.ge.f32.partialorder %v806_v40, 0.0 }
  0xf5   : > { %v870_v46 = vmul.f32 0.2, %v806_v40  ;;  %v883_v47 = vsel %vm819_vm2, %v787_v33, %v851_v41  ;;  %v788_v49 = vadd.f32 %v1345_v24, %v557_v43  ;;  %v804_v50 = vadd.f32 %v1345_v24, %v621_v44  ;;  %v1142_v51 = vpop.f32.mrf.mxu0  ;;  %v1158_v52 = vpop.f32.mrf.mxu1 }
  0xf6   : > { %v899_v48 = vsel %vm835_vm3, %v803_v34, %v867_v42  ;;  %915 = vst [vmem:[%s1353_s19] sm:$0xff] %v883_v47  ;;  %v886_v53 = vsel %vm822_vm4, %v790_v39, %v854_v45  ;;  %v793_v55 = vadd.f32 %v1142_v51, %v1345_v24  ;;  %v809_v56 = vadd.f32 %v1158_v52, %v1345_v24 }
  0xf7   : > { %931 = vst [vmem:[%s1353_s19 + $0x80] sm:$0xff] %v899_v48  ;;  %v902_v54 = vsel %vm838_vm5, %v806_v40, %v870_v46  ;;  %918 = vst [vmem:[%s1353_s19 + $0x18] sm:$0xff] %v886_v53  ;;  %vm820_vm6 = vcmp.ge.f32.partialorder %v788_v49, 0.0  ;;  %v852_v57 = vmul.f32 0.2, %v788_v49  ;;  %vm836_vm7 = vcmp.ge.f32.partialorder %v804_v50, 0.0  ;;  %v570_v59 = vpop.f32.mrf.mxu0  ;;  %v634_v60 = vpop.f32.mrf.mxu1 }
  0xf8   : > { %934 = vst [vmem:[%s1353_s19 + $0x98] sm:$0xff] %v902_v54  ;;  %v868_v58 = vmul.f32 0.2, %v804_v50  ;;  %vm825_vm8 = vcmp.ge.f32.partialorder %v793_v55, 0.0  ;;  %v857_v61 = vmul.f32 0.2, %v793_v55  ;;  %v791_v1 = vadd.f32 %v1345_v24, %v570_v59 }
  0xf9   : > { %vm841_vm9 = vcmp.ge.f32.partialorder %v809_v56, 0.0  ;;  %v873_v62 = vmul.f32 0.2, %v809_v56  ;;  %v884_v63 = vsel %vm820_vm6, %v788_v49, %v852_v57  ;;  %v807_v2 = vadd.f32 %v1345_v24, %v634_v60  ;;  %v1143_v3 = vpop.f32.mrf.mxu0  ;;  %v1159_v4 = vpop.f32.mrf.mxu1 }
  0xfa   : > { %v900_v0 = vsel %vm836_vm7, %v804_v50, %v868_v58  ;;  %916 = vst [vmem:[%s1353_s19 + $0x8] sm:$0xff] %v884_v63  ;;  %v889_v5 = vsel %vm825_vm8, %v793_v55, %v857_v61  ;;  %v794_v7 = vadd.f32 %v1143_v3, %v1345_v24  ;;  %v810_v8 = vadd.f32 %v1159_v4, %v1345_v24 }
  0xfb   : > { %932 = vst [vmem:[%s1353_s19 + $0x88] sm:$0xff] %v900_v0  ;;  %v905_v6 = vsel %vm841_vm9, %v809_v56, %v873_v62  ;;  %921 = vst [vmem:[%s1353_s19 + $0x30] sm:$0xff] %v889_v5  ;;  %vm823_vm10 = vcmp.ge.f32.partialorder %v791_v1, 0.0  ;;  %v855_v9 = vmul.f32 0.2, %v791_v1  ;;  %vm839_vm11 = vcmp.ge.f32.partialorder %v807_v2, 0.0  ;;  %v573_v11 = vpop.f32.mrf.mxu0  ;;  %v637_v12 = vpop.f32.mrf.mxu1 }
  0xfc   : > { %937 = vst [vmem:[%s1353_s19 + $0xb0] sm:$0xff] %v905_v6  ;;  %v871_v10 = vmul.f32 0.2, %v807_v2  ;;  %vm826_vm12 = vcmp.ge.f32.partialorder %v794_v7, 0.0  ;;  %v858_v13 = vmul.f32 0.2, %v794_v7  ;;  %v792_v17 = vadd.f32 %v1345_v24, %v573_v11 }
  0xfd   : > { %vm842_vm13 = vcmp.ge.f32.partialorder %v810_v8, 0.0  ;;  %v874_v14 = vmul.f32 0.2, %v810_v8  ;;  %v887_v15 = vsel %vm823_vm10, %v791_v1, %v855_v9  ;;  %v808_v18 = vadd.f32 %v1345_v24, %v637_v12  ;;  %v1146_v19 = vpop.f32.mrf.mxu0  ;;  %v1162_v20 = vpop.f32.mrf.mxu1 }
  0xfe   : > { %v903_v16 = vsel %vm839_vm11, %v807_v2, %v871_v10  ;;  %919 = vst [vmem:[%s1353_s19 + $0x20] sm:$0xff] %v887_v15  ;;  %v890_v21 = vsel %vm826_vm12, %v794_v7, %v858_v13  ;;  %v797_v23 = vadd.f32 %v1146_v19, %v1345_v24  ;;  %v813_v25 = vadd.f32 %v1162_v20, %v1345_v24 }
  0xff   : > { %935 = vst [vmem:[%s1353_s19 + $0xa0] sm:$0xff] %v903_v16  ;;  %v906_v22 = vsel %vm842_vm13, %v810_v8, %v874_v14  ;;  %922 = vst [vmem:[%s1353_s19 + $0x38] sm:$0xff] %v890_v21  ;;  %vm824_vm14 = vcmp.ge.f32.partialorder %v792_v17, 0.0  ;;  %v856_v26 = vmul.f32 0.2, %v792_v17  ;;  %vm840_vm15 = vcmp.ge.f32.partialorder %v808_v18, 0.0  ;;  %v586_v28 = vpop.f32.mrf.mxu0  ;;  %v650_v29 = vpop.f32.mrf.mxu1 }
 0x100   : > { %938 = vst [vmem:[%s1353_s19 + $0xb8] sm:$0xff] %v906_v22  ;;  %v872_v27 = vmul.f32 0.2, %v808_v18  ;;  %vm829_vm0 = vcmp.ge.f32.partialorder %v797_v23, 0.0  ;;  %v861_v30 = vmul.f32 0.2, %v797_v23  ;;  %v795_v34 = vadd.f32 %v1345_v24, %v586_v28 }
 0x101   : > { %vm845_vm1 = vcmp.ge.f32.partialorder %v813_v25, 0.0  ;;  %v877_v31 = vmul.f32 0.2, %v813_v25  ;;  %v888_v32 = vsel %vm824_vm14, %v792_v17, %v856_v26  ;;  %v811_v35 = vadd.f32 %v1345_v24, %v650_v29  ;;  %v1147_v36 = vpop.f32.mrf.mxu0  ;;  %v1163_v37 = vpop.f32.mrf.mxu1 }
 0x102   : > { %v904_v33 = vsel %vm840_vm15, %v808_v18, %v872_v27  ;;  %920 = vst [vmem:[%s1353_s19 + $0x28] sm:$0xff] %v888_v32  ;;  %v893_v38 = vsel %vm829_vm0, %v797_v23, %v861_v30  ;;  %v798_v40 = vadd.f32 %v1147_v36, %v1345_v24  ;;  %v814_v41 = vadd.f32 %v1163_v37, %v1345_v24 }
 0x103   : > { %936 = vst [vmem:[%s1353_s19 + $0xa8] sm:$0xff] %v904_v33  ;;  %v909_v39 = vsel %vm845_vm1, %v813_v25, %v877_v31  ;;  %925 = vst [vmem:[%s1353_s19 + $0x50] sm:$0xff] %v893_v38  ;;  %vm827_vm2 = vcmp.ge.f32.partialorder %v795_v34, 0.0  ;;  %v859_v42 = vmul.f32 0.2, %v795_v34  ;;  %vm843_vm3 = vcmp.ge.f32.partialorder %v811_v35, 0.0  ;;  %v589_v44 = vpop.f32.mrf.mxu0  ;;  %v653_v45 = vpop.f32.mrf.mxu1 }
 0x104   : > { %941 = vst [vmem:[%s1353_s19 + $0xd0] sm:$0xff] %v909_v39  ;;  %v875_v43 = vmul.f32 0.2, %v811_v35  ;;  %vm830_vm4 = vcmp.ge.f32.partialorder %v798_v40, 0.0  ;;  %v862_v46 = vmul.f32 0.2, %v798_v40  ;;  %v796_v50 = vadd.f32 %v1345_v24, %v589_v44 }
 0x105   : > { %vm846_vm5 = vcmp.ge.f32.partialorder %v814_v41, 0.0  ;;  %v878_v47 = vmul.f32 0.2, %v814_v41  ;;  %v891_v48 = vsel %vm827_vm2, %v795_v34, %v859_v42  ;;  %v812_v51 = vadd.f32 %v1345_v24, %v653_v45  ;;  %v1150_v52 = vpop.f32.mrf.mxu0  ;;  %v1166_v53 = vpop.f32.mrf.mxu1 }
 0x106   : > { %v907_v49 = vsel %vm843_vm3, %v811_v35, %v875_v43  ;;  %923 = vst [vmem:[%s1353_s19 + $0x40] sm:$0xff] %v891_v48  ;;  %v894_v54 = vsel %vm830_vm4, %v798_v40, %v862_v46  ;;  %v801_v56 = vadd.f32 %v1150_v52, %v1345_v24  ;;  %v817_v57 = vadd.f32 %v1166_v53, %v1345_v24 }
 0x107   : > { %939 = vst [vmem:[%s1353_s19 + $0xc0] sm:$0xff] %v907_v49  ;;  %v910_v55 = vsel %vm846_vm5, %v814_v41, %v878_v47  ;;  %926 = vst [vmem:[%s1353_s19 + $0x58] sm:$0xff] %v894_v54  ;;  %vm828_vm6 = vcmp.ge.f32.partialorder %v796_v50, 0.0  ;;  %v860_v58 = vmul.f32 0.2, %v796_v50  ;;  %vm844_vm7 = vcmp.ge.f32.partialorder %v812_v51, 0.0  ;;  %v602_v60 = vpop.f32.mrf.mxu0  ;;  %v666_v61 = vpop.f32.mrf.mxu1 }
 0x108   : > { %942 = vst [vmem:[%s1353_s19 + $0xd8] sm:$0xff] %v910_v55  ;;  %v876_v59 = vmul.f32 0.2, %v812_v51  ;;  %vm833_vm8 = vcmp.ge.f32.partialorder %v801_v56, 0.0  ;;  %v865_v62 = vmul.f32 0.2, %v801_v56  ;;  %v799_v2 = vadd.f32 %v1345_v24, %v602_v60 }
 0x109   : > { %vm849_vm9 = vcmp.ge.f32.partialorder %v817_v57, 0.0  ;;  %v881_v63 = vmul.f32 0.2, %v817_v57  ;;  %v892_v0 = vsel %vm828_vm6, %v796_v50, %v860_v58  ;;  %v815_v3 = vadd.f32 %v1345_v24, %v666_v61  ;;  %v1151_v4 = vpop.f32.mrf.mxu0  ;;  %v1167_v5 = vpop.f32.mrf.mxu1 }
 0x10a   : > { %v908_v1 = vsel %vm844_vm7, %v812_v51, %v876_v59  ;;  %924 = vst [vmem:[%s1353_s19 + $0x48] sm:$0xff] %v892_v0  ;;  %v897_v6 = vsel %vm833_vm8, %v801_v56, %v865_v62  ;;  %v802_v8 = vadd.f32 %v1151_v4, %v1345_v24  ;;  %v818_v9 = vadd.f32 %v1167_v5, %v1345_v24 }
 0x10b   : > { %940 = vst [vmem:[%s1353_s19 + $0xc8] sm:$0xff] %v908_v1  ;;  %v913_v7 = vsel %vm849_vm9, %v817_v57, %v881_v63  ;;  %929 = vst [vmem:[%s1353_s19 + $0x70] sm:$0xff] %v897_v6  ;;  %vm831_vm10 = vcmp.ge.f32.partialorder %v799_v2, 0.0  ;;  %v863_v10 = vmul.f32 0.2, %v799_v2  ;;  %vm847_vm11 = vcmp.ge.f32.partialorder %v815_v3, 0.0  ;;  %v605_v12 = vpop.f32.mrf.mxu0  ;;  %v669_v13 = vpop.f32.mrf.mxu1 }
 0x10c   : > { %945 = vst [vmem:[%s1353_s19 + $0xf0] sm:$0xff] %v913_v7  ;;  %v879_v11 = vmul.f32 0.2, %v815_v3  ;;  %vm834_vm12 = vcmp.ge.f32.partialorder %v802_v8, 0.0  ;;  %v866_v14 = vmul.f32 0.2, %v802_v8  ;;  %v800_v18 = vadd.f32 %v1345_v24, %v605_v12 }
 0x10d   : > { %vm850_vm13 = vcmp.ge.f32.partialorder %v818_v9, 0.0  ;;  %v882_v15 = vmul.f32 0.2, %v818_v9  ;;  %v895_v16 = vsel %vm831_vm10, %v799_v2, %v863_v10  ;;  %v816_v19 = vadd.f32 %v1345_v24, %v669_v13 }
 0x10e   : > { %v911_v17 = vsel %vm847_vm11, %v815_v3, %v879_v11  ;;  %927 = vst [vmem:[%s1353_s19 + $0x60] sm:$0xff] %v895_v16  ;;  %v898_v20 = vsel %vm834_vm12, %v802_v8, %v866_v14  ;;  %vm832_vm14 = vcmp.ge.f32.partialorder %v800_v18, 0.0  ;;  %v864_v22 = vmul.f32 0.2, %v800_v18 }
 0x10f   : > { %943 = vst [vmem:[%s1353_s19 + $0xe0] sm:$0xff] %v911_v17  ;;  %v914_v21 = vsel %vm850_vm13, %v818_v9, %v882_v15  ;;  %930 = vst [vmem:[%s1353_s19 + $0x78] sm:$0xff] %v898_v20  ;;  %vm848_vm15 = vcmp.ge.f32.partialorder %v816_v19, 0.0  ;;  %v880_v23 = vmul.f32 0.2, %v816_v19 }
 0x110   : > { %946 = vst [vmem:[%s1353_s19 + $0xf8] sm:$0xff] %v914_v21  ;;  %v896_v25 = vsel %vm832_vm14, %v800_v18, %v864_v22 }
 0x111   : > { %v912_v26 = vsel %vm848_vm15, %v816_v19, %v880_v23  ;;  %928 = vst [vmem:[%s1353_s19 + $0x68] sm:$0xff] %v896_v25 }
 0x112   : > { %944 = vst [vmem:[%s1353_s19 + $0xe8] sm:$0xff] %v912_v26 }
 0x113 PF: > { %s13_s14 = sadd.s32 1, %s1254_s14   ;;  %s1430_s12 = smov %s1250_s13 }
 0x114   : > { %p10_p5 = scmp.ge.s32.totalorder %s13_s14, 4   ;;  %s1431_s13 = smov %s1433_s15 }
 0x116   :  { %12 = sbr.rel (!%p10_p5) target bundleno = 2 (0x2), region = 76 }

// kernel: vae_forward.28
= control target key start
LH: loop header
LB: loop body
LE: loop exit
PB: predicated region body
PF: predicated region fallthrough
CT: control target
= control target key end

     0   :  { %s652_s1 = inlined_call_operand.vmem [shape: bf16[128,128], index: 1, kind: input, shape index: {}]   ;;  %s653_s0 = inlined_call_operand.vmem [shape: bf16[128,128], index: 0, kind: input, shape index: {}]   ;;  %s654_s2 = inlined_call_operand.vmem [shape: f32[1,128], index: 2, kind: input, shape index: {}]   ;;  %s655_s3 = inlined_call_operand.vmem [shape: f32[128,128], index: 3, kind: output, shape index: {}]  }
   0x1   :  { %v499_v0 = vld [vmem:[%s652_s1 + $0x38] sm:$0xff]   ;;  %v500_v1 = vld [vmem:[%s652_s1 + $0x30] sm:$0xff]   ;;  %v501_v2 = vld [vmem:[%s652_s1 + $0x28] sm:$0xff]  }
   0x2   :  { %451 = vmatprep.subr.bf16.mxu0 %v499_v0  ;;  %483 = vmatprep.subr.bf16.mxu1 %v499_v0  ;;  %v502_v3 = vld [vmem:[%s652_s1 + $0x20] sm:$0xff]   ;;  %v503_v6 = vld [vmem:[%s652_s1 + $0x18] sm:$0xff]   ;;  %v504_v7 = vld [vmem:[%s652_s1 + $0x10] sm:$0xff]  }
   0x3   :  { %452 = vmatpush3.bf16.msra.mxu0 %v499_v0  ;;  %491 = vmatpush3.bf16.msra.mxu1 %v499_v0  ;;  %v507_v4 = vld [vmem:[%s653_s0] sm:$0xff]   ;;  %v505_v8 = vld [vmem:[%s652_s1 + $0x8] sm:$0xff]   ;;  %v511_v12 = vld [vmem:[%s653_s0 + $0x10] sm:$0xff]  }
   0x4   :  { %453 = vmatprep.subr.bf16.mxu0 %v500_v1  ;;  %484 = vmatprep.subr.bf16.mxu1 %v500_v1  ;;  %v508_v5 = vld [vmem:[%s653_s0 + $0x20] sm:$0xff]   ;;  %v509_v10 = vld [vmem:[%s653_s0 + $0x8] sm:$0xff]   ;;  %v512_v13 = vld [vmem:[%s653_s0 + $0x30] sm:$0xff]  }
   0x5   :  { %467 = vmatprep.mubr.bf16.mxu0 %v507_v4  ;;  %475 = vmatprep.mubr.bf16.mxu1 %v508_v5  ;;  %v506_v9 = vld [vmem:[%s652_s1] sm:$0xff]   ;;  %v510_v11 = vld [vmem:[%s653_s0 + $0x28] sm:$0xff]   ;;  %v513_v14 = vld [vmem:[%s653_s0 + $0x18] sm:$0xff]  }
   0x6   :  { %v514_v15 = vld [vmem:[%s653_s0 + $0x38] sm:$0xff]   ;;  %v586_v16 = vld [vmem:[%s654_s2] ss:$0 sm:$0xff] }
   0x7   :  { %454 = vmatpush3.bf16.msra.mxu0 %v500_v1  ;;  %492 = vmatpush3.bf16.msra.mxu1 %v500_v1 }
   0x8   :  { %455 = vmatprep.subr.bf16.mxu0 %v501_v2  ;;  %485 = vmatprep.subr.bf16.mxu1 %v501_v2 }
   0xb   :  { %456 = vmatpush3.bf16.msra.mxu0 %v501_v2  ;;  %493 = vmatpush3.bf16.msra.mxu1 %v501_v2 }
   0xc   :  { %457 = vmatprep.subr.bf16.mxu0 %v502_v3  ;;  %486 = vmatprep.subr.bf16.mxu1 %v502_v3 }
   0xf   :  { %458 = vmatpush3.bf16.msra.mxu0 %v502_v3  ;;  %494 = vmatpush3.bf16.msra.mxu1 %v502_v3 }
  0x10   :  { %459 = vmatprep.subr.bf16.mxu0 %v503_v6  ;;  %487 = vmatprep.subr.bf16.mxu1 %v503_v6 }
  0x13   :  { %460 = vmatpush3.bf16.msra.mxu0 %v503_v6  ;;  %495 = vmatpush3.bf16.msra.mxu1 %v503_v6 }
  0x14   :  { %461 = vmatprep.subr.bf16.mxu0 %v504_v7  ;;  %488 = vmatprep.subr.bf16.mxu1 %v504_v7 }
  0x17   :  { %462 = vmatpush3.bf16.msra.mxu0 %v504_v7  ;;  %496 = vmatpush3.bf16.msra.mxu1 %v504_v7 }
  0x18   :  { %463 = vmatprep.subr.bf16.mxu0 %v505_v8  ;;  %489 = vmatprep.subr.bf16.mxu1 %v505_v8 }
  0x1b   :  { %464 = vmatpush3.bf16.msra.mxu0 %v505_v8  ;;  %497 = vmatpush3.bf16.msra.mxu1 %v505_v8 }
  0x1c   :  { %465 = vmatprep.subr.bf16.mxu0 %v506_v9  ;;  %490 = vmatprep.subr.bf16.mxu1 %v506_v9 }
  0x1f   :  { %466 = vmatpush3.bf16.msra.mxu0 %v506_v9  ;;  %498 = vmatpush3.bf16.msra.mxu1 %v506_v9 }
  0x22   :  { %468 = vmatmul.mubr.bf16.vlgmr.msra.gmra.mxu0 %v509_v10  ;;  %476 = vmatmul.mubr.bf16.vlgmr.msra.gmra.mxu1 %v510_v11 }
  0x23   :  { %471 = vmatprep.mubr.bf16.mxu0 %v511_v12  ;;  %479 = vmatprep.mubr.bf16.mxu1 %v512_v13 }
  0x2a   :  { %472 = vmatmul.mubr.bf16.gmra.mxu0 %v513_v14  ;;  %480 = vmatmul.mubr.bf16.gmra.mxu1 %v514_v15 }
  0xe2   :  { %v469_v17 = vpop.f32.mrf.mxu0  ;;  %v477_v18 = vpop.f32.mrf.mxu1 }
  0xe3   :  { %v336_v19 = vadd.f32 %v469_v17, %v586_v16  ;;  %v344_v20 = vadd.f32 %v477_v18, %v586_v16 }
  0xe4   :  { %v213_v21 = vpop.f32.mrf.mxu0  ;;  %v245_v22 = vpop.f32.mrf.mxu1 }
  0xe5   :  { %vm352_vm0 = vcmp.ge.f32.partialorder %v336_v19, 0.0  ;;  %v368_v23 = vmul.f32 0.2, %v336_v19  ;;  %vm360_vm1 = vcmp.ge.f32.partialorder %v344_v20, 0.0  ;;  %v376_v24 = vmul.f32 0.2, %v344_v20 }
  0xe6   :  { %v334_v25 = vadd.f32 %v586_v16, %v213_v21  ;;  %v342_v26 = vadd.f32 %v586_v16, %v245_v22  ;;  %v470_v27 = vpop.f32.mrf.mxu0  ;;  %v478_v28 = vpop.f32.mrf.mxu1 }
  0xe7   :  { %v384_v29 = vsel %vm352_vm0, %v336_v19, %v368_v23  ;;  %v392_v30 = vsel %vm360_vm1, %v344_v20, %v376_v24  ;;  %v337_v31 = vadd.f32 %v470_v27, %v586_v16  ;;  %v345_v32 = vadd.f32 %v478_v28, %v586_v16 }
  0xe8   :  { %400 = vst [vmem:[%s655_s3 + $0x10] sm:$0xff] %v384_v29  ;;  %408 = vst [vmem:[%s655_s3 + $0x50] sm:$0xff] %v392_v30  ;;  %vm350_vm2 = vcmp.ge.f32.partialorder %v334_v25, 0.0  ;;  %v366_v33 = vmul.f32 0.2, %v334_v25  ;;  %vm358_vm3 = vcmp.ge.f32.partialorder %v342_v26, 0.0  ;;  %v216_v35 = vpop.f32.mrf.mxu0  ;;  %v248_v36 = vpop.f32.mrf.mxu1 }
  0xe9   :  { %v374_v34 = vmul.f32 0.2, %v342_v26  ;;  %vm353_vm4 = vcmp.ge.f32.partialorder %v337_v31, 0.0  ;;  %v369_v37 = vmul.f32 0.2, %v337_v31  ;;  %vm361_vm5 = vcmp.ge.f32.partialorder %v345_v32, 0.0 }
  0xea   :  { %v377_v38 = vmul.f32 0.2, %v345_v32  ;;  %v382_v39 = vsel %vm350_vm2, %v334_v25, %v366_v33  ;;  %v335_v41 = vadd.f32 %v586_v16, %v216_v35  ;;  %v343_v42 = vadd.f32 %v586_v16, %v248_v36  ;;  %v473_v43 = vpop.f32.mrf.mxu0  ;;  %v481_v44 = vpop.f32.mrf.mxu1 }
  0xeb   :  { %v390_v40 = vsel %vm358_vm3, %v342_v26, %v374_v34  ;;  %398 = vst [vmem:[%s655_s3] sm:$0xff] %v382_v39  ;;  %v385_v45 = vsel %vm353_vm4, %v337_v31, %v369_v37  ;;  %v340_v47 = vadd.f32 %v473_v43, %v586_v16  ;;  %v348_v48 = vadd.f32 %v481_v44, %v586_v16 }
  0xec   :  { %406 = vst [vmem:[%s655_s3 + $0x40] sm:$0xff] %v390_v40  ;;  %v393_v46 = vsel %vm361_vm5, %v345_v32, %v377_v38  ;;  %401 = vst [vmem:[%s655_s3 + $0x18] sm:$0xff] %v385_v45  ;;  %vm351_vm6 = vcmp.ge.f32.partialorder %v335_v41, 0.0  ;;  %v367_v49 = vmul.f32 0.2, %v335_v41  ;;  %vm359_vm7 = vcmp.ge.f32.partialorder %v343_v42, 0.0  ;;  %v229_v51 = vpop.f32.mrf.mxu0  ;;  %v261_v52 = vpop.f32.mrf.mxu1 }
  0xed   :  { %409 = vst [vmem:[%s655_s3 + $0x58] sm:$0xff] %v393_v46  ;;  %v375_v50 = vmul.f32 0.2, %v343_v42  ;;  %vm356_vm8 = vcmp.ge.f32.partialorder %v340_v47, 0.0  ;;  %v372_v53 = vmul.f32 0.2, %v340_v47  ;;  %v338_v57 = vadd.f32 %v586_v16, %v229_v51 }
  0xee   :  { %vm364_vm9 = vcmp.ge.f32.partialorder %v348_v48, 0.0  ;;  %v380_v54 = vmul.f32 0.2, %v348_v48  ;;  %v383_v55 = vsel %vm351_vm6, %v335_v41, %v367_v49  ;;  %v346_v58 = vadd.f32 %v586_v16, %v261_v52  ;;  %v474_v59 = vpop.f32.mrf.mxu0  ;;  %v482_v60 = vpop.f32.mrf.mxu1 }
  0xef   :  { %v391_v56 = vsel %vm359_vm7, %v343_v42, %v375_v50  ;;  %399 = vst [vmem:[%s655_s3 + $0x8] sm:$0xff] %v383_v55  ;;  %v388_v61 = vsel %vm356_vm8, %v340_v47, %v372_v53  ;;  %v341_v63 = vadd.f32 %v474_v59, %v586_v16  ;;  %v349_v0 = vadd.f32 %v482_v60, %v586_v16 }
  0xf0   :  { %407 = vst [vmem:[%s655_s3 + $0x48] sm:$0xff] %v391_v56  ;;  %v396_v62 = vsel %vm364_vm9, %v348_v48, %v380_v54  ;;  %404 = vst [vmem:[%s655_s3 + $0x30] sm:$0xff] %v388_v61  ;;  %vm354_vm10 = vcmp.ge.f32.partialorder %v338_v57, 0.0  ;;  %v370_v1 = vmul.f32 0.2, %v338_v57  ;;  %vm362_vm11 = vcmp.ge.f32.partialorder %v346_v58, 0.0  ;;  %v232_v3 = vpop.f32.mrf.mxu0  ;;  %v264_v4 = vpop.f32.mrf.mxu1 }
  0xf1   :  { %412 = vst [vmem:[%s655_s3 + $0x70] sm:$0xff] %v396_v62  ;;  %v378_v2 = vmul.f32 0.2, %v346_v58  ;;  %vm357_vm12 = vcmp.ge.f32.partialorder %v341_v63, 0.0  ;;  %v373_v5 = vmul.f32 0.2, %v341_v63  ;;  %v339_v9 = vadd.f32 %v586_v16, %v232_v3 }
  0xf2   :  { %vm365_vm13 = vcmp.ge.f32.partialorder %v349_v0, 0.0  ;;  %v381_v6 = vmul.f32 0.2, %v349_v0  ;;  %v386_v7 = vsel %vm354_vm10, %v338_v57, %v370_v1  ;;  %v347_v10 = vadd.f32 %v586_v16, %v264_v4 }
  0xf3   :  { %v394_v8 = vsel %vm362_vm11, %v346_v58, %v378_v2  ;;  %402 = vst [vmem:[%s655_s3 + $0x20] sm:$0xff] %v386_v7  ;;  %v389_v11 = vsel %vm357_vm12, %v341_v63, %v373_v5  ;;  %vm355_vm14 = vcmp.ge.f32.partialorder %v339_v9, 0.0  ;;  %v371_v13 = vmul.f32 0.2, %v339_v9 }
  0xf4   :  { %410 = vst [vmem:[%s655_s3 + $0x60] sm:$0xff] %v394_v8  ;;  %v397_v12 = vsel %vm365_vm13, %v349_v0, %v381_v6  ;;  %405 = vst [vmem:[%s655_s3 + $0x38] sm:$0xff] %v389_v11  ;;  %vm363_vm15 = vcmp.ge.f32.partialorder %v347_v10, 0.0  ;;  %v379_v14 = vmul.f32 0.2, %v347_v10 }
  0xf5   :  { %413 = vst [vmem:[%s655_s3 + $0x78] sm:$0xff] %v397_v12  ;;  %v387_v15 = vsel %vm355_vm14, %v339_v9, %v371_v13 }
  0xf6   :  { %v395_v16 = vsel %vm363_vm15, %v347_v10, %v379_v14  ;;  %403 = vst [vmem:[%s655_s3 + $0x28] sm:$0xff] %v387_v15 }
  0xf7   :  { %411 = vst [vmem:[%s655_s3 + $0x68] sm:$0xff] %v395_v16 }

// kernel: vae_forward.29
= control target key start
LH: loop header
LB: loop body
LE: loop exit
PB: predicated region body
PF: predicated region fallthrough
CT: control target
= control target key end

     0   :  { %v105_v0 = vmov 0.0   ;;  %s187_s1 = inlined_call_operand.vmem [shape: f32[1,128], index: 1, kind: output, shape index: {0}]   ;;  %s188_s2 = inlined_call_operand.vmem [shape: f32[1,128], index: 2, kind: output, shape index: {1}]   ;;  %s189_s0 = inlined_call_operand.vmem [shape: f32[128,128], index: 0, kind: input, shape index: {}]  }
   0x1   :  { %14 = vst [vmem:[%s187_s1] sm:$0x1] %v105_v0  ;;  %15 = vst [vmem:[%s188_s2] sm:$0x1] %v105_v0  ;;  %v16_v1 = vld [vmem:[%s189_s0] sm:$0xff]  ;;  %v17_v2 = vld [vmem:[%s189_s0 + $0x8] sm:$0xff] }
   0x2   :  { %v18_v3 = vld [vmem:[%s189_s0 + $0x10] sm:$0xff]  ;;  %v19_v4 = vld [vmem:[%s189_s0 + $0x18] sm:$0xff]  ;;  %v33_v5 = vadd.f32 %v17_v2, %v16_v1  ;;  %v57_v6 = vmul.f32 %v16_v1, %v16_v1  ;;  %v58_v7 = vmul.f32 %v17_v2, %v17_v2  ;;  %v20_v9 = vld [vmem:[%s189_s0 + $0x20] sm:$0xff] }
   0x3   :  { %v59_v8 = vmul.f32 %v18_v3, %v18_v3  ;;  %v60_v11 = vmul.f32 %v19_v4, %v19_v4  ;;  %v21_v13 = vld [vmem:[%s189_s0 + $0x28] sm:$0xff]  ;;  %v61_v15 = vmul.f32 %v20_v9, %v20_v9  ;;  %v22_v17 = vld [vmem:[%s189_s0 + $0x30] sm:$0xff]  ;;  %v23_v21 = vld [vmem:[%s189_s0 + $0x38] sm:$0xff] }
   0x4   :  { %v34_v10 = vadd.f32 %v33_v5, %v18_v3  ;;  %v73_v12 = vadd.f32 %v58_v7, %v57_v6  ;;  %v62_v19 = vmul.f32 %v21_v13, %v21_v13  ;;  %v63_v23 = vmul.f32 %v22_v17, %v22_v17  ;;  %v24_v25 = vld [vmem:[%s189_s0 + $0x40] sm:$0xff]  ;;  %v25_v29 = vld [vmem:[%s189_s0 + $0x48] sm:$0xff]  ;;  %v26_v33 = vld [vmem:[%s189_s0 + $0x50] sm:$0xff] }
   0x5   :  { %v64_v27 = vmul.f32 %v23_v21, %v23_v21  ;;  %v65_v31 = vmul.f32 %v24_v25, %v24_v25  ;;  %v66_v35 = vmul.f32 %v25_v29, %v25_v29  ;;  %v27_v37 = vld [vmem:[%s189_s0 + $0x58] sm:$0xff]  ;;  %v67_v39 = vmul.f32 %v26_v33, %v26_v33  ;;  %v28_v41 = vld [vmem:[%s189_s0 + $0x60] sm:$0xff]  ;;  %v29_v45 = vld [vmem:[%s189_s0 + $0x68] sm:$0xff] }
   0x6   :  { %v35_v14 = vadd.f32 %v34_v10, %v19_v4  ;;  %v74_v16 = vadd.f32 %v73_v12, %v59_v8  ;;  %v68_v43 = vmul.f32 %v27_v37, %v27_v37  ;;  %v69_v47 = vmul.f32 %v28_v41, %v28_v41  ;;  %v30_v49 = vld [vmem:[%s189_s0 + $0x70] sm:$0xff]  ;;  %v31_v53 = vld [vmem:[%s189_s0 + $0x78] sm:$0xff] }
   0x7   :  { %v70_v51 = vmul.f32 %v29_v45, %v29_v45  ;;  %v71_v55 = vmul.f32 %v30_v49, %v30_v49  ;;  %v72_v58 = vmul.f32 %v31_v53, %v31_v53 }
   0x8   :  { %v36_v18 = vadd.f32 %v35_v14, %v20_v9  ;;  %v75_v20 = vadd.f32 %v74_v16, %v60_v11  ;;  %v32_v7 = vld [vmem:[%s187_s1] sm:$0x1] }
   0x9   :  { %v56_v12 = vld [vmem:[%s188_s2] sm:$0x1] }
   0xa   :  { %v37_v22 = vadd.f32 %v36_v18, %v21_v13  ;;  %v76_v24 = vadd.f32 %v75_v20, %v61_v15 }
   0xc   :  { %v38_v26 = vadd.f32 %v37_v22, %v22_v17  ;;  %v77_v28 = vadd.f32 %v76_v24, %v62_v19 }
   0xe   :  { %v39_v30 = vadd.f32 %v38_v26, %v23_v21  ;;  %v78_v32 = vadd.f32 %v77_v28, %v63_v23 }
  0x10   :  { %v40_v34 = vadd.f32 %v39_v30, %v24_v25  ;;  %v79_v36 = vadd.f32 %v78_v32, %v64_v27 }
  0x12   :  { %v41_v38 = vadd.f32 %v40_v34, %v25_v29  ;;  %v80_v40 = vadd.f32 %v79_v36, %v65_v31 }
  0x14   :  { %v42_v42 = vadd.f32 %v41_v38, %v26_v33  ;;  %v81_v44 = vadd.f32 %v80_v40, %v66_v35 }
  0x16   :  { %v43_v46 = vadd.f32 %v42_v42, %v27_v37  ;;  %v82_v48 = vadd.f32 %v81_v44, %v67_v39 }
  0x18   :  { %v44_v50 = vadd.f32 %v43_v46, %v28_v41  ;;  %v83_v52 = vadd.f32 %v82_v48, %v68_v43 }
  0x1a   :  { %v45_v54 = vadd.f32 %v44_v50, %v29_v45  ;;  %v84_v56 = vadd.f32 %v83_v52, %v69_v47 }
  0x1c   :  { %v46_v57 = vadd.f32 %v45_v54, %v30_v49  ;;  %v85_v59 = vadd.f32 %v84_v56, %v70_v51 }
  0x1e   :  { %v47_v60 = vadd.f32 %v46_v57, %v31_v53  ;;  %v86_v61 = vadd.f32 %v85_v59, %v71_v55 }
  0x20   :  { %v48_v62 = vrot.slane %v47_v60, 4  ;;  %v87_v63 = vadd.f32 %v86_v61, %v72_v58 }
  0x22   :  { %v49_v0 = vadd.f32 %v48_v62, %v47_v60  ;;  %v88_v1 = vrot.slane %v87_v63, 4 }
  0x24   :  { %v50_v2 = vrot.slane %v49_v0, 2  ;;  %v89_v3 = vadd.f32 %v88_v1, %v87_v63 }
  0x26   :  { %v51_v4 = vadd.f32 %v50_v2, %v49_v0  ;;  %v90_v5 = vrot.slane %v89_v3, 2 }
  0x28   :  { %v52_v6 = vrot.slane %v51_v4, 1  ;;  %v91_v8 = vadd.f32 %v90_v5, %v89_v3 }
  0x2a   :  { %v53_v9 = vadd.f32 %v52_v6, %v51_v4  ;;  %v92_v10 = vrot.slane %v91_v8, 1 }
  0x2c   :  { %v54_v11 = vadd.f32 %v53_v9, %v32_v7  ;;  %v93_v13 = vadd.f32 %v92_v10, %v91_v8 }
  0x2e   :  { %55 = vst [vmem:[%s187_s1] sm:$0x1] %v54_v11  ;;  %v94_v14 = vadd.f32 %v93_v13, %v56_v12 }
  0x30   :  { %95 = vst [vmem:[%s188_s2] sm:$0x1] %v94_v14 }

// kernel: vae_forward.30
= control target key start
LH: loop header
LB: loop body
LE: loop exit
PB: predicated region body
PF: predicated region fallthrough
CT: control target
= control target key end

     0   :  { %vm76_vm0 = vcmask 130048   ;;  %s237_s0 = inlined_call_operand.vmem [shape: f32[128,128], index: 0, kind: input, shape index: {}]   ;;  %s238_s1 = inlined_call_operand.vmem [shape: f32[1,128], index: 1, kind: input, shape index: {}]   ;;  %s239_s2 = inlined_call_operand.vmem [shape: f32[1,128], index: 2, kind: input, shape index: {}]   ;;  %s240_s3 = inlined_call_operand.vmem [shape: f32[128,16], index: 3, kind: output, shape index: {}]  }
   0x1   :  { %v14_v0 = vld [vmem:[%s237_s0] sm:$0xff]  ;;  %v15_v4 = vld [vmem:[%s237_s0 + $0x8] sm:$0xff]  ;;  %v16_v5 = vld [vmem:[%s237_s0 + $0x10] sm:$0xff] }
   0x2   :  { %v97_v1 = vld [vmem:[%s238_s1] ss:$0 sm:$0xff]  ;;  %v17_v6 = vld [vmem:[%s237_s0 + $0x18] sm:$0xff]  ;;  %v19_v11 = vld [vmem:[%s237_s0 + $0x28] sm:$0xff] }
   0x3   :  { %v98_v2 = vld [vmem:[%s239_s2] ss:$0 sm:$0xff]  ;;  %v37_v3 = vmul.f32 %v97_v1, %v14_v0  ;;  %v38_v7 = vmul.f32 %v97_v1, %v15_v4  ;;  %v39_v8 = vmul.f32 %v97_v1, %v16_v5  ;;  %v40_v9 = vmul.f32 %v97_v1, %v17_v6  ;;  %v20_v12 = vld [vmem:[%s237_s0 + $0x30] sm:$0xff]  ;;  %v21_v17 = vld [vmem:[%s237_s0 + $0x38] sm:$0xff] }
   0x4   :  { %v18_v10 = vld [vmem:[%s237_s0 + $0x20] sm:$0xff]  ;;  %v42_v15 = vmul.f32 %v97_v1, %v19_v11  ;;  %v43_v16 = vmul.f32 %v97_v1, %v20_v12  ;;  %v23_v19 = vld [vmem:[%s237_s0 + $0x48] sm:$0xff]  ;;  %v44_v23 = vmul.f32 %v97_v1, %v21_v17  ;;  %v24_v24 = vld [vmem:[%s237_s0 + $0x50] sm:$0xff] }
   0x5   :  { %v60_v13 = vadd.f32 %v98_v2, %v37_v3  ;;  %v41_v14 = vmul.f32 %v97_v1, %v18_v10  ;;  %v22_v18 = vld [vmem:[%s237_s0 + $0x40] sm:$0xff]  ;;  %v61_v20 = vadd.f32 %v98_v2, %v38_v7  ;;  %v62_v21 = vadd.f32 %v98_v2, %v39_v8  ;;  %v25_v25 = vld [vmem:[%s237_s0 + $0x58] sm:$0xff]  ;;  %v27_v31 = vld [vmem:[%s237_s0 + $0x68] sm:$0xff] }
   0x6   :  { %v63_v22 = vadd.f32 %v98_v2, %v40_v9  ;;  %v26_v26 = vld [vmem:[%s237_s0 + $0x60] sm:$0xff]  ;;  %v65_v28 = vadd.f32 %v98_v2, %v42_v15  ;;  %v66_v29 = vadd.f32 %v98_v2, %v43_v16  ;;  %v45_v30 = vmul.f32 %v97_v1, %v22_v18  ;;  %v28_v32 = vld [vmem:[%s237_s0 + $0x70] sm:$0xff]  ;;  %v29_v33 = vld [vmem:[%s237_s0 + $0x78] sm:$0xff] }
   0x7   :  { %77 = vst.msk [vmem:[%s240_s3] sm:$0xff] %vm76_vm0, %v60_v13  ;;  %v64_v27 = vadd.f32 %v98_v2, %v41_v14  ;;  %78 = vst.msk [vmem:[%s240_s3 + $0x8] sm:$0xff] %vm76_vm0, %v61_v20  ;;  %v67_v34 = vadd.f32 %v98_v2, %v44_v23  ;;  %v46_v35 = vmul.f32 %v97_v1, %v23_v19 }
   0x8   :  { %79 = vst.msk [vmem:[%s240_s3 + $0x10] sm:$0xff] %vm76_vm0, %v62_v21  ;;  %80 = vst.msk [vmem:[%s240_s3 + $0x18] sm:$0xff] %vm76_vm0, %v63_v22  ;;  %v47_v36 = vmul.f32 %v97_v1, %v24_v24  ;;  %v48_v37 = vmul.f32 %v97_v1, %v25_v25  ;;  %v68_v38 = vadd.f32 %v98_v2, %v45_v30 }
   0x9   :  { %81 = vst.msk [vmem:[%s240_s3 + $0x20] sm:$0xff] %vm76_vm0, %v64_v27  ;;  %82 = vst.msk [vmem:[%s240_s3 + $0x28] sm:$0xff] %vm76_vm0, %v65_v28  ;;  %v49_v39 = vmul.f32 %v97_v1, %v26_v26  ;;  %v50_v40 = vmul.f32 %v97_v1, %v27_v31  ;;  %v51_v41 = vmul.f32 %v97_v1, %v28_v32 }
   0xa   :  { %83 = vst.msk [vmem:[%s240_s3 + $0x30] sm:$0xff] %vm76_vm0, %v66_v29  ;;  %84 = vst.msk [vmem:[%s240_s3 + $0x38] sm:$0xff] %vm76_vm0, %v67_v34  ;;  %v69_v42 = vadd.f32 %v98_v2, %v46_v35  ;;  %v70_v43 = vadd.f32 %v98_v2, %v47_v36  ;;  %v71_v44 = vadd.f32 %v98_v2, %v48_v37 }
   0xb   :  { %v52_v45 = vmul.f32 %v97_v1, %v29_v33  ;;  %85 = vst.msk [vmem:[%s240_s3 + $0x40] sm:$0xff] %vm76_vm0, %v68_v38  ;;  %v72_v46 = vadd.f32 %v98_v2, %v49_v39  ;;  %v73_v47 = vadd.f32 %v98_v2, %v50_v40  ;;  %v74_v48 = vadd.f32 %v98_v2, %v51_v41 }
   0xc   :  { %86 = vst.msk [vmem:[%s240_s3 + $0x48] sm:$0xff] %vm76_vm0, %v69_v42  ;;  %87 = vst.msk [vmem:[%s240_s3 + $0x50] sm:$0xff] %vm76_vm0, %v70_v43 }
   0xd   :  { %88 = vst.msk [vmem:[%s240_s3 + $0x58] sm:$0xff] %vm76_vm0, %v71_v44  ;;  %v75_v49 = vadd.f32 %v98_v2, %v52_v45  ;;  %89 = vst.msk [vmem:[%s240_s3 + $0x60] sm:$0xff] %vm76_vm0, %v72_v46 }
   0xe   :  { %90 = vst.msk [vmem:[%s240_s3 + $0x68] sm:$0xff] %vm76_vm0, %v73_v47  ;;  %91 = vst.msk [vmem:[%s240_s3 + $0x70] sm:$0xff] %vm76_vm0, %v74_v48 }
   0xf   :  { %92 = vst.msk [vmem:[%s240_s3 + $0x78] sm:$0xff] %vm76_vm0, %v75_v49 }

// kernel: vae_forward.31
= control target key start
LH: loop header
LB: loop body
LE: loop exit
PB: predicated region body
PF: predicated region fallthrough
CT: control target
= control target key end

     0   :  { %s456_s1 = inlined_call_operand.vmem [shape: bf16[256,128], index: 1, kind: input, shape index: {}]   ;;  %s457_s0 = inlined_call_operand.vmem [shape: bf16[32,256], index: 0, kind: input, shape index: {}]   ;;  %s458_s2 = inlined_call_operand.vmem [shape: f32[1,128], index: 2, kind: input, shape index: {}]   ;;  %s459_s3 = inlined_call_operand.vmem [shape: f32[32,128], index: 3, kind: output, shape index: {}]  }
   0x1   :  { %v339_v0 = vld [vmem:[%s456_s1 + $0x78] sm:$0xff]   ;;  %v341_v2 = vld [vmem:[%s456_s1 + $0x70] sm:$0xff]   ;;  %v343_v4 = vld [vmem:[%s456_s1 + $0x68] sm:$0xff]  }
   0x2   :  { %v340_v1 = vld [vmem:[%s456_s1 + $0x38] sm:$0xff]   ;;  %295 = vmatprep.subr.bf16.mxu0 %v339_v0  ;;  %323 = vmatprep.subr.bf16.mxu1 %v339_v0  ;;  %v342_v3 = vld [vmem:[%s456_s1 + $0x30] sm:$0xff]   ;;  %v344_v5 = vld [vmem:[%s456_s1 + $0x28] sm:$0xff]  }
   0x3   :  { %296 = vmatpush3.bf16.msra.mxu0 %v340_v1  ;;  %331 = vmatpush3.bf16.msra.mxu1 %v340_v1  ;;  %v345_v6 = vld [vmem:[%s456_s1 + $0x60] sm:$0xff]   ;;  %v347_v8 = vld [vmem:[%s456_s1 + $0x58] sm:$0xff]   ;;  %v349_v10 = vld [vmem:[%s456_s1 + $0x50] sm:$0xff]  }
   0x4   :  { %297 = vmatprep.subr.bf16.mxu0 %v341_v2  ;;  %324 = vmatprep.subr.bf16.mxu1 %v341_v2  ;;  %v346_v7 = vld [vmem:[%s456_s1 + $0x20] sm:$0xff]   ;;  %v348_v9 = vld [vmem:[%s456_s1 + $0x18] sm:$0xff]   ;;  %v350_v13 = vld [vmem:[%s456_s1 + $0x10] sm:$0xff]  }
   0x5   :  { %v357_v11 = vld [vmem:[%s457_s0 + $0x4] ss:$8 sps:$4 sm:$0xff]   ;;  %v360_v12 = vld [vmem:[%s457_s0 + $0x14] ss:$8 sps:$4 sm:$0xff]   ;;  %v355_v18 = vld [vmem:[%s457_s0] ss:$8 sps:$4 sm:$0xff]  }
   0x6   :  { %v351_v14 = vld [vmem:[%s456_s1 + $0x48] sm:$0xff]   ;;  %211 = vmatprep.mubr.bf16.mxu0 %v357_v11  ;;  %219 = vmatprep.mubr.bf16.mxu1 %v360_v12  ;;  %v353_v16 = vld [vmem:[%s456_s1 + $0x40] sm:$0xff]   ;;  %v358_v19 = vld [vmem:[%s457_s0 + $0x10] ss:$8 sps:$4 sm:$0xff]  }
   0x7   :  { %298 = vmatpush3.bf16.msra.mxu0 %v342_v3  ;;  %332 = vmatpush3.bf16.msra.mxu1 %v342_v3  ;;  %v352_v15 = vld [vmem:[%s456_s1 + $0x8] sm:$0xff]   ;;  %v354_v17 = vld [vmem:[%s456_s1] sm:$0xff]  }
   0x8   :  { %299 = vmatprep.subr.bf16.mxu0 %v343_v4  ;;  %325 = vmatprep.subr.bf16.mxu1 %v343_v4  ;;  %v294_v23 = vld [vmem:[%s458_s2] ss:$0 sm:$0xff] }
   0xb   :  { %300 = vmatpush3.bf16.msra.mxu0 %v344_v5  ;;  %333 = vmatpush3.bf16.msra.mxu1 %v344_v5 }
   0xc   :  { %301 = vmatprep.subr.bf16.mxu0 %v345_v6  ;;  %326 = vmatprep.subr.bf16.mxu1 %v345_v6 }
   0xf   :  { %302 = vmatpush3.bf16.msra.mxu0 %v346_v7  ;;  %334 = vmatpush3.bf16.msra.mxu1 %v346_v7 }
  0x10   :  { %303 = vmatprep.subr.bf16.mxu0 %v347_v8  ;;  %327 = vmatprep.subr.bf16.mxu1 %v347_v8 }
  0x13   :  { %304 = vmatpush3.bf16.msra.mxu0 %v348_v9  ;;  %335 = vmatpush3.bf16.msra.mxu1 %v348_v9 }
  0x14   :  { %305 = vmatprep.subr.bf16.mxu0 %v349_v10  ;;  %328 = vmatprep.subr.bf16.mxu1 %v349_v10 }
  0x17   :  { %306 = vmatpush3.bf16.msra.mxu0 %v350_v13  ;;  %336 = vmatpush3.bf16.msra.mxu1 %v350_v13 }
  0x18   :  { %307 = vmatprep.subr.bf16.mxu0 %v351_v14  ;;  %329 = vmatprep.subr.bf16.mxu1 %v351_v14 }
  0x1b   :  { %308 = vmatpush3.bf16.msra.mxu0 %v352_v15  ;;  %337 = vmatpush3.bf16.msra.mxu1 %v352_v15 }
  0x1c   :  { %309 = vmatprep.subr.bf16.mxu0 %v353_v16  ;;  %330 = vmatprep.subr.bf16.mxu1 %v353_v16 }
  0x1f   :  { %310 = vmatpush3.bf16.msra.mxu0 %v354_v17  ;;  %338 = vmatpush3.bf16.msra.mxu1 %v354_v17 }
  0x22   :  { %212 = vmatmul.mubr.bf16.vlgmr.msra.gmra.mxu0 %v355_v18  ;;  %220 = vmatmul.mubr.bf16.vlgmr.msra.gmra.mxu1 %v358_v19 }
  0xe2   :  { %v311_v20 = vpop.f32.mrf.mxu0  ;;  %v317_v21 = vpop.f32.mrf.mxu1 }
  0xe4   :  { %v312_v22 = vpop.f32.mrf.mxu0  ;;  %v318_v24 = vpop.f32.mrf.mxu1 }
  0xe5   :  { %v313_v25 = vadd.f32 %v312_v22, %v311_v20  ;;  %v319_v26 = vadd.f32 %v318_v24, %v317_v21 }
  0xe6   :  { %v314_v27 = vpop.f32.mrf.mxu0  ;;  %v320_v28 = vpop.f32.mrf.mxu1 }
  0xe7   :  { %v250_v29 = vadd.f32 %v313_v25, %v294_v23  ;;  %v252_v30 = vadd.f32 %v319_v26, %v294_v23 }
  0xe8   :  { %v315_v31 = vpop.f32.mrf.mxu0  ;;  %v321_v32 = vpop.f32.mrf.mxu1 }
  0xe9   :  { %vm254_vm0 = vcmp.ge.f32.partialorder %v250_v29, 0.0  ;;  %v258_v33 = vmul.f32 0.2, %v250_v29  ;;  %vm256_vm1 = vcmp.ge.f32.partialorder %v252_v30, 0.0  ;;  %v260_v34 = vmul.f32 0.2, %v252_v30 }
  0xea   :  { %v316_v35 = vadd.f32 %v315_v31, %v314_v27  ;;  %v322_v36 = vadd.f32 %v321_v32, %v320_v28 }
  0xeb   :  { %v262_v37 = vsel %vm254_vm0, %v250_v29, %v258_v33  ;;  %v264_v38 = vsel %vm256_vm1, %v252_v30, %v260_v34 }
  0xec   :  { %266 = vst [vmem:[%s459_s3] sm:$0xff] %v262_v37  ;;  %268 = vst [vmem:[%s459_s3 + $0x10] sm:$0xff] %v264_v38  ;;  %v251_v39 = vadd.f32 %v316_v35, %v294_v23  ;;  %v253_v40 = vadd.f32 %v322_v36, %v294_v23 }
  0xee   :  { %vm255_vm2 = vcmp.ge.f32.partialorder %v251_v39, 0.0  ;;  %v259_v41 = vmul.f32 0.2, %v251_v39  ;;  %vm257_vm3 = vcmp.ge.f32.partialorder %v253_v40, 0.0  ;;  %v261_v42 = vmul.f32 0.2, %v253_v40 }
  0xf0   :  { %v263_v43 = vsel %vm255_vm2, %v251_v39, %v259_v41  ;;  %v265_v44 = vsel %vm257_vm3, %v253_v40, %v261_v42 }
  0xf1   :  { %267 = vst [vmem:[%s459_s3 + $0x8] sm:$0xff] %v263_v43  ;;  %269 = vst [vmem:[%s459_s3 + $0x18] sm:$0xff] %v265_v44 }

// kernel: vae_forward.32
= control target key start
LH: loop header
LB: loop body
LE: loop exit
PB: predicated region body
PF: predicated region fallthrough
CT: control target
= control target key end

     0   :  { %v57_v0 = vmov 0.0   ;;  %s103_s1 = inlined_call_operand.vmem [shape: f32[1,128], index: 1, kind: output, shape index: {0}]   ;;  %s104_s2 = inlined_call_operand.vmem [shape: f32[1,128], index: 2, kind: output, shape index: {1}]   ;;  %s105_s0 = inlined_call_operand.vmem [shape: f32[32,128], index: 0, kind: input, shape index: {}]  }
   0x1   :  { %14 = vst [vmem:[%s103_s1] sm:$0x1] %v57_v0  ;;  %15 = vst [vmem:[%s104_s2] sm:$0x1] %v57_v0  ;;  %v16_v1 = vld [vmem:[%s105_s0] sm:$0xff]  ;;  %v17_v2 = vld [vmem:[%s105_s0 + $0x8] sm:$0xff] }
   0x2   :  { %v18_v3 = vld [vmem:[%s105_s0 + $0x10] sm:$0xff]  ;;  %v19_v4 = vld [vmem:[%s105_s0 + $0x18] sm:$0xff]  ;;  %v21_v5 = vadd.f32 %v17_v2, %v16_v1  ;;  %v33_v6 = vmul.f32 %v16_v1, %v16_v1  ;;  %v34_v7 = vmul.f32 %v17_v2, %v17_v2 }
   0x3   :  { %v35_v8 = vmul.f32 %v18_v3, %v18_v3  ;;  %v36_v10 = vmul.f32 %v19_v4, %v19_v4 }
   0x4   :  { %v22_v9 = vadd.f32 %v21_v5, %v18_v3  ;;  %v37_v11 = vadd.f32 %v34_v7, %v33_v6 }
   0x6   :  { %v23_v12 = vadd.f32 %v22_v9, %v19_v4  ;;  %v38_v13 = vadd.f32 %v37_v11, %v35_v8 }
   0x8   :  { %v24_v14 = vrot.slane %v23_v12, 4  ;;  %v39_v15 = vadd.f32 %v38_v13, %v36_v10  ;;  %v20_v24 = vld [vmem:[%s103_s1] sm:$0x1] }
   0x9   :  { %v32_v27 = vld [vmem:[%s104_s2] sm:$0x1] }
   0xa   :  { %v25_v16 = vadd.f32 %v24_v14, %v23_v12  ;;  %v40_v17 = vrot.slane %v39_v15, 4 }
   0xc   :  { %v26_v18 = vrot.slane %v25_v16, 2  ;;  %v41_v19 = vadd.f32 %v40_v17, %v39_v15 }
   0xe   :  { %v27_v20 = vadd.f32 %v26_v18, %v25_v16  ;;  %v42_v21 = vrot.slane %v41_v19, 2 }
  0x10   :  { %v28_v22 = vrot.slane %v27_v20, 1  ;;  %v43_v23 = vadd.f32 %v42_v21, %v41_v19 }
  0x12   :  { %v29_v25 = vadd.f32 %v28_v22, %v27_v20  ;;  %v44_v26 = vrot.slane %v43_v23, 1 }
  0x14   :  { %v30_v28 = vadd.f32 %v29_v25, %v20_v24  ;;  %v45_v29 = vadd.f32 %v44_v26, %v43_v23 }
  0x16   :  { %31 = vst [vmem:[%s103_s1] sm:$0x1] %v30_v28  ;;  %v46_v30 = vadd.f32 %v45_v29, %v32_v27 }
  0x18   :  { %47 = vst [vmem:[%s104_s2] sm:$0x1] %v46_v30 }

// kernel: vae_forward.33
= control target key start
LH: loop header
LB: loop body
LE: loop exit
PB: predicated region body
PF: predicated region fallthrough
CT: control target
= control target key end

     0   :  { %vm40_vm0 = vcmask 261120   ;;  %s101_s0 = inlined_call_operand.vmem [shape: f32[32,128], index: 0, kind: input, shape index: {}]   ;;  %s102_s1 = inlined_call_operand.vmem [shape: f32[1,128], index: 1, kind: input, shape index: {}]   ;;  %s103_s2 = inlined_call_operand.vmem [shape: f32[1,128], index: 2, kind: input, shape index: {}]   ;;  %s104_s3 = inlined_call_operand.vmem [shape: f32[32,32], index: 3, kind: output, shape index: {}]  }
   0x1   :  { %v14_v0 = vld [vmem:[%s101_s0] sm:$0xff]  ;;  %v15_v4 = vld [vmem:[%s101_s0 + $0x8] sm:$0xff]  ;;  %v16_v5 = vld [vmem:[%s101_s0 + $0x10] sm:$0xff] }
   0x2   :  { %v49_v1 = vld [vmem:[%s102_s1] ss:$0 sm:$0xff]  ;;  %v17_v6 = vld [vmem:[%s101_s0 + $0x18] sm:$0xff] }
   0x3   :  { %v50_v2 = vld [vmem:[%s103_s2] ss:$0 sm:$0xff]  ;;  %v25_v3 = vmul.f32 %v49_v1, %v14_v0  ;;  %v26_v7 = vmul.f32 %v49_v1, %v15_v4  ;;  %v27_v8 = vmul.f32 %v49_v1, %v16_v5  ;;  %v28_v9 = vmul.f32 %v49_v1, %v17_v6 }
   0x5   :  { %v36_v10 = vadd.f32 %v50_v2, %v25_v3  ;;  %v37_v11 = vadd.f32 %v50_v2, %v26_v7  ;;  %v38_v12 = vadd.f32 %v50_v2, %v27_v8  ;;  %v39_v13 = vadd.f32 %v50_v2, %v28_v9 }
   0x7   :  { %41 = vst.msk [vmem:[%s104_s3] sm:$0xff] %vm40_vm0, %v36_v10  ;;  %42 = vst.msk [vmem:[%s104_s3 + $0x8] sm:$0xff] %vm40_vm0, %v37_v11 }
   0x8   :  { %43 = vst.msk [vmem:[%s104_s3 + $0x10] sm:$0xff] %vm40_vm0, %v38_v12  ;;  %44 = vst.msk [vmem:[%s104_s3 + $0x18] sm:$0xff] %vm40_vm0, %v39_v13 }

// kernel: vae_forward.36
= control target key start
LH: loop header
LB: loop body
LE: loop exit
PB: predicated region body
PF: predicated region fallthrough
CT: control target
= control target key end

     0   :  { %vm31_vm0 = vcmask 523264   ;;  %s71_s0 = inlined_call_operand.vmem [shape: f32[8,128], index: 0, kind: input, shape index: {}]   ;;  %s72_s1 = inlined_call_operand.vmem [shape: f32[1,128], index: 1, kind: input, shape index: {}]   ;;  %s73_s2 = inlined_call_operand.vmem [shape: f32[1,128], index: 2, kind: input, shape index: {}]   ;;  %s74_s3 = inlined_call_operand.vmem [shape: f32[8,64], index: 3, kind: output, shape index: {}]  }
   0x1   :  { %v14_v0 = vld [vmem:[%s71_s0] sm:$0xff] }
   0x2   :  { %v37_v1 = vld [vmem:[%s72_s1] ss:$0 sm:$0xff] }
   0x3   :  { %v38_v2 = vld [vmem:[%s73_s2] ss:$0 sm:$0xff]  ;;  %v22_v3 = vmul.f32 %v37_v1, %v14_v0 }
   0x5   :  { %v30_v4 = vadd.f32 %v38_v2, %v22_v3 }
   0x7   :  { %32 = vst.msk [vmem:[%s74_s3] sm:$0xff] %vm31_vm0, %v30_v4 }

// kernel: vae_forward.34
= control target key start
LH: loop header
LB: loop body
LE: loop exit
PB: predicated region body
PF: predicated region fallthrough
CT: control target
= control target key end

     0   :  { %s640_s1 = inlined_call_operand.vmem [shape: bf16[512,128], index: 1, kind: input, shape index: {}]   ;;  %s641_s0 = inlined_call_operand.vmem [shape: bf16[8,512], index: 0, kind: input, shape index: {}]   ;;  %s642_s2 = inlined_call_operand.vmem [shape: f32[1,128], index: 2, kind: input, shape index: {}]   ;;  %s643_s3 = inlined_call_operand.vmem [shape: f32[8,128], index: 3, kind: output, shape index: {}]  }
   0x1   :  { %v476_v0 = vld [vmem:[%s640_s1 + $0x78] sm:$0xff]   ;;  %v480_v4 = vld [vmem:[%s640_s1 + $0x70] sm:$0xff]   ;;  %v484_v8 = vld [vmem:[%s640_s1 + $0x68] sm:$0xff]  }
   0x2   :  { %v477_v1 = vld [vmem:[%s640_s1 + $0xf8] sm:$0xff]   ;;  %432 = vmatprep.subr.bf16.mxu0 %v476_v0  ;;  %v481_v5 = vld [vmem:[%s640_s1 + $0xf0] sm:$0xff]   ;;  %v485_v9 = vld [vmem:[%s640_s1 + $0xe8] sm:$0xff]  }
   0x3   :  { %v478_v2 = vld [vmem:[%s640_s1 + $0x38] sm:$0xff]   ;;  %454 = vmatprep.subr.bf16.mxu1 %v477_v1  ;;  %v482_v6 = vld [vmem:[%s640_s1 + $0x30] sm:$0xff]   ;;  %v486_v10 = vld [vmem:[%s640_s1 + $0x28] sm:$0xff]  }
   0x4   :  { %v479_v3 = vld [vmem:[%s640_s1 + $0xb8] sm:$0xff]   ;;  %433 = vmatpush3.bf16.msra.mxu0 %v478_v2  ;;  %v483_v7 = vld [vmem:[%s640_s1 + $0xb0] sm:$0xff]   ;;  %v487_v11 = vld [vmem:[%s640_s1 + $0xa8] sm:$0xff]  }
   0x5   :  { %455 = vmatpush3.bf16.msra.mxu1 %v479_v3  ;;  %434 = vmatprep.subr.bf16.mxu0 %v480_v4  ;;  %v488_v12 = vld [vmem:[%s640_s1 + $0x60] sm:$0xff]   ;;  %v492_v16 = vld [vmem:[%s640_s1 + $0x58] sm:$0xff]   ;;  %v496_v20 = vld [vmem:[%s640_s1 + $0x50] sm:$0xff]  }
   0x6   :  { %456 = vmatprep.subr.bf16.mxu1 %v481_v5  ;;  %v489_v13 = vld [vmem:[%s640_s1 + $0xe0] sm:$0xff]   ;;  %v493_v17 = vld [vmem:[%s640_s1 + $0xd8] sm:$0xff]   ;;  %v497_v21 = vld [vmem:[%s640_s1 + $0xd0] sm:$0xff]  }
   0x7   :  { %v490_v14 = vld [vmem:[%s640_s1 + $0x20] sm:$0xff]   ;;  %v494_v18 = vld [vmem:[%s640_s1 + $0x18] sm:$0xff]   ;;  %v498_v22 = vld [vmem:[%s640_s1 + $0x10] sm:$0xff]  }
   0x8   :  { %435 = vmatpush3.bf16.msra.mxu0 %v482_v6  ;;  %v491_v15 = vld [vmem:[%s640_s1 + $0xa0] sm:$0xff]   ;;  %v495_v19 = vld [vmem:[%s640_s1 + $0x98] sm:$0xff]   ;;  %v499_v23 = vld [vmem:[%s640_s1 + $0x90] sm:$0xff]  }
   0x9   :  { %457 = vmatpush3.bf16.msra.mxu1 %v483_v7  ;;  %436 = vmatprep.subr.bf16.mxu0 %v484_v8  ;;  %v500_v24 = vld [vmem:[%s640_s1 + $0x48] sm:$0xff]   ;;  %v504_v28 = vld [vmem:[%s640_s1 + $0x40] sm:$0xff]  }
   0xa   :  { %458 = vmatprep.subr.bf16.mxu1 %v485_v9  ;;  %v501_v25 = vld [vmem:[%s640_s1 + $0xc8] sm:$0xff]   ;;  %v505_v29 = vld [vmem:[%s640_s1 + $0xc0] sm:$0xff]  }
   0xb   :  { %v502_v26 = vld [vmem:[%s640_s1 + $0x8] sm:$0xff]   ;;  %v506_v30 = vld [vmem:[%s640_s1] sm:$0xff]  }
   0xc   :  { %437 = vmatpush3.bf16.msra.mxu0 %v486_v10  ;;  %v503_v27 = vld [vmem:[%s640_s1 + $0x88] sm:$0xff]   ;;  %v507_v31 = vld [vmem:[%s640_s1 + $0x80] sm:$0xff]  }
   0xd   :  { %459 = vmatpush3.bf16.msra.mxu1 %v487_v11  ;;  %438 = vmatprep.subr.bf16.mxu0 %v488_v12  ;;  %v21_v32 = vld [vmem:[%s641_s0] sm:$0xff]  ;;  %v22_v33 = vld [vmem:[%s641_s0 + $0x8] sm:$0xff] }
   0xe   :  { %460 = vmatprep.subr.bf16.mxu1 %v489_v13  ;;  %v395_v34 = vcombine.low %v21_v32, %v21_v32  ;;  %v396_v35 = vcombine.high %v21_v32, %v21_v32  ;;  %v397_v36 = vcombine.low %v22_v33, %v22_v33  ;;  %v398_v37 = vcombine.high %v22_v33, %v22_v33  ;;  %v431_v44 = vld [vmem:[%s642_s2] ss:$0 sm:$0xff] }
  0x10   :  { %439 = vmatpush3.bf16.msra.mxu0 %v490_v14  ;;  %325 = vmatprep.mubr.bf16.mxu0 %v396_v35 }
  0x11   :  { %461 = vmatpush3.bf16.msra.mxu1 %v491_v15  ;;  %440 = vmatprep.subr.bf16.mxu0 %v492_v16 }
  0x12   :  { %462 = vmatprep.subr.bf16.mxu1 %v493_v17  ;;  %365 = vmatprep.mubr.bf16.mxu1 %v398_v37 }
  0x14   :  { %441 = vmatpush3.bf16.msra.mxu0 %v494_v18 }
  0x15   :  { %463 = vmatpush3.bf16.msra.mxu1 %v495_v19  ;;  %442 = vmatprep.subr.bf16.mxu0 %v496_v20 }
  0x16   :  { %464 = vmatprep.subr.bf16.mxu1 %v497_v21 }
  0x18   :  { %443 = vmatpush3.bf16.msra.mxu0 %v498_v22 }
  0x19   :  { %465 = vmatpush3.bf16.msra.mxu1 %v499_v23  ;;  %444 = vmatprep.subr.bf16.mxu0 %v500_v24 }
  0x1a   :  { %466 = vmatprep.subr.bf16.mxu1 %v501_v25 }
  0x1c   :  { %445 = vmatpush3.bf16.msra.mxu0 %v502_v26 }
  0x1d   :  { %467 = vmatpush3.bf16.msra.mxu1 %v503_v27  ;;  %446 = vmatprep.subr.bf16.mxu0 %v504_v28 }
  0x1e   :  { %468 = vmatprep.subr.bf16.mxu1 %v505_v29 }
  0x20   :  { %447 = vmatpush3.bf16.msra.mxu0 %v506_v30 }
  0x21   :  { %469 = vmatpush3.bf16.msra.mxu1 %v507_v31 }
  0x23   :  { %326 = vmatmul.mubr.bf16.vlgmr.msra.gmra.mxu0 %v395_v34 }
  0x24   :  { %366 = vmatmul.mubr.bf16.vlgmr.msra.gmra.mxu1 %v397_v36 }
  0xe3   :  { %v448_v38 = vpop.f32.mrf.mxu0 }
  0xe4   :  { %v470_v39 = vpop.f32.mrf.mxu1 }
  0xe5   :  { %v449_v40 = vpop.f32.mrf.mxu0 }
  0xe6   :  { %v471_v41 = vpop.f32.mrf.mxu1  ;;  %v450_v42 = vadd.f32 %v449_v40, %v448_v38 }
  0xe7   :  { %v472_v43 = vadd.f32 %v471_v41, %v470_v39  ;;  %v451_v45 = vpop.f32.mrf.mxu0 }
  0xe8   :  { %v473_v46 = vpop.f32.mrf.mxu1 }
  0xe9   :  { %v368_v47 = vadd.f32 %v472_v43, %v450_v42  ;;  %v452_v48 = vpop.f32.mrf.mxu0 }
  0xea   :  { %v474_v49 = vpop.f32.mrf.mxu1 }
  0xeb   :  { %v386_v50 = vadd.f32 %v431_v44, %v368_v47 }
  0xed   :  { %vm387_vm0 = vcmp.ge.f32.partialorder %v386_v50, 0.0  ;;  %v388_v51 = vmul.f32 0.2, %v386_v50 }
  0xef   :  { %v389_v52 = vsel %vm387_vm0, %v386_v50, %v388_v51 }
  0xf0   :  { %390 = vst [vmem:[%s643_s3] sm:$0xff] %v389_v52 }

// kernel: vae_forward.35
= control target key start
LH: loop header
LB: loop body
LE: loop exit
PB: predicated region body
PF: predicated region fallthrough
CT: control target
= control target key end

     0   :  { %v45_v0 = vmov 0.0   ;;  %s82_s1 = inlined_call_operand.vmem [shape: f32[1,128], index: 1, kind: output, shape index: {0}]   ;;  %s83_s2 = inlined_call_operand.vmem [shape: f32[1,128], index: 2, kind: output, shape index: {1}]   ;;  %s84_s0 = inlined_call_operand.vmem [shape: f32[8,128], index: 0, kind: input, shape index: {}]  }
   0x1   :  { %14 = vst [vmem:[%s82_s1] sm:$0x1] %v45_v0  ;;  %15 = vst [vmem:[%s83_s2] sm:$0x1] %v45_v0  ;;  %v16_v1 = vld [vmem:[%s84_s0] sm:$0xff] }
   0x2   :  { %v18_v2 = vrot.slane %v16_v1, 4  ;;  %v27_v3 = vmul.f32 %v16_v1, %v16_v1 }
   0x4   :  { %v19_v4 = vadd.f32 %v18_v2, %v16_v1  ;;  %v28_v5 = vrot.slane %v27_v3, 4 }
   0x6   :  { %v20_v6 = vrot.slane %v19_v4, 2  ;;  %v29_v7 = vadd.f32 %v28_v5, %v27_v3 }
   0x8   :  { %v21_v8 = vadd.f32 %v20_v6, %v19_v4  ;;  %v30_v9 = vrot.slane %v29_v7, 2  ;;  %v17_v12 = vld [vmem:[%s82_s1] sm:$0x1] }
   0x9   :  { %v26_v15 = vld [vmem:[%s83_s2] sm:$0x1] }
   0xa   :  { %v22_v10 = vrot.slane %v21_v8, 1  ;;  %v31_v11 = vadd.f32 %v30_v9, %v29_v7 }
   0xc   :  { %v23_v13 = vadd.f32 %v22_v10, %v21_v8  ;;  %v32_v14 = vrot.slane %v31_v11, 1 }
   0xe   :  { %v24_v16 = vadd.f32 %v23_v13, %v17_v12  ;;  %v33_v17 = vadd.f32 %v32_v14, %v31_v11 }
  0x10   :  { %25 = vst [vmem:[%s82_s1] sm:$0x1] %v24_v16  ;;  %v34_v18 = vadd.f32 %v33_v17, %v26_v15 }
  0x12   :  { %35 = vst [vmem:[%s83_s2] sm:$0x1] %v34_v18 }

// kernel: vae_forward.37
= control target key start
LH: loop header
LB: loop body
LE: loop exit
PB: predicated region body
PF: predicated region fallthrough
CT: control target
= control target key end

     0   :  { %s352_s1 = inlined_call_operand.vmem [shape: bf16[256,128], index: 1, kind: input, shape index: {}]   ;;  %s353_s0 = inlined_call_operand.vmem [shape: bf16[8,256], index: 0, kind: input, shape index: {}]   ;;  %s354_s2 = inlined_call_operand.vmem [shape: f32[1,128], index: 2, kind: input, shape index: {}]   ;;  %s355_s3 = inlined_call_operand.vmem [shape: f32[8,128], index: 3, kind: output, shape index: {}]  }
   0x1   :  { %v257_v0 = vld [vmem:[%s352_s1 + $0x78] sm:$0xff]   ;;  %v259_v2 = vld [vmem:[%s352_s1 + $0x70] sm:$0xff]   ;;  %v261_v4 = vld [vmem:[%s352_s1 + $0x68] sm:$0xff]  }
   0x2   :  { %v258_v1 = vld [vmem:[%s352_s1 + $0x38] sm:$0xff]   ;;  %235 = vmatprep.subr.bf16.mxu0 %v257_v0  ;;  %v260_v3 = vld [vmem:[%s352_s1 + $0x30] sm:$0xff]   ;;  %v262_v5 = vld [vmem:[%s352_s1 + $0x28] sm:$0xff]  }
   0x3   :  { %236 = vmatpush3.bf16.msra.mxu0 %v258_v1  ;;  %v263_v6 = vld [vmem:[%s352_s1 + $0x60] sm:$0xff]   ;;  %v265_v8 = vld [vmem:[%s352_s1 + $0x58] sm:$0xff]   ;;  %v267_v10 = vld [vmem:[%s352_s1 + $0x50] sm:$0xff]  }
   0x4   :  { %237 = vmatprep.subr.bf16.mxu0 %v259_v2  ;;  %v264_v7 = vld [vmem:[%s352_s1 + $0x20] sm:$0xff]   ;;  %v266_v9 = vld [vmem:[%s352_s1 + $0x18] sm:$0xff]   ;;  %v268_v13 = vld [vmem:[%s352_s1 + $0x10] sm:$0xff]  }
   0x5   :  { %v21_v11 = vld [vmem:[%s353_s0] sm:$0xff]  ;;  %v269_v14 = vld [vmem:[%s352_s1 + $0x48] sm:$0xff]  }
   0x6   :  { %v217_v12 = vcombine.high %v21_v11, %v21_v11  ;;  %v270_v15 = vld [vmem:[%s352_s1 + $0x8] sm:$0xff]   ;;  %v271_v16 = vld [vmem:[%s352_s1 + $0x40] sm:$0xff]   ;;  %v216_v18 = vcombine.low %v21_v11, %v21_v11 }
   0x7   :  { %238 = vmatpush3.bf16.msra.mxu0 %v260_v3  ;;  %v272_v17 = vld [vmem:[%s352_s1] sm:$0xff]  }
   0x8   :  { %239 = vmatprep.subr.bf16.mxu0 %v261_v4  ;;  %189 = vmatprep.mubr.bf16.mxu0 %v217_v12  ;;  %v234_v21 = vld [vmem:[%s354_s2] ss:$0 sm:$0xff] }
   0xb   :  { %240 = vmatpush3.bf16.msra.mxu0 %v262_v5 }
   0xc   :  { %241 = vmatprep.subr.bf16.mxu0 %v263_v6 }
   0xf   :  { %242 = vmatpush3.bf16.msra.mxu0 %v264_v7 }
  0x10   :  { %243 = vmatprep.subr.bf16.mxu0 %v265_v8 }
  0x13   :  { %244 = vmatpush3.bf16.msra.mxu0 %v266_v9 }
  0x14   :  { %245 = vmatprep.subr.bf16.mxu0 %v267_v10 }
  0x17   :  { %246 = vmatpush3.bf16.msra.mxu0 %v268_v13 }
  0x18   :  { %247 = vmatprep.subr.bf16.mxu0 %v269_v14 }
  0x1b   :  { %248 = vmatpush3.bf16.msra.mxu0 %v270_v15 }
  0x1c   :  { %249 = vmatprep.subr.bf16.mxu0 %v271_v16 }
  0x1f   :  { %250 = vmatpush3.bf16.msra.mxu0 %v272_v17 }
  0x22   :  { %190 = vmatmul.mubr.bf16.vlgmr.msra.gmra.mxu0 %v216_v18 }
  0xe2   :  { %v251_v19 = vpop.f32.mrf.mxu0 }
  0xe4   :  { %v252_v20 = vpop.f32.mrf.mxu0 }
  0xe5   :  { %v253_v22 = vadd.f32 %v252_v20, %v251_v19 }
  0xe6   :  { %v254_v23 = vpop.f32.mrf.mxu0 }
  0xe7   :  { %v210_v24 = vadd.f32 %v253_v22, %v234_v21 }
  0xe8   :  { %v255_v25 = vpop.f32.mrf.mxu0 }
  0xe9   :  { %211 = vst [vmem:[%s355_s3] sm:$0xff] %v210_v24 }

// kernel: vae_forward.39
= control target key start
LH: loop header
LB: loop body
LE: loop exit
PB: predicated region body
PF: predicated region fallthrough
CT: control target
= control target key end

     0   :  { %v233_v1 = vmov 0   ;;  %v172_v18 = vlaneseq  ;;  %s314_s1 = inlined_call_operand.vmem [shape: bf16[128,256], index: 1, kind: input, shape index: {}]   ;;  %s315_s0 = inlined_call_operand.vmem [shape: bf16[8,128], index: 0, kind: input, shape index: {}]   ;;  %s316_s2 = inlined_call_operand.vmem [shape: f32[1,256], index: 2, kind: input, shape index: {}]   ;;  %s317_s3 = inlined_call_operand.vmem [shape: f32[8,256], index: 3, kind: output, shape index: {}]  }
   0x1   :  { %v209_v0 = vld [vmem:[%s314_s1 + $0x74] ss:$8 sps:$4 sm:$0xff]   ;;  %152 = vmatprep.mubr.bf16.mxu0 %v233_v1  ;;  %v211_v2 = vld [vmem:[%s314_s1 + $0x70] ss:$8 sps:$4 sm:$0xff]   ;;  %v212_v3 = vld [vmem:[%s314_s1 + $0x64] ss:$8 sps:$4 sm:$0xff]  }
   0x2   :  { %120 = vmatprep.subr.bf16.mxu0 %v209_v0  ;;  %v214_v4 = vld [vmem:[%s314_s1 + $0x60] ss:$8 sps:$4 sm:$0xff]   ;;  %v215_v5 = vld [vmem:[%s314_s1 + $0x54] ss:$8 sps:$4 sm:$0xff]   ;;  %v217_v6 = vld [vmem:[%s314_s1 + $0x50] ss:$8 sps:$4 sm:$0xff]  }
   0x3   :  { %121 = vmatpush1.bf16.msra.mxu0 %v211_v2  ;;  %v218_v7 = vld [vmem:[%s314_s1 + $0x44] ss:$8 sps:$4 sm:$0xff]   ;;  %v220_v8 = vld [vmem:[%s314_s1 + $0x40] ss:$8 sps:$4 sm:$0xff]   ;;  %v221_v9 = vld [vmem:[%s314_s1 + $0x34] ss:$8 sps:$4 sm:$0xff]  }
   0x4   :  { %122 = vmatprep.subr.bf16.mxu0 %v212_v3  ;;  %v223_v10 = vld [vmem:[%s314_s1 + $0x30] ss:$8 sps:$4 sm:$0xff]   ;;  %v224_v11 = vld [vmem:[%s314_s1 + $0x24] ss:$8 sps:$4 sm:$0xff]   ;;  %v226_v12 = vld [vmem:[%s314_s1 + $0x20] ss:$8 sps:$4 sm:$0xff]  }
   0x5   :  { %v227_v13 = vld [vmem:[%s314_s1 + $0x14] ss:$8 sps:$4 sm:$0xff]   ;;  %v229_v14 = vld [vmem:[%s314_s1 + $0x10] ss:$8 sps:$4 sm:$0xff]   ;;  %v230_v15 = vld [vmem:[%s314_s1 + $0x4] ss:$8 sps:$4 sm:$0xff]  }
   0x6   :  { %v232_v16 = vld [vmem:[%s314_s1] ss:$8 sps:$4 sm:$0xff]   ;;  %v173_v19 = vshrl.u32 %v172_v18, 7 }
   0x7   :  { %123 = vmatpush1.bf16.msra.mxu0 %v214_v4  ;;  %v23_v17 = vld [vmem:[%s315_s0] sm:$0xf] }
   0x8   :  { %124 = vmatprep.subr.bf16.mxu0 %v215_v5  ;;  %v174_v20 = vsub.s32 0, %v173_v19  ;;  %v170_v21 = vld [vmem:[%s316_s2] sm:$0x3]  ;;  %v178_v22 = vsub.s32 1, %v173_v19 }
   0xa   :  { %v175_v23 = vrot.slane %v170_v21, %v174_v20  ;;  %v179_v24 = vrot.slane %v170_v21, %v178_v22 }
   0xb   :  { %125 = vmatpush1.bf16.msra.mxu0 %v217_v6 }
   0xc   :  { %126 = vmatprep.subr.bf16.mxu0 %v218_v7 }
   0xf   :  { %127 = vmatpush1.bf16.msra.mxu0 %v220_v8 }
  0x10   :  { %128 = vmatprep.subr.bf16.mxu0 %v221_v9 }
  0x13   :  { %129 = vmatpush1.bf16.msra.mxu0 %v223_v10 }
  0x14   :  { %130 = vmatprep.subr.bf16.mxu0 %v224_v11 }
  0x17   :  { %131 = vmatpush1.bf16.msra.mxu0 %v226_v12 }
  0x18   :  { %132 = vmatprep.subr.bf16.mxu0 %v227_v13 }
  0x1b   :  { %133 = vmatpush1.bf16.msra.mxu0 %v229_v14 }
  0x1c   :  { %134 = vmatprep.subr.bf16.mxu0 %v230_v15 }
  0x1f   :  { %135 = vmatpush1.bf16.msra.mxu0 %v232_v16 }
  0x22   :  { %153 = vmatmul.mubr.bf16.vlgmr.msra.gmra.mxu0 %v23_v17 }
  0xe2   :  { %v154_v25 = vpop.f32.mrf.mxu0 }
  0xe3   :  { %v182_v26 = vadd.f32 %v175_v23, %v154_v25 }
  0xe4   :  { %v156_v27 = vpop.f32.mrf.mxu0 }
  0xe5   :  { %v184_v28 = vmax.f32 %v182_v26, 0.0  ;;  %v183_v29 = vadd.f32 %v179_v24, %v156_v27 }
  0xe6   :  { %v158_v30 = vpop.f32.mrf.mxu0 }
  0xe7   :  { %186 = vst [vmem:[%s317_s3] sm:$0xff] %v184_v28  ;;  %v185_v31 = vmax.f32 %v183_v29, 0.0 }
  0xe8   :  { %v159_v32 = vpop.f32.mrf.mxu0 }
  0xe9   :  { %187 = vst [vmem:[%s317_s3 + $0x8] sm:$0xff] %v185_v31 }

// kernel: vae_forward.40
= control target key start
LH: loop header
LB: loop body
LE: loop exit
PB: predicated region body
PF: predicated region fallthrough
CT: control target
= control target key end

     0   :  { %s980_s1 = inlined_call_operand.vmem [shape: bf16[640,128], index: 1, kind: input, shape index: {}]   ;;  %s981_s0 = inlined_call_operand.vmem [shape: bf16[32,640], index: 0, kind: input, shape index: {}]   ;;  %s982_s2 = inlined_call_operand.vmem [shape: f32[1,128], index: 2, kind: input, shape index: {}]   ;;  %s983_s3 = inlined_call_operand.vmem [shape: f32[32,128], index: 3, kind: output, shape index: {}]  }
   0x1   :  { %v741_v0 = vld [vmem:[%s980_s1 + $0x78] sm:$0xff]   ;;  %v745_v4 = vld [vmem:[%s980_s1 + $0x70] sm:$0xff]   ;;  %v749_v8 = vld [vmem:[%s980_s1 + $0x68] sm:$0xff]  }
   0x2   :  { %v742_v1 = vld [vmem:[%s980_s1 + $0xf8] sm:$0xff]   ;;  %655 = vmatprep.subr.bf16.mxu0 %v741_v0  ;;  %v746_v5 = vld [vmem:[%s980_s1 + $0xf0] sm:$0xff]   ;;  %v750_v9 = vld [vmem:[%s980_s1 + $0xe8] sm:$0xff]  }
   0x3   :  { %v743_v2 = vld [vmem:[%s980_s1 + $0x38] sm:$0xff]   ;;  %683 = vmatprep.subr.bf16.mxu1 %v742_v1  ;;  %v747_v6 = vld [vmem:[%s980_s1 + $0x30] sm:$0xff]   ;;  %v751_v10 = vld [vmem:[%s980_s1 + $0x28] sm:$0xff]  }
   0x4   :  { %v744_v3 = vld [vmem:[%s980_s1 + $0xb8] sm:$0xff]   ;;  %656 = vmatpush3.bf16.msra.mxu0 %v743_v2  ;;  %v748_v7 = vld [vmem:[%s980_s1 + $0xb0] sm:$0xff]   ;;  %v752_v11 = vld [vmem:[%s980_s1 + $0xa8] sm:$0xff]  }
   0x5   :  { %684 = vmatpush3.bf16.msra.mxu1 %v744_v3  ;;  %657 = vmatprep.subr.bf16.mxu0 %v745_v4  ;;  %v753_v12 = vld [vmem:[%s980_s1 + $0x60] sm:$0xff]   ;;  %v757_v16 = vld [vmem:[%s980_s1 + $0x58] sm:$0xff]   ;;  %v761_v20 = vld [vmem:[%s980_s1 + $0x50] sm:$0xff]  }
   0x6   :  { %685 = vmatprep.subr.bf16.mxu1 %v746_v5  ;;  %v754_v13 = vld [vmem:[%s980_s1 + $0xe0] sm:$0xff]   ;;  %v758_v17 = vld [vmem:[%s980_s1 + $0xd8] sm:$0xff]   ;;  %v762_v21 = vld [vmem:[%s980_s1 + $0xd0] sm:$0xff]  }
   0x7   :  { %v755_v14 = vld [vmem:[%s980_s1 + $0x20] sm:$0xff]   ;;  %v759_v18 = vld [vmem:[%s980_s1 + $0x18] sm:$0xff]   ;;  %v763_v22 = vld [vmem:[%s980_s1 + $0x10] sm:$0xff]  }
   0x8   :  { %658 = vmatpush3.bf16.msra.mxu0 %v747_v6  ;;  %v756_v15 = vld [vmem:[%s980_s1 + $0xa0] sm:$0xff]   ;;  %v760_v19 = vld [vmem:[%s980_s1 + $0x98] sm:$0xff]   ;;  %v764_v23 = vld [vmem:[%s980_s1 + $0x90] sm:$0xff]  }
   0x9   :  { %686 = vmatpush3.bf16.msra.mxu1 %v748_v7  ;;  %659 = vmatprep.subr.bf16.mxu0 %v749_v8  ;;  %v765_v24 = vld [vmem:[%s980_s1 + $0x48] sm:$0xff]   ;;  %v769_v28 = vld [vmem:[%s980_s1 + $0x40] sm:$0xff]   ;;  %v779_v36 = vld [vmem:[%s980_s1 + $0x138] sm:$0xff]  }
   0xa   :  { %687 = vmatprep.subr.bf16.mxu1 %v750_v9  ;;  %v766_v25 = vld [vmem:[%s980_s1 + $0xc8] sm:$0xff]   ;;  %v770_v29 = vld [vmem:[%s980_s1 + $0xc0] sm:$0xff]   ;;  %v780_v37 = vld [vmem:[%s980_s1 + $0x130] sm:$0xff]  }
   0xb   :  { %v767_v26 = vld [vmem:[%s980_s1 + $0x8] sm:$0xff]   ;;  %v771_v30 = vld [vmem:[%s980_s1] sm:$0xff]   ;;  %v783_v45 = vld [vmem:[%s980_s1 + $0x118] sm:$0xff]  }
   0xc   :  { %660 = vmatpush3.bf16.msra.mxu0 %v751_v10  ;;  %v768_v27 = vld [vmem:[%s980_s1 + $0x88] sm:$0xff]   ;;  %v772_v31 = vld [vmem:[%s980_s1 + $0x80] sm:$0xff]   ;;  %v790_v46 = vld [vmem:[%s980_s1 + $0x110] sm:$0xff]  }
   0xd   :  { %688 = vmatpush3.bf16.msra.mxu1 %v752_v11  ;;  %661 = vmatprep.subr.bf16.mxu0 %v753_v12  ;;  %v773_v32 = vld [vmem:[%s981_s0] ss:$20 sps:$4 sm:$0xff]   ;;  %v775_v33 = vld [vmem:[%s981_s0 + $0x4] ss:$20 sps:$4 sm:$0xff]   ;;  %v776_v34 = vld [vmem:[%s981_s0 + $0x8] ss:$20 sps:$4 sm:$0xff]  }
   0xe   :  { %689 = vmatprep.subr.bf16.mxu1 %v754_v13  ;;  %v778_v35 = vld [vmem:[%s981_s0 + $0xc] ss:$20 sps:$4 sm:$0xff]   ;;  %443 = vmatprep.mubr.bf16.mxu0 %v775_v33  ;;  %v786_v40 = vld [vmem:[%s981_s0 + $0x34] ss:$20 sps:$4 sm:$0xff]   ;;  %v789_v42 = vld [vmem:[%s981_s0 + $0x30] ss:$20 sps:$4 sm:$0xff]  }
   0xf   :  { %492 = vmatprep.mubr.bf16.mxu1 %v778_v35  ;;  %v781_v38 = vld [vmem:[%s980_s1 + $0x128] sm:$0xff]   ;;  %v782_v43 = vld [vmem:[%s980_s1 + $0x120] sm:$0xff]  }
  0x10   :  { %662 = vmatpush3.bf16.msra.mxu0 %v755_v14  ;;  %v784_v39 = vld [vmem:[%s981_s0 + $0x2c] ss:$20 sps:$4 sm:$0xff]   ;;  %v788_v41 = vld [vmem:[%s981_s0 + $0x28] ss:$20 sps:$4 sm:$0xff]   ;;  %v793_v44 = vld [vmem:[%s981_s0 + $0x10] ss:$20 sps:$4 sm:$0xff]  }
  0x11   :  { %690 = vmatpush3.bf16.msra.mxu1 %v756_v15  ;;  %663 = vmatprep.subr.bf16.mxu0 %v757_v16  ;;  %v791_v47 = vld [vmem:[%s980_s1 + $0x108] sm:$0xff]   ;;  %v792_v48 = vld [vmem:[%s980_s1 + $0x100] sm:$0xff]  }
  0x12   :  { %691 = vmatprep.subr.bf16.mxu1 %v758_v17  ;;  %v794_v49 = vld [vmem:[%s981_s0 + $0x38] ss:$20 sps:$4 sm:$0xff]   ;;  %v654_v10 = vld [vmem:[%s982_s2] ss:$0 sm:$0xff] }
  0x14   :  { %664 = vmatpush3.bf16.msra.mxu0 %v759_v18 }
  0x15   :  { %692 = vmatpush3.bf16.msra.mxu1 %v760_v19  ;;  %665 = vmatprep.subr.bf16.mxu0 %v761_v20 }
  0x16   :  { %693 = vmatprep.subr.bf16.mxu1 %v762_v21 }
  0x18   :  { %666 = vmatpush3.bf16.msra.mxu0 %v763_v22 }
  0x19   :  { %694 = vmatpush3.bf16.msra.mxu1 %v764_v23  ;;  %667 = vmatprep.subr.bf16.mxu0 %v765_v24 }
  0x1a   :  { %695 = vmatprep.subr.bf16.mxu1 %v766_v25 }
  0x1c   :  { %668 = vmatpush3.bf16.msra.mxu0 %v767_v26 }
  0x1d   :  { %696 = vmatpush3.bf16.msra.mxu1 %v768_v27  ;;  %669 = vmatprep.subr.bf16.mxu0 %v769_v28 }
  0x1e   :  { %697 = vmatprep.subr.bf16.mxu1 %v770_v29 }
  0x20   :  { %670 = vmatpush3.bf16.msra.mxu0 %v771_v30 }
  0x21   :  { %698 = vmatpush3.bf16.msra.mxu1 %v772_v31  ;;  %721 = vmatprep.subr.bf16.mxu0 %v779_v36 }
  0x23   :  { %444 = vmatmul.mubr.bf16.vlgmr.msra.gmra.mxu0 %v773_v32 }
  0x24   :  { %493 = vmatmul.mubr.bf16.vlgmr.msra.gmra.mxu1 %v776_v34  ;;  %722 = vmatpush3.bf16.msra.mxu0 %v779_v36 }
  0x25   :  { %723 = vmatprep.subr.bf16.mxu0 %v780_v37  ;;  %451 = vmatprep.mubr.bf16.mxu0 %v784_v39 }
  0x26   :  { %500 = vmatprep.mubr.bf16.mxu1 %v786_v40 }
  0x28   :  { %724 = vmatpush3.bf16.msra.mxu0 %v780_v37 }
  0x29   :  { %725 = vmatprep.subr.bf16.mxu0 %v781_v38 }
  0x2b   :  { %452 = vmatmul.mubr.bf16.gmra.mxu0 %v788_v41 }
  0x2c   :  { %501 = vmatmul.mubr.bf16.gmra.mxu1 %v789_v42  ;;  %726 = vmatpush3.bf16.msra.mxu0 %v781_v38 }
  0x2d   :  { %727 = vmatprep.subr.bf16.mxu0 %v782_v43  ;;  %737 = vmatprep.mubr.bf16.mxu0 %v793_v44 }
  0x30   :  { %728 = vmatpush3.bf16.msra.mxu0 %v782_v43 }
  0x31   :  { %729 = vmatprep.subr.bf16.mxu0 %v783_v45 }
  0x34   :  { %730 = vmatpush3.bf16.msra.mxu0 %v783_v45 }
  0x35   :  { %731 = vmatprep.subr.bf16.mxu0 %v790_v46 }
  0x38   :  { %732 = vmatpush3.bf16.msra.mxu0 %v790_v46 }
  0x39   :  { %733 = vmatprep.subr.bf16.mxu0 %v791_v47 }
  0x3c   :  { %734 = vmatpush3.bf16.msra.mxu0 %v791_v47 }
  0x3d   :  { %735 = vmatprep.subr.bf16.mxu0 %v792_v48 }
  0x40   :  { %736 = vmatpush3.bf16.msra.mxu0 %v792_v48 }
  0x43   :  { %738 = vmatmul.mubr.bf16.vlgmr.msra.gmra.mxu0 %v794_v49 }
  0xe3   :  { %v671_v50 = vpop.f32.mrf.mxu0 }
  0xe4   :  { %v699_v51 = vpop.f32.mrf.mxu1 }
  0xe5   :  { %v672_v52 = vpop.f32.mrf.mxu0 }
  0xe6   :  { %v700_v53 = vpop.f32.mrf.mxu1  ;;  %v673_v4 = vadd.f32 %v672_v52, %v671_v50 }
  0xe7   :  { %v674_v54 = vpop.f32.mrf.mxu0  ;;  %v701_v5 = vadd.f32 %v700_v53, %v699_v51 }
  0xe8   :  { %v702_v55 = vpop.f32.mrf.mxu1 }
  0xe9   :  { %v675_v56 = vpop.f32.mrf.mxu0  ;;  %v495_v12 = vadd.f32 %v701_v5, %v673_v4 }
  0xea   :  { %v703_v57 = vpop.f32.mrf.mxu1  ;;  %v676_v13 = vadd.f32 %v675_v56, %v674_v54 }
  0xeb   :  { %v677_v58 = vpop.f32.mrf.mxu0  ;;  %v704_v14 = vadd.f32 %v703_v57, %v702_v55 }
  0xec   :  { %v705_v59 = vpop.f32.mrf.mxu1 }
  0xed   :  { %v678_v60 = vpop.f32.mrf.mxu0  ;;  %v498_v23 = vadd.f32 %v704_v14, %v676_v13 }
  0xee   :  { %v706_v61 = vpop.f32.mrf.mxu1  ;;  %v679_v0 = vadd.f32 %v678_v60, %v677_v58 }
  0xef   :  { %v680_v62 = vpop.f32.mrf.mxu0  ;;  %v707_v1 = vadd.f32 %v706_v61, %v705_v59 }
  0xf0   :  { %v708_v63 = vpop.f32.mrf.mxu1 }
  0xf1   :  { %v681_v2 = vpop.f32.mrf.mxu0  ;;  %v503_v8 = vadd.f32 %v707_v1, %v679_v0 }
  0xf2   :  { %v709_v3 = vpop.f32.mrf.mxu1  ;;  %v682_v6 = vadd.f32 %v681_v2, %v680_v62 }
  0xf3   :  { %v710_v7 = vadd.f32 %v709_v3, %v708_v63 }
  0xf5   :  { %v506_v18 = vadd.f32 %v710_v7, %v682_v6 }
 0x103   :  { %v739_v9 = vpop.f32.mrf.mxu0 }
 0x104   :  { %v552_v11 = vadd.f32 %v739_v9, %v503_v8 }
 0x105   :  { %v543_v15 = vpop.f32.mrf.mxu0 }
 0x106   :  { %v582_v16 = vadd.f32 %v654_v10, %v552_v11  ;;  %v544_v17 = vadd.f32 %v543_v15, %v495_v12 }
 0x107   :  { %v740_v19 = vpop.f32.mrf.mxu0 }
 0x108   :  { %vm586_vm0 = vcmp.ge.f32.partialorder %v582_v16, 0.0  ;;  %v590_v20 = vmul.f32 0.2, %v582_v16  ;;  %v580_v21 = vadd.f32 %v654_v10, %v544_v17  ;;  %v555_v22 = vadd.f32 %v740_v19, %v506_v18 }
 0x109   :  { %v546_v24 = vpop.f32.mrf.mxu0 }
 0x10a   :  { %v594_v25 = vsel %vm586_vm0, %v582_v16, %v590_v20  ;;  %vm584_vm1 = vcmp.ge.f32.partialorder %v580_v21, 0.0  ;;  %v588_v26 = vmul.f32 0.2, %v580_v21  ;;  %v583_v27 = vadd.f32 %v654_v10, %v555_v22 }
 0x10b   :  { %598 = vst [vmem:[%s983_s3 + $0x10] sm:$0xff] %v594_v25  ;;  %v547_v28 = vadd.f32 %v546_v24, %v498_v23 }
 0x10c   :  { %v592_v29 = vsel %vm584_vm1, %v580_v21, %v588_v26  ;;  %vm587_vm2 = vcmp.ge.f32.partialorder %v583_v27, 0.0  ;;  %v591_v30 = vmul.f32 0.2, %v583_v27 }
 0x10d   :  { %596 = vst [vmem:[%s983_s3] sm:$0xff] %v592_v29  ;;  %v581_v31 = vadd.f32 %v654_v10, %v547_v28 }
 0x10e   :  { %v595_v32 = vsel %vm587_vm2, %v583_v27, %v591_v30 }
 0x10f   :  { %599 = vst [vmem:[%s983_s3 + $0x18] sm:$0xff] %v595_v32  ;;  %vm585_vm3 = vcmp.ge.f32.partialorder %v581_v31, 0.0  ;;  %v589_v33 = vmul.f32 0.2, %v581_v31 }
 0x111   :  { %v593_v34 = vsel %vm585_vm3, %v581_v31, %v589_v33 }
 0x112   :  { %597 = vst [vmem:[%s983_s3 + $0x8] sm:$0xff] %v593_v34 }

// kernel: vae_forward.43
= control target key start
LH: loop header
LB: loop body
LE: loop exit
PB: predicated region body
PF: predicated region fallthrough
CT: control target
= control target key end

     0   :  { %s1189_s1 = inlined_call_operand.vmem [shape: bf16[384,128], index: 1, kind: input, shape index: {}]   ;;  %s1190_s0 = inlined_call_operand.vmem [shape: bf16[128,384], index: 0, kind: input, shape index: {}]   ;;  %s1191_s2 = inlined_call_operand.vmem [shape: f32[1,128], index: 2, kind: input, shape index: {}]   ;;  %s1192_s3 = inlined_call_operand.vmem [shape: f32[128,128], index: 3, kind: output, shape index: {}]  }
   0x1   :  { %v900_v0 = vld [vmem:[%s1189_s1 + $0x78] sm:$0xff]   ;;  %v903_v3 = vld [vmem:[%s1189_s1 + $0x70] sm:$0xff]   ;;  %v906_v6 = vld [vmem:[%s1189_s1 + $0x68] sm:$0xff]  }
   0x2   :  { %v901_v1 = vld [vmem:[%s1189_s1 + $0x38] sm:$0xff]   ;;  %788 = vmatprep.subr.bf16.mxu0 %v900_v0  ;;  %v904_v4 = vld [vmem:[%s1189_s1 + $0x30] sm:$0xff]   ;;  %v907_v7 = vld [vmem:[%s1189_s1 + $0x28] sm:$0xff]  }
   0x3   :  { %v902_v2 = vld [vmem:[%s1189_s1 + $0xb8] sm:$0xff]   ;;  %789 = vmatpush3.bf16.msra.mxu0 %v901_v1  ;;  %v905_v5 = vld [vmem:[%s1189_s1 + $0xb0] sm:$0xff]   ;;  %v908_v8 = vld [vmem:[%s1189_s1 + $0xa8] sm:$0xff]  }
   0x4   :  { %868 = vmatprep.subr.bf16.mxu1 %v902_v2  ;;  %790 = vmatprep.subr.bf16.mxu0 %v903_v3  ;;  %v909_v9 = vld [vmem:[%s1189_s1 + $0x60] sm:$0xff]   ;;  %v912_v12 = vld [vmem:[%s1189_s1 + $0x58] sm:$0xff]   ;;  %v915_v15 = vld [vmem:[%s1189_s1 + $0x50] sm:$0xff]  }
   0x5   :  { %869 = vmatpush3.bf16.msra.mxu1 %v902_v2  ;;  %v910_v10 = vld [vmem:[%s1189_s1 + $0x20] sm:$0xff]   ;;  %v914_v13 = vld [vmem:[%s1189_s1 + $0x98] sm:$0xff]   ;;  %v917_v16 = vld [vmem:[%s1189_s1 + $0x90] sm:$0xff]  }
   0x6   :  { %870 = vmatprep.subr.bf16.mxu1 %v905_v5  ;;  %v911_v11 = vld [vmem:[%s1189_s1 + $0xa0] sm:$0xff]   ;;  %v913_v14 = vld [vmem:[%s1189_s1 + $0x18] sm:$0xff]   ;;  %v916_v17 = vld [vmem:[%s1189_s1 + $0x10] sm:$0xff]  }
   0x7   :  { %791 = vmatpush3.bf16.msra.mxu0 %v904_v4  ;;  %v918_v18 = vld [vmem:[%s1189_s1 + $0x48] sm:$0xff]   ;;  %v921_v21 = vld [vmem:[%s1189_s1 + $0x40] sm:$0xff]   ;;  %v936_v32 = vld [vmem:[%s1190_s0 + $0x50] ss:$12 sps:$4 sm:$0xff]  }
   0x8   :  { %792 = vmatprep.subr.bf16.mxu0 %v906_v6  ;;  %v919_v19 = vld [vmem:[%s1189_s1 + $0x8] sm:$0xff]   ;;  %v923_v22 = vld [vmem:[%s1189_s1 + $0x80] sm:$0xff]   ;;  %v934_v34 = vld [vmem:[%s1190_s0 + $0x30] ss:$12 sps:$4 sm:$0xff]  }
   0x9   :  { %871 = vmatpush3.bf16.msra.mxu1 %v905_v5  ;;  %v920_v20 = vld [vmem:[%s1189_s1 + $0x88] sm:$0xff]   ;;  %v926_v23 = vld [vmem:[%s1190_s0 + $0x4] ss:$12 sps:$4 sm:$0xff]   ;;  %v932_v31 = vld [vmem:[%s1190_s0 + $0x34] ss:$12 sps:$4 sm:$0xff]  }
   0xa   :  { %872 = vmatprep.subr.bf16.mxu1 %v908_v8  ;;  %v927_v24 = vld [vmem:[%s1190_s0 + $0x8] ss:$12 sps:$4 sm:$0xff]   ;;  %v922_v25 = vld [vmem:[%s1189_s1] sm:$0xff]   ;;  %435 = vmatprep.mubr.bf16.mxu0 %v926_v23  ;;  %v937_v35 = vld [vmem:[%s1190_s0 + $0x4c] ss:$12 sps:$4 sm:$0xff]  }
   0xb   :  { %793 = vmatpush3.bf16.msra.mxu0 %v907_v7  ;;  %884 = vmatprep.mubr.bf16.mxu1 %v927_v24  ;;  %v924_v26 = vld [vmem:[%s1190_s0] ss:$12 sps:$4 sm:$0xff]   ;;  %v929_v27 = vld [vmem:[%s1190_s0 + $0x1c] ss:$12 sps:$4 sm:$0xff]   ;;  %v935_v29 = vld [vmem:[%s1190_s0 + $0x38] ss:$12 sps:$4 sm:$0xff]  }
   0xc   :  { %794 = vmatprep.subr.bf16.mxu0 %v909_v9  ;;  %v928_v28 = vld [vmem:[%s1190_s0 + $0x20] ss:$12 sps:$4 sm:$0xff]   ;;  %v931_v30 = vld [vmem:[%s1190_s0 + $0x18] ss:$12 sps:$4 sm:$0xff]   ;;  %v943_v33 = vld [vmem:[%s1190_s0 + $0x68] ss:$12 sps:$4 sm:$0xff]  }
   0xd   :  { %873 = vmatpush3.bf16.msra.mxu1 %v908_v8  ;;  %v944_v36 = vld [vmem:[%s1190_s0 + $0x80] ss:$12 sps:$4 sm:$0xff]   ;;  %v951_v37 = vld [vmem:[%s1190_s0 + $0x98] ss:$12 sps:$4 sm:$0xff]   ;;  %v939_v38 = vld [vmem:[%s1190_s0 + $0x48] ss:$12 sps:$4 sm:$0xff]  }
   0xe   :  { %874 = vmatprep.subr.bf16.mxu1 %v911_v11  ;;  %v940_v39 = vld [vmem:[%s1190_s0 + $0x64] ss:$12 sps:$4 sm:$0xff]   ;;  %v942_v41 = vld [vmem:[%s1190_s0 + $0x60] ss:$12 sps:$4 sm:$0xff]   ;;  %v945_v42 = vld [vmem:[%s1190_s0 + $0x7c] ss:$12 sps:$4 sm:$0xff]  }
   0xf   :  { %795 = vmatpush3.bf16.msra.mxu0 %v910_v10  ;;  %v952_v40 = vld [vmem:[%s1190_s0 + $0xb0] ss:$12 sps:$4 sm:$0xff]   ;;  %v947_v43 = vld [vmem:[%s1190_s0 + $0x78] ss:$12 sps:$4 sm:$0xff]   ;;  %v948_v44 = vld [vmem:[%s1190_s0 + $0x94] ss:$12 sps:$4 sm:$0xff]  }
  0x10   :  { %796 = vmatprep.subr.bf16.mxu0 %v912_v12  ;;  %v950_v45 = vld [vmem:[%s1190_s0 + $0x90] ss:$12 sps:$4 sm:$0xff]   ;;  %v953_v46 = vld [vmem:[%s1190_s0 + $0xac] ss:$12 sps:$4 sm:$0xff]   ;;  %v955_v47 = vld [vmem:[%s1190_s0 + $0xa8] ss:$12 sps:$4 sm:$0xff]  }
  0x11   :  { %875 = vmatpush3.bf16.msra.mxu1 %v911_v11  ;;  %v1123_v54 = vld [vmem:[%s1191_s2] ss:$0 sm:$0xff] }
  0x12   :  { %876 = vmatprep.subr.bf16.mxu1 %v914_v13 }
  0x13   :  { %797 = vmatpush3.bf16.msra.mxu0 %v913_v14 }
  0x14   :  { %798 = vmatprep.subr.bf16.mxu0 %v915_v15 }
  0x15   :  { %877 = vmatpush3.bf16.msra.mxu1 %v914_v13 }
  0x16   :  { %878 = vmatprep.subr.bf16.mxu1 %v917_v16 }
  0x17   :  { %799 = vmatpush3.bf16.msra.mxu0 %v916_v17 }
  0x18   :  { %800 = vmatprep.subr.bf16.mxu0 %v918_v18 }
  0x19   :  { %879 = vmatpush3.bf16.msra.mxu1 %v917_v16 }
  0x1a   :  { %880 = vmatprep.subr.bf16.mxu1 %v920_v20 }
  0x1b   :  { %801 = vmatpush3.bf16.msra.mxu0 %v919_v19 }
  0x1c   :  { %802 = vmatprep.subr.bf16.mxu0 %v921_v21 }
  0x1d   :  { %881 = vmatpush3.bf16.msra.mxu1 %v920_v20 }
  0x1e   :  { %882 = vmatprep.subr.bf16.mxu1 %v923_v22 }
  0x1f   :  { %803 = vmatpush3.bf16.msra.mxu0 %v922_v25 }
  0x21   :  { %883 = vmatpush3.bf16.msra.mxu1 %v923_v22 }
  0x22   :  { %436 = vmatmul.mubr.bf16.vlgmr.msra.gmra.mxu0 %v924_v26 }
  0x23   :  { %443 = vmatprep.mubr.bf16.mxu0 %v929_v27 }
  0x24   :  { %885 = vmatmul.mubr.bf16.vlgmr.msra.gmra.mxu1 %v928_v28 }
  0x25   :  { %888 = vmatprep.mubr.bf16.mxu1 %v935_v29 }
  0x2a   :  { %444 = vmatmul.mubr.bf16.gmra.mxu0 %v931_v30 }
  0x2b   :  { %451 = vmatprep.mubr.bf16.mxu0 %v932_v31 }
  0x2c   :  { %889 = vmatmul.mubr.bf16.gmra.mxu1 %v936_v32 }
  0x2d   :  { %892 = vmatprep.mubr.bf16.mxu1 %v943_v33 }
  0x32   :  { %452 = vmatmul.mubr.bf16.gmra.mxu0 %v934_v34 }
  0x33   :  { %459 = vmatprep.mubr.bf16.mxu0 %v937_v35 }
  0x34   :  { %893 = vmatmul.mubr.bf16.gmra.mxu1 %v944_v36 }
  0x35   :  { %896 = vmatprep.mubr.bf16.mxu1 %v951_v37 }
  0x3a   :  { %460 = vmatmul.mubr.bf16.gmra.mxu0 %v939_v38 }
  0x3b   :  { %467 = vmatprep.mubr.bf16.mxu0 %v940_v39 }
  0x3c   :  { %897 = vmatmul.mubr.bf16.gmra.mxu1 %v952_v40 }
  0x42   :  { %468 = vmatmul.mubr.bf16.gmra.mxu0 %v942_v41 }
  0x43   :  { %475 = vmatprep.mubr.bf16.mxu0 %v945_v42 }
  0x4a   :  { %476 = vmatmul.mubr.bf16.gmra.mxu0 %v947_v43 }
  0x4b   :  { %483 = vmatprep.mubr.bf16.mxu0 %v948_v44 }
  0x52   :  { %484 = vmatmul.mubr.bf16.gmra.mxu0 %v950_v45 }
  0x53   :  { %491 = vmatprep.mubr.bf16.mxu0 %v953_v46 }
  0x5a   :  { %492 = vmatmul.mubr.bf16.gmra.mxu0 %v955_v47 }
  0xe2   :  { %v804_v48 = vpop.f32.mrf.mxu0 }
  0xe4   :  { %v805_v49 = vpop.f32.mrf.mxu0  ;;  %v886_v50 = vpop.f32.mrf.mxu1 }
  0xe5   :  { %v806_v51 = vadd.f32 %v805_v49, %v804_v48 }
  0xe6   :  { %v807_v52 = vpop.f32.mrf.mxu0  ;;  %v534_v53 = vpop.f32.mrf.mxu1 }
  0xe7   :  { %v535_v55 = vadd.f32 %v806_v51, %v534_v53 }
  0xe8   :  { %v808_v56 = vpop.f32.mrf.mxu0  ;;  %v887_v57 = vpop.f32.mrf.mxu1 }
  0xe9   :  { %v655_v58 = vadd.f32 %v1123_v54, %v535_v55  ;;  %v809_v59 = vadd.f32 %v808_v56, %v807_v52 }
  0xea   :  { %v810_v60 = vpop.f32.mrf.mxu0  ;;  %v537_v61 = vpop.f32.mrf.mxu1 }
  0xeb   :  { %vm671_vm0 = vcmp.ge.f32.partialorder %v655_v58, 0.0  ;;  %v687_v62 = vmul.f32 0.2, %v655_v58  ;;  %v538_v63 = vadd.f32 %v809_v59, %v537_v61 }
  0xec   :  { %v811_v0 = vpop.f32.mrf.mxu0  ;;  %v890_v1 = vpop.f32.mrf.mxu1 }
  0xed   :  { %v703_v2 = vsel %vm671_vm0, %v655_v58, %v687_v62  ;;  %v656_v3 = vadd.f32 %v1123_v54, %v538_v63  ;;  %v812_v4 = vadd.f32 %v811_v0, %v810_v60 }
  0xee   :  { %719 = vst [vmem:[%s1192_s3] sm:$0xff] %v703_v2  ;;  %v813_v5 = vpop.f32.mrf.mxu0  ;;  %v550_v9 = vpop.f32.mrf.mxu1 }
  0xef   :  { %vm672_vm1 = vcmp.ge.f32.partialorder %v656_v3, 0.0  ;;  %v688_v6 = vmul.f32 0.2, %v656_v3  ;;  %v543_v7 = vadd.f32 %v886_v50, %v812_v4 }
  0xf0   :  { %v814_v8 = vpop.f32.mrf.mxu0  ;;  %v891_v17 = vpop.f32.mrf.mxu1 }
  0xf1   :  { %v704_v10 = vsel %vm672_vm1, %v656_v3, %v688_v6  ;;  %v657_v11 = vadd.f32 %v1123_v54, %v543_v7  ;;  %v815_v12 = vadd.f32 %v814_v8, %v813_v5 }
  0xf2   :  { %720 = vst [vmem:[%s1192_s3 + $0x8] sm:$0xff] %v704_v10  ;;  %v816_v13 = vpop.f32.mrf.mxu0  ;;  %v553_v25 = vpop.f32.mrf.mxu1 }
  0xf3   :  { %vm673_vm2 = vcmp.ge.f32.partialorder %v657_v11, 0.0  ;;  %v689_v14 = vmul.f32 0.2, %v657_v11  ;;  %v546_v15 = vadd.f32 %v887_v57, %v815_v12 }
  0xf4   :  { %v817_v16 = vpop.f32.mrf.mxu0  ;;  %v894_v33 = vpop.f32.mrf.mxu1 }
  0xf5   :  { %v705_v18 = vsel %vm673_vm2, %v657_v11, %v689_v14  ;;  %v658_v19 = vadd.f32 %v1123_v54, %v546_v15  ;;  %v818_v20 = vadd.f32 %v817_v16, %v816_v13 }
  0xf6   :  { %721 = vst [vmem:[%s1192_s3 + $0x10] sm:$0xff] %v705_v18  ;;  %v819_v21 = vpop.f32.mrf.mxu0  ;;  %v566_v41 = vpop.f32.mrf.mxu1 }
  0xf7   :  { %vm674_vm3 = vcmp.ge.f32.partialorder %v658_v19, 0.0  ;;  %v690_v22 = vmul.f32 0.2, %v658_v19  ;;  %v551_v23 = vadd.f32 %v818_v20, %v550_v9 }
  0xf8   :  { %v820_v24 = vpop.f32.mrf.mxu0  ;;  %v895_v49 = vpop.f32.mrf.mxu1 }
  0xf9   :  { %v706_v26 = vsel %vm674_vm3, %v658_v19, %v690_v22  ;;  %v659_v27 = vadd.f32 %v1123_v54, %v551_v23  ;;  %v821_v28 = vadd.f32 %v820_v24, %v819_v21 }
  0xfa   :  { %722 = vst [vmem:[%s1192_s3 + $0x18] sm:$0xff] %v706_v26  ;;  %v822_v29 = vpop.f32.mrf.mxu0  ;;  %v569_v58 = vpop.f32.mrf.mxu1 }
  0xfb   :  { %vm675_vm4 = vcmp.ge.f32.partialorder %v659_v27, 0.0  ;;  %v691_v30 = vmul.f32 0.2, %v659_v27  ;;  %v554_v31 = vadd.f32 %v821_v28, %v553_v25 }
  0xfc   :  { %v823_v32 = vpop.f32.mrf.mxu0  ;;  %v898_v2 = vpop.f32.mrf.mxu1 }
  0xfd   :  { %v707_v34 = vsel %vm675_vm4, %v659_v27, %v691_v30  ;;  %v660_v35 = vadd.f32 %v1123_v54, %v554_v31  ;;  %v824_v36 = vadd.f32 %v823_v32, %v822_v29 }
  0xfe   :  { %723 = vst [vmem:[%s1192_s3 + $0x20] sm:$0xff] %v707_v34  ;;  %v825_v37 = vpop.f32.mrf.mxu0  ;;  %v582_v10 = vpop.f32.mrf.mxu1 }
  0xff   :  { %vm676_vm5 = vcmp.ge.f32.partialorder %v660_v35, 0.0  ;;  %v692_v38 = vmul.f32 0.2, %v660_v35  ;;  %v559_v39 = vadd.f32 %v890_v1, %v824_v36 }
 0x100   :  { %v826_v40 = vpop.f32.mrf.mxu0  ;;  %v899_v18 = vpop.f32.mrf.mxu1 }
 0x101   :  { %v708_v42 = vsel %vm676_vm5, %v660_v35, %v692_v38  ;;  %v661_v43 = vadd.f32 %v1123_v54, %v559_v39  ;;  %v827_v44 = vadd.f32 %v826_v40, %v825_v37 }
 0x102   :  { %724 = vst [vmem:[%s1192_s3 + $0x28] sm:$0xff] %v708_v42  ;;  %v828_v45 = vpop.f32.mrf.mxu0  ;;  %v585_v26 = vpop.f32.mrf.mxu1 }
 0x103   :  { %vm677_vm6 = vcmp.ge.f32.partialorder %v661_v43, 0.0  ;;  %v693_v46 = vmul.f32 0.2, %v661_v43  ;;  %v562_v47 = vadd.f32 %v891_v17, %v827_v44 }
 0x104   :  { %v829_v48 = vpop.f32.mrf.mxu0 }
 0x105   :  { %v709_v50 = vsel %vm677_vm6, %v661_v43, %v693_v46  ;;  %v662_v51 = vadd.f32 %v1123_v54, %v562_v47  ;;  %v830_v52 = vadd.f32 %v829_v48, %v828_v45 }
 0x106   :  { %725 = vst [vmem:[%s1192_s3 + $0x30] sm:$0xff] %v709_v50  ;;  %v831_v53 = vpop.f32.mrf.mxu0 }
 0x107   :  { %vm678_vm7 = vcmp.ge.f32.partialorder %v662_v51, 0.0  ;;  %v694_v55 = vmul.f32 0.2, %v662_v51  ;;  %v567_v56 = vadd.f32 %v830_v52, %v566_v41 }
 0x108   :  { %v832_v57 = vpop.f32.mrf.mxu0 }
 0x109   :  { %v710_v59 = vsel %vm678_vm7, %v662_v51, %v694_v55  ;;  %v663_v60 = vadd.f32 %v1123_v54, %v567_v56  ;;  %v833_v61 = vadd.f32 %v832_v57, %v831_v53 }
 0x10a   :  { %726 = vst [vmem:[%s1192_s3 + $0x38] sm:$0xff] %v710_v59  ;;  %v834_v62 = vpop.f32.mrf.mxu0 }
 0x10b   :  { %vm679_vm8 = vcmp.ge.f32.partialorder %v663_v60, 0.0  ;;  %v695_v63 = vmul.f32 0.2, %v663_v60  ;;  %v570_v0 = vadd.f32 %v833_v61, %v569_v58 }
 0x10c   :  { %v835_v1 = vpop.f32.mrf.mxu0 }
 0x10d   :  { %v711_v3 = vsel %vm679_vm8, %v663_v60, %v695_v63  ;;  %v664_v4 = vadd.f32 %v1123_v54, %v570_v0  ;;  %v836_v5 = vadd.f32 %v835_v1, %v834_v62 }
 0x10e   :  { %727 = vst [vmem:[%s1192_s3 + $0x40] sm:$0xff] %v711_v3  ;;  %v837_v6 = vpop.f32.mrf.mxu0 }
 0x10f   :  { %vm680_vm9 = vcmp.ge.f32.partialorder %v664_v4, 0.0  ;;  %v696_v7 = vmul.f32 0.2, %v664_v4  ;;  %v575_v8 = vadd.f32 %v894_v33, %v836_v5 }
 0x110   :  { %v838_v9 = vpop.f32.mrf.mxu0 }
 0x111   :  { %v712_v11 = vsel %vm680_vm9, %v664_v4, %v696_v7  ;;  %v665_v12 = vadd.f32 %v1123_v54, %v575_v8  ;;  %v839_v13 = vadd.f32 %v838_v9, %v837_v6 }
 0x112   :  { %728 = vst [vmem:[%s1192_s3 + $0x48] sm:$0xff] %v712_v11  ;;  %v840_v14 = vpop.f32.mrf.mxu0 }
 0x113   :  { %vm681_vm10 = vcmp.ge.f32.partialorder %v665_v12, 0.0  ;;  %v697_v15 = vmul.f32 0.2, %v665_v12  ;;  %v578_v16 = vadd.f32 %v895_v49, %v839_v13 }
 0x114   :  { %v841_v17 = vpop.f32.mrf.mxu0 }
 0x115   :  { %v713_v19 = vsel %vm681_vm10, %v665_v12, %v697_v15  ;;  %v666_v20 = vadd.f32 %v1123_v54, %v578_v16  ;;  %v842_v21 = vadd.f32 %v841_v17, %v840_v14 }
 0x116   :  { %729 = vst [vmem:[%s1192_s3 + $0x50] sm:$0xff] %v713_v19  ;;  %v843_v22 = vpop.f32.mrf.mxu0 }
 0x117   :  { %vm682_vm11 = vcmp.ge.f32.partialorder %v666_v20, 0.0  ;;  %v698_v23 = vmul.f32 0.2, %v666_v20  ;;  %v583_v24 = vadd.f32 %v842_v21, %v582_v10 }
 0x118   :  { %v844_v25 = vpop.f32.mrf.mxu0 }
 0x119   :  { %v714_v27 = vsel %vm682_vm11, %v666_v20, %v698_v23  ;;  %v667_v28 = vadd.f32 %v1123_v54, %v583_v24  ;;  %v845_v29 = vadd.f32 %v844_v25, %v843_v22 }
 0x11a   :  { %730 = vst [vmem:[%s1192_s3 + $0x58] sm:$0xff] %v714_v27  ;;  %v846_v30 = vpop.f32.mrf.mxu0 }
 0x11b   :  { %vm683_vm12 = vcmp.ge.f32.partialorder %v667_v28, 0.0  ;;  %v699_v31 = vmul.f32 0.2, %v667_v28  ;;  %v586_v32 = vadd.f32 %v845_v29, %v585_v26 }
 0x11c   :  { %v847_v33 = vpop.f32.mrf.mxu0 }
 0x11d   :  { %v715_v34 = vsel %vm683_vm12, %v667_v28, %v699_v31  ;;  %v668_v35 = vadd.f32 %v1123_v54, %v586_v32  ;;  %v848_v36 = vadd.f32 %v847_v33, %v846_v30 }
 0x11e   :  { %731 = vst [vmem:[%s1192_s3 + $0x60] sm:$0xff] %v715_v34  ;;  %v849_v37 = vpop.f32.mrf.mxu0 }
 0x11f   :  { %vm684_vm13 = vcmp.ge.f32.partialorder %v668_v35, 0.0  ;;  %v700_v38 = vmul.f32 0.2, %v668_v35  ;;  %v591_v39 = vadd.f32 %v898_v2, %v848_v36 }
 0x120   :  { %v850_v40 = vpop.f32.mrf.mxu0 }
 0x121   :  { %v716_v41 = vsel %vm684_vm13, %v668_v35, %v700_v38  ;;  %v669_v42 = vadd.f32 %v1123_v54, %v591_v39  ;;  %v851_v43 = vadd.f32 %v850_v40, %v849_v37 }
 0x122   :  { %732 = vst [vmem:[%s1192_s3 + $0x68] sm:$0xff] %v716_v41 }
 0x123   :  { %vm685_vm14 = vcmp.ge.f32.partialorder %v669_v42, 0.0  ;;  %v701_v44 = vmul.f32 0.2, %v669_v42  ;;  %v594_v45 = vadd.f32 %v899_v18, %v851_v43 }
 0x125   :  { %v717_v46 = vsel %vm685_vm14, %v669_v42, %v701_v44  ;;  %v670_v47 = vadd.f32 %v1123_v54, %v594_v45 }
 0x126   :  { %733 = vst [vmem:[%s1192_s3 + $0x70] sm:$0xff] %v717_v46 }
 0x127   :  { %vm686_vm15 = vcmp.ge.f32.partialorder %v670_v47, 0.0  ;;  %v702_v48 = vmul.f32 0.2, %v670_v47 }
 0x129   :  { %v718_v49 = vsel %vm686_vm15, %v670_v47, %v702_v48 }
 0x12a   :  { %734 = vst [vmem:[%s1192_s3 + $0x78] sm:$0xff] %v718_v49 }

// kernel: vae_forward.46
= control target key start
LH: loop header
LB: loop body
LE: loop exit
PB: predicated region body
PF: predicated region fallthrough
CT: control target
= control target key end

     0   :  { %s1521_s12 = smov 0   ;;  %s1523_s13 = smov 0   ;;  %s1714_s0 = inlined_call_operand.vmem [shape: bf16[512,256], index: 0, kind: input, shape index: {}]   ;;  %s1715_s1 = inlined_call_operand.vmem [shape: bf16[256,128], index: 1, kind: input, shape index: {}]   ;;  %s1716_s2 = inlined_call_operand.vmem [shape: f32[1,128], index: 2, kind: input, shape index: {}]   ;;  %s1717_s3 = inlined_call_operand.vmem [shape: f32[512,128], index: 3, kind: output, shape index: {}]  }
   0x1   :  { %s1525_s14 = smov 0  }
   0x2 LB: > { %s32_s15 = sadd.s32 1, %s1495_s13  ;;  %p1203_p0 = scmp.ge.s32.totalorder %s1499_s14, 1  ;;  %s1499_s14 = sphi %s1525_s14, %s13_s14   ;;  %s1495_s13 = sphi %s1523_s13, %s1719_s13   ;;  %s1491_s12 = sphi %s1521_s12, %s1718_s12  }
   0x3   : > { %p34_p1 = scmp.ge.s32.totalorder %s32_s15, 2  ;;  %p191_p2 = scmp.lt.s32.totalorder %s1499_s14, 3 }
   0x5   : > { %s1721_s15 = smov (%p34_p1, %s32_s15), 0  ;;  %p192_p3 = pnand %p1203_p0, %p191_p2 }
   0x6   : > { %s1204_s18 = sshll.u32 (!%p192_p3), %s1491_s12, 5 }
   0x7   : > { %195 = sbr.rel (%p192_p3) target bundleno = 309 (0x135), region = 32  ;;  %p236_p4 = scmp.lt.s32.totalorder (!%p192_p3), %s1204_s18, 63 }
   0xc   : > { %v1413_v0 = vld [vmem:[%s1715_s1 + $0x78] sm:$0xff]   ;;  %v1415_v2 = vld [vmem:[%s1715_s1 + $0x70] sm:$0xff]   ;;  %v1417_v4 = vld [vmem:[%s1715_s1 + $0x68] sm:$0xff]   ;;  %s1723_s18 = smov (!%p236_p4, %s1204_s18), 63 }
   0xd   : > { %v1414_v1 = vld [vmem:[%s1715_s1 + $0x38] sm:$0xff]   ;;  %1261 = vmatprep.subr.bf16.mxu0 %v1413_v0  ;;  %1373 = vmatprep.subr.bf16.mxu1 %v1413_v0  ;;  %v1416_v3 = vld [vmem:[%s1715_s1 + $0x30] sm:$0xff]   ;;  %v1418_v5 = vld [vmem:[%s1715_s1 + $0x28] sm:$0xff]   ;;  %s1260_s6 = sshll.u32 %s1723_s18, 3 }
   0xe   : > { %1262 = vmatpush3.bf16.msra.mxu0 %v1414_v1  ;;  %1381 = vmatpush3.bf16.msra.mxu1 %v1414_v1  ;;  %v1419_v6 = vld [vmem:[%s1715_s1 + $0x60] sm:$0xff]   ;;  %v1421_v8 = vld [vmem:[%s1715_s1 + $0x58] sm:$0xff]   ;;  %s1574_s11 = scalar_lea.vmem %s1714_s0, %s1260_s6  ;;  %v1423_v10 = vld [vmem:[%s1715_s1 + $0x50] sm:$0xff]   ;;  %s1641_s8 = scalar_lea.vmem %s1717_s3, %s1260_s6 }
   0xf   : > { %1263 = vmatprep.subr.bf16.mxu0 %v1415_v2  ;;  %1374 = vmatprep.subr.bf16.mxu1 %v1415_v2  ;;  %v1420_v7 = vld [vmem:[%s1715_s1 + $0x20] sm:$0xff]   ;;  %v1422_v9 = vld [vmem:[%s1715_s1 + $0x18] sm:$0xff]   ;;  %v1424_v13 = vld [vmem:[%s1715_s1 + $0x10] sm:$0xff]  }
  0x10   : > { %v1431_v11 = vld [vmem:[%s1574_s11 + $0x4] ss:$8 sps:$4 sm:$0xff]   ;;  %v1429_v18 = vld [vmem:[%s1574_s11] ss:$8 sps:$4 sm:$0xff]   ;;  %v1435_v20 = vld [vmem:[%s1574_s11 + $0x14] ss:$8 sps:$4 sm:$0xff]  }
  0x11   : > { %v1434_v12 = vld [vmem:[%s1574_s11 + $0x84] ss:$8 sps:$4 sm:$0xff]   ;;  %688 = vmatprep.mubr.bf16.mxu0 %v1431_v11  ;;  %v1432_v19 = vld [vmem:[%s1574_s11 + $0x80] ss:$8 sps:$4 sm:$0xff]   ;;  %v1437_v21 = vld [vmem:[%s1574_s11 + $0x94] ss:$8 sps:$4 sm:$0xff]  }
  0x12   : > { %1264 = vmatpush3.bf16.msra.mxu0 %v1416_v3  ;;  %1382 = vmatpush3.bf16.msra.mxu1 %v1416_v3  ;;  %v1425_v14 = vld [vmem:[%s1715_s1 + $0x48] sm:$0xff]   ;;  %v1427_v16 = vld [vmem:[%s1715_s1 + $0x40] sm:$0xff]   ;;  %v1439_v22 = vld [vmem:[%s1574_s11 + $0x10] ss:$8 sps:$4 sm:$0xff]  }
  0x13   : > { %1265 = vmatprep.subr.bf16.mxu0 %v1417_v4  ;;  %1375 = vmatprep.subr.bf16.mxu1 %v1417_v4  ;;  %v1426_v15 = vld [vmem:[%s1715_s1 + $0x8] sm:$0xff]   ;;  %v1428_v17 = vld [vmem:[%s1715_s1] sm:$0xff]   ;;  %v1440_v23 = vld [vmem:[%s1574_s11 + $0x90] ss:$8 sps:$4 sm:$0xff]  }
  0x14   : > { %752 = vmatprep.mubr.bf16.mxu1 %v1434_v12  ;;  %v1441_v24 = vld [vmem:[%s1574_s11 + $0x24] ss:$8 sps:$4 sm:$0xff]   ;;  %v1445_v26 = vld [vmem:[%s1574_s11 + $0x20] ss:$8 sps:$4 sm:$0xff]   ;;  %v1447_v28 = vld [vmem:[%s1574_s11 + $0x34] ss:$8 sps:$4 sm:$0xff]  }
  0x15   : > { %v1443_v25 = vld [vmem:[%s1574_s11 + $0xa4] ss:$8 sps:$4 sm:$0xff]   ;;  %v1446_v27 = vld [vmem:[%s1574_s11 + $0xa0] ss:$8 sps:$4 sm:$0xff]   ;;  %v1449_v29 = vld [vmem:[%s1574_s11 + $0xb4] ss:$8 sps:$4 sm:$0xff]  }
  0x16   : > { %1266 = vmatpush3.bf16.msra.mxu0 %v1418_v5  ;;  %1383 = vmatpush3.bf16.msra.mxu1 %v1418_v5  ;;  %v1451_v30 = vld [vmem:[%s1574_s11 + $0x30] ss:$8 sps:$4 sm:$0xff]   ;;  %v1453_v32 = vld [vmem:[%s1574_s11 + $0x44] ss:$8 sps:$4 sm:$0xff]   ;;  %v1457_v34 = vld [vmem:[%s1574_s11 + $0x40] ss:$8 sps:$4 sm:$0xff]  }
  0x17   : > { %1267 = vmatprep.subr.bf16.mxu0 %v1419_v6  ;;  %1376 = vmatprep.subr.bf16.mxu1 %v1419_v6  ;;  %v1452_v31 = vld [vmem:[%s1574_s11 + $0xb0] ss:$8 sps:$4 sm:$0xff]   ;;  %v1455_v33 = vld [vmem:[%s1574_s11 + $0xc4] ss:$8 sps:$4 sm:$0xff]   ;;  %v1458_v35 = vld [vmem:[%s1574_s11 + $0xc0] ss:$8 sps:$4 sm:$0xff]  }
  0x18   : > { %v1459_v36 = vld [vmem:[%s1574_s11 + $0x54] ss:$8 sps:$4 sm:$0xff]   ;;  %v1463_v38 = vld [vmem:[%s1574_s11 + $0x50] ss:$8 sps:$4 sm:$0xff]   ;;  %v1465_v40 = vld [vmem:[%s1574_s11 + $0x64] ss:$8 sps:$4 sm:$0xff]  }
  0x19   : > { %v1461_v37 = vld [vmem:[%s1574_s11 + $0xd4] ss:$8 sps:$4 sm:$0xff]   ;;  %v1464_v39 = vld [vmem:[%s1574_s11 + $0xd0] ss:$8 sps:$4 sm:$0xff]   ;;  %v1467_v41 = vld [vmem:[%s1574_s11 + $0xe4] ss:$8 sps:$4 sm:$0xff]  }
  0x1a   : > { %1268 = vmatpush3.bf16.msra.mxu0 %v1420_v7  ;;  %1384 = vmatpush3.bf16.msra.mxu1 %v1420_v7  ;;  %v1469_v42 = vld [vmem:[%s1574_s11 + $0x60] ss:$8 sps:$4 sm:$0xff]   ;;  %v1471_v44 = vld [vmem:[%s1574_s11 + $0x74] ss:$8 sps:$4 sm:$0xff]   ;;  %v1475_v46 = vld [vmem:[%s1574_s11 + $0x70] ss:$8 sps:$4 sm:$0xff]  }
  0x1b   : > { %1269 = vmatprep.subr.bf16.mxu0 %v1421_v8  ;;  %1377 = vmatprep.subr.bf16.mxu1 %v1421_v8  ;;  %v1470_v43 = vld [vmem:[%s1574_s11 + $0xe0] ss:$8 sps:$4 sm:$0xff]   ;;  %v1473_v45 = vld [vmem:[%s1574_s11 + $0xf4] ss:$8 sps:$4 sm:$0xff]   ;;  %v1476_v47 = vld [vmem:[%s1574_s11 + $0xf0] ss:$8 sps:$4 sm:$0xff]  }
  0x1c   : > { %v1632_v51 = vld [vmem:[%s1716_s2] ss:$0 sm:$0xff] }
  0x1e   : > { %1270 = vmatpush3.bf16.msra.mxu0 %v1422_v9  ;;  %1385 = vmatpush3.bf16.msra.mxu1 %v1422_v9 }
  0x1f   : > { %1271 = vmatprep.subr.bf16.mxu0 %v1423_v10  ;;  %1378 = vmatprep.subr.bf16.mxu1 %v1423_v10 }
  0x22   : > { %1272 = vmatpush3.bf16.msra.mxu0 %v1424_v13  ;;  %1386 = vmatpush3.bf16.msra.mxu1 %v1424_v13 }
  0x23   : > { %1273 = vmatprep.subr.bf16.mxu0 %v1425_v14  ;;  %1379 = vmatprep.subr.bf16.mxu1 %v1425_v14 }
  0x26   : > { %1274 = vmatpush3.bf16.msra.mxu0 %v1426_v15  ;;  %1387 = vmatpush3.bf16.msra.mxu1 %v1426_v15 }
  0x27   : > { %1275 = vmatprep.subr.bf16.mxu0 %v1427_v16  ;;  %1380 = vmatprep.subr.bf16.mxu1 %v1427_v16 }
  0x2a   : > { %1276 = vmatpush3.bf16.msra.mxu0 %v1428_v17  ;;  %1388 = vmatpush3.bf16.msra.mxu1 %v1428_v17 }
  0x2d   : > { %689 = vmatmul.mubr.bf16.vlgmr.msra.gmra.mxu0 %v1429_v18  ;;  %753 = vmatmul.mubr.bf16.vlgmr.msra.gmra.mxu1 %v1432_v19 }
  0x2e   : > { %696 = vmatprep.mubr.bf16.mxu0 %v1435_v20  ;;  %760 = vmatprep.mubr.bf16.mxu1 %v1437_v21 }
  0x35   : > { %697 = vmatmul.mubr.bf16.gmra.mxu0 %v1439_v22  ;;  %761 = vmatmul.mubr.bf16.gmra.mxu1 %v1440_v23 }
  0x36   : > { %704 = vmatprep.mubr.bf16.mxu0 %v1441_v24  ;;  %768 = vmatprep.mubr.bf16.mxu1 %v1443_v25 }
  0x3d   : > { %705 = vmatmul.mubr.bf16.gmra.mxu0 %v1445_v26  ;;  %769 = vmatmul.mubr.bf16.gmra.mxu1 %v1446_v27 }
  0x3e   : > { %712 = vmatprep.mubr.bf16.mxu0 %v1447_v28  ;;  %776 = vmatprep.mubr.bf16.mxu1 %v1449_v29 }
  0x45   : > { %713 = vmatmul.mubr.bf16.gmra.mxu0 %v1451_v30  ;;  %777 = vmatmul.mubr.bf16.gmra.mxu1 %v1452_v31 }
  0x46   : > { %720 = vmatprep.mubr.bf16.mxu0 %v1453_v32  ;;  %784 = vmatprep.mubr.bf16.mxu1 %v1455_v33 }
  0x4d   : > { %721 = vmatmul.mubr.bf16.gmra.mxu0 %v1457_v34  ;;  %785 = vmatmul.mubr.bf16.gmra.mxu1 %v1458_v35 }
  0x4e   : > { %728 = vmatprep.mubr.bf16.mxu0 %v1459_v36  ;;  %792 = vmatprep.mubr.bf16.mxu1 %v1461_v37 }
  0x55   : > { %729 = vmatmul.mubr.bf16.gmra.mxu0 %v1463_v38  ;;  %793 = vmatmul.mubr.bf16.gmra.mxu1 %v1464_v39 }
  0x56   : > { %736 = vmatprep.mubr.bf16.mxu0 %v1465_v40  ;;  %800 = vmatprep.mubr.bf16.mxu1 %v1467_v41 }
  0x5d   : > { %737 = vmatmul.mubr.bf16.gmra.mxu0 %v1469_v42  ;;  %801 = vmatmul.mubr.bf16.gmra.mxu1 %v1470_v43 }
  0x5e   : > { %744 = vmatprep.mubr.bf16.mxu0 %v1471_v44  ;;  %808 = vmatprep.mubr.bf16.mxu1 %v1473_v45 }
  0x65   : > { %745 = vmatmul.mubr.bf16.gmra.mxu0 %v1475_v46  ;;  %809 = vmatmul.mubr.bf16.gmra.mxu1 %v1476_v47 }
  0xed   : > { %v1277_v48 = vpop.f32.mrf.mxu0  ;;  %v1325_v49 = vpop.f32.mrf.mxu1 }
  0xef   : > { %v1278_v50 = vpop.f32.mrf.mxu0  ;;  %v1326_v52 = vpop.f32.mrf.mxu1 }
  0xf0   : > { %v1279_v53 = vadd.f32 %v1278_v50, %v1277_v48  ;;  %v1327_v54 = vadd.f32 %v1326_v52, %v1325_v49 }
  0xf1   : > { %v1280_v55 = vpop.f32.mrf.mxu0  ;;  %v1328_v56 = vpop.f32.mrf.mxu1 }
  0xf2   : > { %v923_v57 = vadd.f32 %v1279_v53, %v1632_v51  ;;  %v939_v58 = vadd.f32 %v1327_v54, %v1632_v51 }
  0xf3   : > { %v1281_v59 = vpop.f32.mrf.mxu0  ;;  %v1329_v60 = vpop.f32.mrf.mxu1 }
  0xf4   : > { %vm955_vm0 = vcmp.ge.f32.partialorder %v923_v57, 0.0  ;;  %v987_v61 = vmul.f32 0.2, %v923_v57  ;;  %vm971_vm1 = vcmp.ge.f32.partialorder %v939_v58, 0.0  ;;  %v1003_v62 = vmul.f32 0.2, %v939_v58 }
  0xf5   : > { %v1282_v63 = vadd.f32 %v1281_v59, %v1280_v55  ;;  %v1330_v0 = vadd.f32 %v1329_v60, %v1328_v56  ;;  %v1283_v1 = vpop.f32.mrf.mxu0  ;;  %v1331_v2 = vpop.f32.mrf.mxu1 }
  0xf6   : > { %v1019_v3 = vsel %vm955_vm0, %v923_v57, %v987_v61  ;;  %v1035_v4 = vsel %vm971_vm1, %v939_v58, %v1003_v62 }
  0xf7   : > { %1051 = vst [vmem:[%s1641_s8] sm:$0xff] %v1019_v3  ;;  %1067 = vst [vmem:[%s1641_s8 + $0x80] sm:$0xff] %v1035_v4  ;;  %v924_v5 = vadd.f32 %v1282_v63, %v1632_v51  ;;  %v940_v6 = vadd.f32 %v1330_v0, %v1632_v51  ;;  %v1284_v7 = vpop.f32.mrf.mxu0  ;;  %v1332_v8 = vpop.f32.mrf.mxu1 }
  0xf8   : > { %v1285_v9 = vadd.f32 %v1284_v7, %v1283_v1  ;;  %v1333_v10 = vadd.f32 %v1332_v8, %v1331_v2 }
  0xf9   : > { %vm956_vm2 = vcmp.ge.f32.partialorder %v924_v5, 0.0  ;;  %v988_v11 = vmul.f32 0.2, %v924_v5  ;;  %vm972_vm3 = vcmp.ge.f32.partialorder %v940_v6, 0.0  ;;  %v1004_v12 = vmul.f32 0.2, %v940_v6  ;;  %v1286_v13 = vpop.f32.mrf.mxu0  ;;  %v1334_v14 = vpop.f32.mrf.mxu1 }
  0xfa   : > { %v925_v15 = vadd.f32 %v1285_v9, %v1632_v51  ;;  %v941_v16 = vadd.f32 %v1333_v10, %v1632_v51 }
  0xfb   : > { %v1020_v17 = vsel %vm956_vm2, %v924_v5, %v988_v11  ;;  %v1036_v18 = vsel %vm972_vm3, %v940_v6, %v1004_v12  ;;  %v1287_v19 = vpop.f32.mrf.mxu0  ;;  %v1335_v20 = vpop.f32.mrf.mxu1 }
  0xfc   : > { %1052 = vst [vmem:[%s1641_s8 + $0x8] sm:$0xff] %v1020_v17  ;;  %1068 = vst [vmem:[%s1641_s8 + $0x88] sm:$0xff] %v1036_v18  ;;  %vm957_vm4 = vcmp.ge.f32.partialorder %v925_v15, 0.0  ;;  %v989_v21 = vmul.f32 0.2, %v925_v15  ;;  %vm973_vm5 = vcmp.ge.f32.partialorder %v941_v16, 0.0  ;;  %v1288_v23 = vadd.f32 %v1287_v19, %v1286_v13 }
  0xfd   : > { %v1005_v22 = vmul.f32 0.2, %v941_v16  ;;  %v1336_v24 = vadd.f32 %v1335_v20, %v1334_v14  ;;  %v1289_v25 = vpop.f32.mrf.mxu0  ;;  %v1337_v26 = vpop.f32.mrf.mxu1 }
  0xfe   : > { %v1021_v27 = vsel %vm957_vm4, %v925_v15, %v989_v21  ;;  %v926_v29 = vadd.f32 %v1288_v23, %v1632_v51 }
  0xff   : > { %v1037_v28 = vsel %vm973_vm5, %v941_v16, %v1005_v22  ;;  %1053 = vst [vmem:[%s1641_s8 + $0x10] sm:$0xff] %v1021_v27  ;;  %v942_v30 = vadd.f32 %v1336_v24, %v1632_v51  ;;  %v1290_v31 = vpop.f32.mrf.mxu0  ;;  %v1338_v32 = vpop.f32.mrf.mxu1 }
 0x100   : > { %1069 = vst [vmem:[%s1641_s8 + $0x90] sm:$0xff] %v1037_v28  ;;  %v1291_v33 = vadd.f32 %v1290_v31, %v1289_v25  ;;  %v1339_v34 = vadd.f32 %v1338_v32, %v1337_v26  ;;  %vm958_vm6 = vcmp.ge.f32.partialorder %v926_v29, 0.0  ;;  %v990_v35 = vmul.f32 0.2, %v926_v29 }
 0x101   : > { %vm974_vm7 = vcmp.ge.f32.partialorder %v942_v30, 0.0  ;;  %v1006_v36 = vmul.f32 0.2, %v942_v30  ;;  %v1292_v37 = vpop.f32.mrf.mxu0  ;;  %v1340_v38 = vpop.f32.mrf.mxu1 }
 0x102   : > { %v927_v39 = vadd.f32 %v1291_v33, %v1632_v51  ;;  %v943_v40 = vadd.f32 %v1339_v34, %v1632_v51  ;;  %v1022_v41 = vsel %vm958_vm6, %v926_v29, %v990_v35 }
 0x103   : > { %v1038_v42 = vsel %vm974_vm7, %v942_v30, %v1006_v36  ;;  %v1293_v43 = vpop.f32.mrf.mxu0  ;;  %v1341_v44 = vpop.f32.mrf.mxu1  ;;  %1054 = vst [vmem:[%s1641_s8 + $0x18] sm:$0xff] %v1022_v41 }
 0x104   : > { %1070 = vst [vmem:[%s1641_s8 + $0x98] sm:$0xff] %v1038_v42  ;;  %vm959_vm8 = vcmp.ge.f32.partialorder %v927_v39, 0.0  ;;  %v991_v45 = vmul.f32 0.2, %v927_v39  ;;  %vm975_vm9 = vcmp.ge.f32.partialorder %v943_v40, 0.0  ;;  %v1294_v47 = vadd.f32 %v1293_v43, %v1292_v37 }
 0x105   : > { %v1007_v46 = vmul.f32 0.2, %v943_v40  ;;  %v1342_v48 = vadd.f32 %v1341_v44, %v1340_v38  ;;  %v1295_v49 = vpop.f32.mrf.mxu0  ;;  %v1343_v50 = vpop.f32.mrf.mxu1 }
 0x106   : > { %v1023_v52 = vsel %vm959_vm8, %v927_v39, %v991_v45  ;;  %v928_v54 = vadd.f32 %v1294_v47, %v1632_v51 }
 0x107   : > { %v1039_v53 = vsel %vm975_vm9, %v943_v40, %v1007_v46  ;;  %1055 = vst [vmem:[%s1641_s8 + $0x20] sm:$0xff] %v1023_v52  ;;  %v944_v55 = vadd.f32 %v1342_v48, %v1632_v51  ;;  %v1296_v56 = vpop.f32.mrf.mxu0  ;;  %v1344_v57 = vpop.f32.mrf.mxu1 }
 0x108   : > { %1071 = vst [vmem:[%s1641_s8 + $0xa0] sm:$0xff] %v1039_v53  ;;  %v1297_v58 = vadd.f32 %v1296_v56, %v1295_v49  ;;  %v1345_v59 = vadd.f32 %v1344_v57, %v1343_v50  ;;  %vm960_vm10 = vcmp.ge.f32.partialorder %v928_v54, 0.0  ;;  %v992_v60 = vmul.f32 0.2, %v928_v54 }
 0x109   : > { %vm976_vm11 = vcmp.ge.f32.partialorder %v944_v55, 0.0  ;;  %v1008_v61 = vmul.f32 0.2, %v944_v55  ;;  %v1298_v62 = vpop.f32.mrf.mxu0  ;;  %v1346_v63 = vpop.f32.mrf.mxu1 }
 0x10a   : > { %v929_v0 = vadd.f32 %v1297_v58, %v1632_v51  ;;  %v945_v1 = vadd.f32 %v1345_v59, %v1632_v51  ;;  %v1024_v2 = vsel %vm960_vm10, %v928_v54, %v992_v60 }
 0x10b   : > { %v1040_v3 = vsel %vm976_vm11, %v944_v55, %v1008_v61  ;;  %v1299_v4 = vpop.f32.mrf.mxu0  ;;  %v1347_v5 = vpop.f32.mrf.mxu1  ;;  %1056 = vst [vmem:[%s1641_s8 + $0x28] sm:$0xff] %v1024_v2 }
 0x10c   : > { %1072 = vst [vmem:[%s1641_s8 + $0xa8] sm:$0xff] %v1040_v3  ;;  %vm961_vm12 = vcmp.ge.f32.partialorder %v929_v0, 0.0  ;;  %v993_v6 = vmul.f32 0.2, %v929_v0  ;;  %vm977_vm13 = vcmp.ge.f32.partialorder %v945_v1, 0.0  ;;  %v1300_v8 = vadd.f32 %v1299_v4, %v1298_v62 }
 0x10d   : > { %v1009_v7 = vmul.f32 0.2, %v945_v1  ;;  %v1348_v9 = vadd.f32 %v1347_v5, %v1346_v63  ;;  %v1301_v10 = vpop.f32.mrf.mxu0  ;;  %v1349_v11 = vpop.f32.mrf.mxu1 }
 0x10e   : > { %v1025_v12 = vsel %vm961_vm12, %v929_v0, %v993_v6  ;;  %v930_v14 = vadd.f32 %v1300_v8, %v1632_v51 }
 0x10f   : > { %v1041_v13 = vsel %vm977_vm13, %v945_v1, %v1009_v7  ;;  %1057 = vst [vmem:[%s1641_s8 + $0x30] sm:$0xff] %v1025_v12  ;;  %v946_v15 = vadd.f32 %v1348_v9, %v1632_v51  ;;  %v1302_v16 = vpop.f32.mrf.mxu0  ;;  %v1350_v17 = vpop.f32.mrf.mxu1 }
 0x110   : > { %1073 = vst [vmem:[%s1641_s8 + $0xb0] sm:$0xff] %v1041_v13  ;;  %v1303_v18 = vadd.f32 %v1302_v16, %v1301_v10  ;;  %v1351_v19 = vadd.f32 %v1350_v17, %v1349_v11  ;;  %vm962_vm14 = vcmp.ge.f32.partialorder %v930_v14, 0.0  ;;  %v994_v20 = vmul.f32 0.2, %v930_v14 }
 0x111   : > { %vm978_vm15 = vcmp.ge.f32.partialorder %v946_v15, 0.0  ;;  %v1010_v21 = vmul.f32 0.2, %v946_v15  ;;  %v1304_v22 = vpop.f32.mrf.mxu0  ;;  %v1352_v23 = vpop.f32.mrf.mxu1 }
 0x112   : > { %v931_v24 = vadd.f32 %v1303_v18, %v1632_v51  ;;  %v947_v25 = vadd.f32 %v1351_v19, %v1632_v51  ;;  %v1026_v26 = vsel %vm962_vm14, %v930_v14, %v994_v20 }
 0x113   : > { %v1042_v27 = vsel %vm978_vm15, %v946_v15, %v1010_v21  ;;  %v1305_v28 = vpop.f32.mrf.mxu0  ;;  %v1353_v29 = vpop.f32.mrf.mxu1  ;;  %1058 = vst [vmem:[%s1641_s8 + $0x38] sm:$0xff] %v1026_v26 }
 0x114   : > { %1074 = vst [vmem:[%s1641_s8 + $0xb8] sm:$0xff] %v1042_v27  ;;  %vm963_vm0 = vcmp.ge.f32.partialorder %v931_v24, 0.0  ;;  %v995_v30 = vmul.f32 0.2, %v931_v24  ;;  %vm979_vm1 = vcmp.ge.f32.partialorder %v947_v25, 0.0  ;;  %v1306_v32 = vadd.f32 %v1305_v28, %v1304_v22 }
 0x115   : > { %v1011_v31 = vmul.f32 0.2, %v947_v25  ;;  %v1354_v33 = vadd.f32 %v1353_v29, %v1352_v23  ;;  %v1307_v34 = vpop.f32.mrf.mxu0  ;;  %v1355_v35 = vpop.f32.mrf.mxu1 }
 0x116   : > { %v1027_v36 = vsel %vm963_vm0, %v931_v24, %v995_v30  ;;  %v932_v38 = vadd.f32 %v1306_v32, %v1632_v51 }
 0x117   : > { %v1043_v37 = vsel %vm979_vm1, %v947_v25, %v1011_v31  ;;  %1059 = vst [vmem:[%s1641_s8 + $0x40] sm:$0xff] %v1027_v36  ;;  %v948_v39 = vadd.f32 %v1354_v33, %v1632_v51  ;;  %v1308_v40 = vpop.f32.mrf.mxu0  ;;  %v1356_v41 = vpop.f32.mrf.mxu1 }
 0x118   : > { %1075 = vst [vmem:[%s1641_s8 + $0xc0] sm:$0xff] %v1043_v37  ;;  %v1309_v42 = vadd.f32 %v1308_v40, %v1307_v34  ;;  %v1357_v43 = vadd.f32 %v1356_v41, %v1355_v35  ;;  %vm964_vm2 = vcmp.ge.f32.partialorder %v932_v38, 0.0  ;;  %v996_v44 = vmul.f32 0.2, %v932_v38 }
 0x119   : > { %vm980_vm3 = vcmp.ge.f32.partialorder %v948_v39, 0.0  ;;  %v1012_v45 = vmul.f32 0.2, %v948_v39  ;;  %v1310_v46 = vpop.f32.mrf.mxu0  ;;  %v1358_v47 = vpop.f32.mrf.mxu1 }
 0x11a   : > { %v933_v48 = vadd.f32 %v1309_v42, %v1632_v51  ;;  %v949_v49 = vadd.f32 %v1357_v43, %v1632_v51  ;;  %v1028_v50 = vsel %vm964_vm2, %v932_v38, %v996_v44 }
 0x11b   : > { %v1044_v52 = vsel %vm980_vm3, %v948_v39, %v1012_v45  ;;  %v1311_v53 = vpop.f32.mrf.mxu0  ;;  %v1359_v54 = vpop.f32.mrf.mxu1  ;;  %1060 = vst [vmem:[%s1641_s8 + $0x48] sm:$0xff] %v1028_v50 }
 0x11c   : > { %1076 = vst [vmem:[%s1641_s8 + $0xc8] sm:$0xff] %v1044_v52  ;;  %vm965_vm4 = vcmp.ge.f32.partialorder %v933_v48, 0.0  ;;  %v997_v55 = vmul.f32 0.2, %v933_v48  ;;  %vm981_vm5 = vcmp.ge.f32.partialorder %v949_v49, 0.0  ;;  %v1312_v57 = vadd.f32 %v1311_v53, %v1310_v46 }
 0x11d   : > { %v1013_v56 = vmul.f32 0.2, %v949_v49  ;;  %v1360_v58 = vadd.f32 %v1359_v54, %v1358_v47  ;;  %v1313_v59 = vpop.f32.mrf.mxu0  ;;  %v1361_v60 = vpop.f32.mrf.mxu1 }
 0x11e   : > { %v1029_v61 = vsel %vm965_vm4, %v933_v48, %v997_v55  ;;  %v934_v63 = vadd.f32 %v1312_v57, %v1632_v51 }
 0x11f   : > { %v1045_v62 = vsel %vm981_vm5, %v949_v49, %v1013_v56  ;;  %1061 = vst [vmem:[%s1641_s8 + $0x50] sm:$0xff] %v1029_v61  ;;  %v950_v0 = vadd.f32 %v1360_v58, %v1632_v51  ;;  %v1314_v1 = vpop.f32.mrf.mxu0  ;;  %v1362_v2 = vpop.f32.mrf.mxu1 }
 0x120   : > { %1077 = vst [vmem:[%s1641_s8 + $0xd0] sm:$0xff] %v1045_v62  ;;  %v1315_v3 = vadd.f32 %v1314_v1, %v1313_v59  ;;  %v1363_v4 = vadd.f32 %v1362_v2, %v1361_v60  ;;  %vm966_vm6 = vcmp.ge.f32.partialorder %v934_v63, 0.0  ;;  %v998_v5 = vmul.f32 0.2, %v934_v63 }
 0x121   : > { %vm982_vm7 = vcmp.ge.f32.partialorder %v950_v0, 0.0  ;;  %v1014_v6 = vmul.f32 0.2, %v950_v0  ;;  %v1316_v7 = vpop.f32.mrf.mxu0  ;;  %v1364_v8 = vpop.f32.mrf.mxu1 }
 0x122   : > { %v935_v9 = vadd.f32 %v1315_v3, %v1632_v51  ;;  %v951_v10 = vadd.f32 %v1363_v4, %v1632_v51  ;;  %v1030_v11 = vsel %vm966_vm6, %v934_v63, %v998_v5 }
 0x123   : > { %v1046_v12 = vsel %vm982_vm7, %v950_v0, %v1014_v6  ;;  %v1317_v13 = vpop.f32.mrf.mxu0  ;;  %v1365_v14 = vpop.f32.mrf.mxu1  ;;  %1062 = vst [vmem:[%s1641_s8 + $0x58] sm:$0xff] %v1030_v11 }
 0x124   : > { %1078 = vst [vmem:[%s1641_s8 + $0xd8] sm:$0xff] %v1046_v12  ;;  %vm967_vm8 = vcmp.ge.f32.partialorder %v935_v9, 0.0  ;;  %v999_v15 = vmul.f32 0.2, %v935_v9  ;;  %vm983_vm9 = vcmp.ge.f32.partialorder %v951_v10, 0.0  ;;  %v1318_v17 = vadd.f32 %v1317_v13, %v1316_v7 }
 0x125   : > { %v1015_v16 = vmul.f32 0.2, %v951_v10  ;;  %v1366_v18 = vadd.f32 %v1365_v14, %v1364_v8  ;;  %v1319_v19 = vpop.f32.mrf.mxu0  ;;  %v1367_v20 = vpop.f32.mrf.mxu1 }
 0x126   : > { %v1031_v21 = vsel %vm967_vm8, %v935_v9, %v999_v15  ;;  %v936_v23 = vadd.f32 %v1318_v17, %v1632_v51 }
 0x127   : > { %v1047_v22 = vsel %vm983_vm9, %v951_v10, %v1015_v16  ;;  %1063 = vst [vmem:[%s1641_s8 + $0x60] sm:$0xff] %v1031_v21  ;;  %v952_v24 = vadd.f32 %v1366_v18, %v1632_v51  ;;  %v1320_v25 = vpop.f32.mrf.mxu0  ;;  %v1368_v26 = vpop.f32.mrf.mxu1 }
 0x128   : > { %1079 = vst [vmem:[%s1641_s8 + $0xe0] sm:$0xff] %v1047_v22  ;;  %v1321_v27 = vadd.f32 %v1320_v25, %v1319_v19  ;;  %v1369_v28 = vadd.f32 %v1368_v26, %v1367_v20  ;;  %vm968_vm10 = vcmp.ge.f32.partialorder %v936_v23, 0.0  ;;  %v1000_v29 = vmul.f32 0.2, %v936_v23 }
 0x129   : > { %vm984_vm11 = vcmp.ge.f32.partialorder %v952_v24, 0.0  ;;  %v1016_v30 = vmul.f32 0.2, %v952_v24  ;;  %v1322_v31 = vpop.f32.mrf.mxu0  ;;  %v1370_v32 = vpop.f32.mrf.mxu1 }
 0x12a   : > { %v937_v33 = vadd.f32 %v1321_v27, %v1632_v51  ;;  %v953_v34 = vadd.f32 %v1369_v28, %v1632_v51  ;;  %v1032_v35 = vsel %vm968_vm10, %v936_v23, %v1000_v29 }
 0x12b   : > { %v1048_v36 = vsel %vm984_vm11, %v952_v24, %v1016_v30  ;;  %v1323_v37 = vpop.f32.mrf.mxu0  ;;  %v1371_v38 = vpop.f32.mrf.mxu1  ;;  %1064 = vst [vmem:[%s1641_s8 + $0x68] sm:$0xff] %v1032_v35 }
 0x12c   : > { %1080 = vst [vmem:[%s1641_s8 + $0xe8] sm:$0xff] %v1048_v36  ;;  %vm969_vm12 = vcmp.ge.f32.partialorder %v937_v33, 0.0  ;;  %v1001_v39 = vmul.f32 0.2, %v937_v33  ;;  %vm985_vm13 = vcmp.ge.f32.partialorder %v953_v34, 0.0  ;;  %v1324_v41 = vadd.f32 %v1323_v37, %v1322_v31 }
 0x12d   : > { %v1017_v40 = vmul.f32 0.2, %v953_v34  ;;  %v1372_v42 = vadd.f32 %v1371_v38, %v1370_v32 }
 0x12e   : > { %v1033_v43 = vsel %vm969_vm12, %v937_v33, %v1001_v39  ;;  %v938_v45 = vadd.f32 %v1324_v41, %v1632_v51 }
 0x12f   : > { %v1049_v44 = vsel %vm985_vm13, %v953_v34, %v1017_v40  ;;  %1065 = vst [vmem:[%s1641_s8 + $0x70] sm:$0xff] %v1033_v43  ;;  %v954_v46 = vadd.f32 %v1372_v42, %v1632_v51 }
 0x130   : > { %1081 = vst [vmem:[%s1641_s8 + $0xf0] sm:$0xff] %v1049_v44  ;;  %vm970_vm14 = vcmp.ge.f32.partialorder %v938_v45, 0.0  ;;  %v1002_v47 = vmul.f32 0.2, %v938_v45 }
 0x131   : > { %vm986_vm15 = vcmp.ge.f32.partialorder %v954_v46, 0.0  ;;  %v1018_v48 = vmul.f32 0.2, %v954_v46 }
 0x132   : > { %v1034_v49 = vsel %vm970_vm14, %v938_v45, %v1002_v47 }
 0x133   : > { %v1050_v50 = vsel %vm986_vm15, %v954_v46, %v1018_v48  ;;  %1066 = vst [vmem:[%s1641_s8 + $0x78] sm:$0xff] %v1034_v49 }
 0x134   : > { %1082 = vst [vmem:[%s1641_s8 + $0xf8] sm:$0xff] %v1050_v50 }
 0x135 PF: > { %s13_s14 = sadd.s32 1, %s1499_s14   ;;  %s1718_s12 = smov %s1495_s13 }
 0x136   : > { %p10_p5 = scmp.ge.s32.totalorder %s13_s14, 4   ;;  %s1719_s13 = smov %s1721_s15 }
 0x138   :  { %12 = sbr.rel (!%p10_p5) target bundleno = 2 (0x2), region = 76 }

// kernel: vae_forward.49
= control target key start
LH: loop header
LB: loop body
LE: loop exit
PB: predicated region body
PF: predicated region fallthrough
CT: control target
= control target key end

     0   :  { %s1180_s12 = smov 0   ;;  %s1182_s13 = smov 0   ;;  %s1330_s0 = inlined_call_operand.vmem [shape: bf16[2048,128], index: 0, kind: input, shape index: {}]   ;;  %s1331_s1 = inlined_call_operand.vmem [shape: bf16[128,128], index: 1, kind: input, shape index: {}]   ;;  %s1332_s2 = inlined_call_operand.vmem [shape: f32[1,128], index: 2, kind: input, shape index: {}]   ;;  %s1333_s3 = inlined_call_operand.vmem [shape: f32[2048,128], index: 3, kind: output, shape index: {}]  }
   0x1   :  { %s1184_s14 = smov 0  }
   0x2 LB: > { %s32_s15 = sadd.s32 1, %s1154_s13  ;;  %p968_p0 = scmp.ge.s32.totalorder %s1158_s14, 1  ;;  %s1158_s14 = sphi %s1184_s14, %s13_s14   ;;  %s1154_s13 = sphi %s1182_s13, %s1335_s13   ;;  %s1150_s12 = sphi %s1180_s12, %s1334_s12  }
   0x3   : > { %p34_p1 = scmp.ge.s32.totalorder %s32_s15, 8  ;;  %p188_p2 = scmp.lt.s32.totalorder %s1158_s14, 9 }
   0x5   : > { %s1337_s15 = smov (%p34_p1, %s32_s15), 0  ;;  %p189_p3 = pnand %p968_p0, %p188_p2 }
   0x6   : > { %s969_s18 = sshll.u32 (!%p189_p3), %s1150_s12, 5 }
   0x7   : > { %192 = sbr.rel (%p189_p3) target bundleno = 271 (0x10f), region = 32  ;;  %p230_p4 = scmp.lt.s32.totalorder (!%p189_p3), %s969_s18, 255 }
   0xc   : > { %v1112_v0 = vld [vmem:[%s1331_s1 + $0x38] sm:$0xff]   ;;  %v1113_v1 = vld [vmem:[%s1331_s1 + $0x30] sm:$0xff]   ;;  %s1339_s18 = smov (!%p230_p4, %s969_s18), 255  ;;  %v1114_v2 = vld [vmem:[%s1331_s1 + $0x28] sm:$0xff]  }
   0xd   : > { %1024 = vmatprep.subr.bf16.mxu0 %v1112_v0  ;;  %1072 = vmatprep.subr.bf16.mxu1 %v1112_v0  ;;  %s970_s23 = sshll.u32 %s1339_s18, 2  ;;  %v1115_v3 = vld [vmem:[%s1331_s1 + $0x20] sm:$0xff]   ;;  %v1116_v6 = vld [vmem:[%s1331_s1 + $0x18] sm:$0xff]   ;;  %v1117_v7 = vld [vmem:[%s1331_s1 + $0x10] sm:$0xff]   ;;  %s972_s10 = sshll.u32 %s1339_s18, 3 }
   0xe   : > { %1025 = vmatpush3.bf16.msra.mxu0 %v1112_v0  ;;  %1080 = vmatpush3.bf16.msra.mxu1 %v1112_v0  ;;  %s1213_s26 = scalar_lea.vmem %s1330_s0, %s970_s23  ;;  %v1118_v8 = vld [vmem:[%s1331_s1 + $0x8] sm:$0xff]   ;;  %v1119_v9 = vld [vmem:[%s1331_s1] sm:$0xff]   ;;  %s1255_s19 = scalar_lea.vmem %s1333_s3, %s972_s10 }
   0xf   : > { %1026 = vmatprep.subr.bf16.mxu0 %v1113_v1  ;;  %1073 = vmatprep.subr.bf16.mxu1 %v1113_v1  ;;  %v1120_v4 = vld [vmem:[%s1213_s26] sm:$0xff]   ;;  %v1122_v10 = vld [vmem:[%s1213_s26 + $0x8] sm:$0xff]   ;;  %v1124_v12 = vld [vmem:[%s1213_s26 + $0x10] sm:$0xff]  }
  0x10   : > { %v1121_v5 = vld [vmem:[%s1213_s26 + $0x40] sm:$0xff]   ;;  %1040 = vmatprep.mubr.bf16.mxu0 %v1120_v4  ;;  %v1123_v11 = vld [vmem:[%s1213_s26 + $0x48] sm:$0xff]   ;;  %v1125_v13 = vld [vmem:[%s1213_s26 + $0x50] sm:$0xff]  }
  0x11   : > { %1056 = vmatprep.mubr.bf16.mxu1 %v1121_v5  ;;  %v1126_v14 = vld [vmem:[%s1213_s26 + $0x18] sm:$0xff]   ;;  %v1128_v16 = vld [vmem:[%s1213_s26 + $0x20] sm:$0xff]   ;;  %v1130_v18 = vld [vmem:[%s1213_s26 + $0x28] sm:$0xff]  }
  0x12   : > { %1027 = vmatpush3.bf16.msra.mxu0 %v1113_v1  ;;  %1081 = vmatpush3.bf16.msra.mxu1 %v1113_v1  ;;  %v1127_v15 = vld [vmem:[%s1213_s26 + $0x58] sm:$0xff]   ;;  %v1129_v17 = vld [vmem:[%s1213_s26 + $0x60] sm:$0xff]   ;;  %v1131_v19 = vld [vmem:[%s1213_s26 + $0x68] sm:$0xff]  }
  0x13   : > { %1028 = vmatprep.subr.bf16.mxu0 %v1114_v2  ;;  %1074 = vmatprep.subr.bf16.mxu1 %v1114_v2  ;;  %v1132_v20 = vld [vmem:[%s1213_s26 + $0x30] sm:$0xff]   ;;  %v1134_v22 = vld [vmem:[%s1213_s26 + $0x38] sm:$0xff]   ;;  %v1250_v24 = vld [vmem:[%s1332_s2] ss:$0 sm:$0xff] }
  0x14   : > { %v1133_v21 = vld [vmem:[%s1213_s26 + $0x70] sm:$0xff]   ;;  %v1135_v23 = vld [vmem:[%s1213_s26 + $0x78] sm:$0xff]  }
  0x16   : > { %1029 = vmatpush3.bf16.msra.mxu0 %v1114_v2  ;;  %1082 = vmatpush3.bf16.msra.mxu1 %v1114_v2 }
  0x17   : > { %1030 = vmatprep.subr.bf16.mxu0 %v1115_v3  ;;  %1075 = vmatprep.subr.bf16.mxu1 %v1115_v3 }
  0x1a   : > { %1031 = vmatpush3.bf16.msra.mxu0 %v1115_v3  ;;  %1083 = vmatpush3.bf16.msra.mxu1 %v1115_v3 }
  0x1b   : > { %1032 = vmatprep.subr.bf16.mxu0 %v1116_v6  ;;  %1076 = vmatprep.subr.bf16.mxu1 %v1116_v6 }
  0x1e   : > { %1033 = vmatpush3.bf16.msra.mxu0 %v1116_v6  ;;  %1084 = vmatpush3.bf16.msra.mxu1 %v1116_v6 }
  0x1f   : > { %1034 = vmatprep.subr.bf16.mxu0 %v1117_v7  ;;  %1077 = vmatprep.subr.bf16.mxu1 %v1117_v7 }
  0x22   : > { %1035 = vmatpush3.bf16.msra.mxu0 %v1117_v7  ;;  %1085 = vmatpush3.bf16.msra.mxu1 %v1117_v7 }
  0x23   : > { %1036 = vmatprep.subr.bf16.mxu0 %v1118_v8  ;;  %1078 = vmatprep.subr.bf16.mxu1 %v1118_v8 }
  0x26   : > { %1037 = vmatpush3.bf16.msra.mxu0 %v1118_v8  ;;  %1086 = vmatpush3.bf16.msra.mxu1 %v1118_v8 }
  0x27   : > { %1038 = vmatprep.subr.bf16.mxu0 %v1119_v9  ;;  %1079 = vmatprep.subr.bf16.mxu1 %v1119_v9 }
  0x2a   : > { %1039 = vmatpush3.bf16.msra.mxu0 %v1119_v9  ;;  %1087 = vmatpush3.bf16.msra.mxu1 %v1119_v9 }
  0x2d   : > { %1041 = vmatmul.mubr.bf16.vlgmr.msra.gmra.mxu0 %v1122_v10  ;;  %1057 = vmatmul.mubr.bf16.vlgmr.msra.gmra.mxu1 %v1123_v11 }
  0x2e   : > { %1044 = vmatprep.mubr.bf16.mxu0 %v1124_v12  ;;  %1060 = vmatprep.mubr.bf16.mxu1 %v1125_v13 }
  0x35   : > { %1045 = vmatmul.mubr.bf16.gmra.mxu0 %v1126_v14  ;;  %1061 = vmatmul.mubr.bf16.gmra.mxu1 %v1127_v15 }
  0x36   : > { %1048 = vmatprep.mubr.bf16.mxu0 %v1128_v16  ;;  %1064 = vmatprep.mubr.bf16.mxu1 %v1129_v17 }
  0x3d   : > { %1049 = vmatmul.mubr.bf16.gmra.mxu0 %v1130_v18  ;;  %1065 = vmatmul.mubr.bf16.gmra.mxu1 %v1131_v19 }
  0x3e   : > { %1052 = vmatprep.mubr.bf16.mxu0 %v1132_v20  ;;  %1068 = vmatprep.mubr.bf16.mxu1 %v1133_v21 }
  0x45   : > { %1053 = vmatmul.mubr.bf16.gmra.mxu0 %v1134_v22  ;;  %1069 = vmatmul.mubr.bf16.gmra.mxu1 %v1135_v23 }
  0xed   : > { %v1042_v25 = vpop.f32.mrf.mxu0  ;;  %v1058_v26 = vpop.f32.mrf.mxu1 }
  0xee   : > { %v789_v27 = vadd.f32 %v1042_v25, %v1250_v24  ;;  %v805_v28 = vadd.f32 %v1058_v26, %v1250_v24 }
  0xef   : > { %v554_v29 = vpop.f32.mrf.mxu0  ;;  %v618_v30 = vpop.f32.mrf.mxu1 }
  0xf0   : > { %821 = vst [vmem:[%s1255_s19 + $0x10] sm:$0xff] %v789_v27  ;;  %837 = vst [vmem:[%s1255_s19 + $0x90] sm:$0xff] %v805_v28  ;;  %v787_v31 = vadd.f32 %v1250_v24, %v554_v29  ;;  %v803_v32 = vadd.f32 %v1250_v24, %v618_v30 }
  0xf1   : > { %v1043_v33 = vpop.f32.mrf.mxu0  ;;  %v1059_v34 = vpop.f32.mrf.mxu1 }
  0xf2   : > { %819 = vst [vmem:[%s1255_s19] sm:$0xff] %v787_v31  ;;  %835 = vst [vmem:[%s1255_s19 + $0x80] sm:$0xff] %v803_v32  ;;  %v790_v35 = vadd.f32 %v1043_v33, %v1250_v24  ;;  %v806_v36 = vadd.f32 %v1059_v34, %v1250_v24 }
  0xf3   : > { %v557_v37 = vpop.f32.mrf.mxu0  ;;  %v621_v38 = vpop.f32.mrf.mxu1 }
  0xf4   : > { %822 = vst [vmem:[%s1255_s19 + $0x18] sm:$0xff] %v790_v35  ;;  %838 = vst [vmem:[%s1255_s19 + $0x98] sm:$0xff] %v806_v36  ;;  %v788_v39 = vadd.f32 %v1250_v24, %v557_v37  ;;  %v804_v40 = vadd.f32 %v1250_v24, %v621_v38 }
  0xf5   : > { %v1046_v41 = vpop.f32.mrf.mxu0  ;;  %v1062_v42 = vpop.f32.mrf.mxu1 }
  0xf6   : > { %820 = vst [vmem:[%s1255_s19 + $0x8] sm:$0xff] %v788_v39  ;;  %836 = vst [vmem:[%s1255_s19 + $0x88] sm:$0xff] %v804_v40  ;;  %v793_v43 = vadd.f32 %v1046_v41, %v1250_v24  ;;  %v809_v44 = vadd.f32 %v1062_v42, %v1250_v24 }
  0xf7   : > { %v570_v45 = vpop.f32.mrf.mxu0  ;;  %v634_v46 = vpop.f32.mrf.mxu1 }
  0xf8   : > { %825 = vst [vmem:[%s1255_s19 + $0x30] sm:$0xff] %v793_v43  ;;  %841 = vst [vmem:[%s1255_s19 + $0xb0] sm:$0xff] %v809_v44  ;;  %v791_v47 = vadd.f32 %v1250_v24, %v570_v45  ;;  %v807_v48 = vadd.f32 %v1250_v24, %v634_v46 }
  0xf9   : > { %v1047_v49 = vpop.f32.mrf.mxu0  ;;  %v1063_v50 = vpop.f32.mrf.mxu1 }
  0xfa   : > { %823 = vst [vmem:[%s1255_s19 + $0x20] sm:$0xff] %v791_v47  ;;  %839 = vst [vmem:[%s1255_s19 + $0xa0] sm:$0xff] %v807_v48  ;;  %v794_v51 = vadd.f32 %v1047_v49, %v1250_v24  ;;  %v810_v52 = vadd.f32 %v1063_v50, %v1250_v24 }
  0xfb   : > { %v573_v53 = vpop.f32.mrf.mxu0  ;;  %v637_v54 = vpop.f32.mrf.mxu1 }
  0xfc   : > { %826 = vst [vmem:[%s1255_s19 + $0x38] sm:$0xff] %v794_v51  ;;  %842 = vst [vmem:[%s1255_s19 + $0xb8] sm:$0xff] %v810_v52  ;;  %v792_v55 = vadd.f32 %v1250_v24, %v573_v53  ;;  %v808_v56 = vadd.f32 %v1250_v24, %v637_v54 }
  0xfd   : > { %v1050_v57 = vpop.f32.mrf.mxu0  ;;  %v1066_v58 = vpop.f32.mrf.mxu1 }
  0xfe   : > { %824 = vst [vmem:[%s1255_s19 + $0x28] sm:$0xff] %v792_v55  ;;  %840 = vst [vmem:[%s1255_s19 + $0xa8] sm:$0xff] %v808_v56  ;;  %v797_v59 = vadd.f32 %v1050_v57, %v1250_v24  ;;  %v813_v60 = vadd.f32 %v1066_v58, %v1250_v24 }
  0xff   : > { %v586_v61 = vpop.f32.mrf.mxu0  ;;  %v650_v62 = vpop.f32.mrf.mxu1 }
 0x100   : > { %829 = vst [vmem:[%s1255_s19 + $0x50] sm:$0xff] %v797_v59  ;;  %845 = vst [vmem:[%s1255_s19 + $0xd0] sm:$0xff] %v813_v60  ;;  %v795_v63 = vadd.f32 %v1250_v24, %v586_v61  ;;  %v811_v0 = vadd.f32 %v1250_v24, %v650_v62 }
 0x101   : > { %v1051_v1 = vpop.f32.mrf.mxu0  ;;  %v1067_v2 = vpop.f32.mrf.mxu1 }
 0x102   : > { %827 = vst [vmem:[%s1255_s19 + $0x40] sm:$0xff] %v795_v63  ;;  %843 = vst [vmem:[%s1255_s19 + $0xc0] sm:$0xff] %v811_v0  ;;  %v798_v3 = vadd.f32 %v1051_v1, %v1250_v24  ;;  %v814_v4 = vadd.f32 %v1067_v2, %v1250_v24 }
 0x103   : > { %v589_v5 = vpop.f32.mrf.mxu0  ;;  %v653_v6 = vpop.f32.mrf.mxu1 }
 0x104   : > { %830 = vst [vmem:[%s1255_s19 + $0x58] sm:$0xff] %v798_v3  ;;  %846 = vst [vmem:[%s1255_s19 + $0xd8] sm:$0xff] %v814_v4  ;;  %v796_v7 = vadd.f32 %v1250_v24, %v589_v5  ;;  %v812_v8 = vadd.f32 %v1250_v24, %v653_v6 }
 0x105   : > { %v1054_v9 = vpop.f32.mrf.mxu0  ;;  %v1070_v10 = vpop.f32.mrf.mxu1 }
 0x106   : > { %828 = vst [vmem:[%s1255_s19 + $0x48] sm:$0xff] %v796_v7  ;;  %844 = vst [vmem:[%s1255_s19 + $0xc8] sm:$0xff] %v812_v8  ;;  %v801_v11 = vadd.f32 %v1054_v9, %v1250_v24  ;;  %v817_v12 = vadd.f32 %v1070_v10, %v1250_v24 }
 0x107   : > { %v602_v13 = vpop.f32.mrf.mxu0  ;;  %v666_v14 = vpop.f32.mrf.mxu1 }
 0x108   : > { %833 = vst [vmem:[%s1255_s19 + $0x70] sm:$0xff] %v801_v11  ;;  %849 = vst [vmem:[%s1255_s19 + $0xf0] sm:$0xff] %v817_v12  ;;  %v799_v15 = vadd.f32 %v1250_v24, %v602_v13  ;;  %v815_v16 = vadd.f32 %v1250_v24, %v666_v14 }
 0x109   : > { %v1055_v17 = vpop.f32.mrf.mxu0  ;;  %v1071_v18 = vpop.f32.mrf.mxu1 }
 0x10a   : > { %831 = vst [vmem:[%s1255_s19 + $0x60] sm:$0xff] %v799_v15  ;;  %847 = vst [vmem:[%s1255_s19 + $0xe0] sm:$0xff] %v815_v16  ;;  %v802_v19 = vadd.f32 %v1055_v17, %v1250_v24  ;;  %v818_v20 = vadd.f32 %v1071_v18, %v1250_v24 }
 0x10b   : > { %v605_v21 = vpop.f32.mrf.mxu0  ;;  %v669_v22 = vpop.f32.mrf.mxu1 }
 0x10c   : > { %834 = vst [vmem:[%s1255_s19 + $0x78] sm:$0xff] %v802_v19  ;;  %850 = vst [vmem:[%s1255_s19 + $0xf8] sm:$0xff] %v818_v20  ;;  %v800_v23 = vadd.f32 %v1250_v24, %v605_v21  ;;  %v816_v25 = vadd.f32 %v1250_v24, %v669_v22 }
 0x10e   : > { %832 = vst [vmem:[%s1255_s19 + $0x68] sm:$0xff] %v800_v23  ;;  %848 = vst [vmem:[%s1255_s19 + $0xe8] sm:$0xff] %v816_v25 }
 0x10f PF: > { %s13_s14 = sadd.s32 1, %s1158_s14   ;;  %s1334_s12 = smov %s1154_s13 }
 0x110   : > { %p10_p5 = scmp.ge.s32.totalorder %s13_s14, 10   ;;  %s1335_s13 = smov %s1337_s15 }
 0x112   :  { %12 = sbr.rel (!%p10_p5) target bundleno = 2 (0x2), region = 76 }

</bundles_post_ra>
